<compile_context>
chip_gen: v7x
topology: tpu7x:2x2x1
jax: 0.10.0
libtpu: 0.0.40
codegen_flags: <defaults>
</compile_context>

<pallas_src>
import jax
import jax.numpy as jnp
from jax.experimental import pallas as pl
from jax.experimental.pallas import tpu as pltpu

# ---------------- module hyper-parameters (forward-consistent) ----------------
NOTE_AXIS_LAYERS = 2          # fixed 2-layer LSTM (hardcoded in the kernel)
NOTE_AXIS_UNITS = 32          # LSTM hidden size
TIME_AXIS_UNITS = 32          # per-note time-axis feature width (notes input)
NOTE_UNITS = 3                # (play, replay, volume) -> logits emit NOTE_UNITS-1
INPUT_SIZE = TIME_AXIS_UNITS + NOTE_UNITS

LANE = 128                    # vreg lane width
MAX_BATCH_TILE = 128          # lane-aligned batch tile; 128 keeps the two
                              # software-pipelined (4H, TB) pre-terms at
                              # 16 vregs each (vreg file is 64)


def _round_up(v, m):
    return ((v + m - 1) // m) * m


# ---------------------------- Pallas kernel ----------------------------------
def _note_axis_kernel(x_ref, wih0_ref, whh0_ref, b0_ref,
                      wih1_ref, whh1_ref, b1_ref,
                      wlog_ref, blog_ref,
                      probs_ref, xproj_ref, h1h_ref):
    """One batch-tile of the note-axis forward (batch in lanes).

    x_ref:     (N, D_pad, TB)   concatenated [notes, shift_chosen], zero-padded D
    probs_ref: (NU-1, N*TB)     sigmoid probabilities, lane-dense single store
    xproj_ref: (N, 4H, TB)      VMEM scratch — hoisted layer-0 input projection
    h1h_ref:   (H, N*TB)        VMEM scratch — layer-1 hidden history

    Gate row order of all weights/biases (prepared in the wrapper): [i, f, o | g].
    """
    N = x_ref.shape[0]
    TB = x_ref.shape[2]
    H = whh0_ref.shape[1]                 # whh0ᵀ is (4H, H)

    wih0_t = wih0_ref[...]                # (4H, D_pad)
    whh0_t = whh0_ref[...]                # (4H, H)
    wih1_t = wih1_ref[...]                # (4H, H)
    whh1_t = whh1_ref[...]                # (4H, H)

    # Hoisted bias broadcasts (JAX does not CSE broadcast_in_dim).
    b0b = jnp.broadcast_to(b0_ref[...], (4 * H, TB))
    b1b = jnp.broadcast_to(b1_ref[...], (4 * H, TB))

    # ---- phase 1: hoisted layer-0 input projection (off the serial chain) ---
    for n in range(N):
        xproj_ref[n] = (jnp.dot(wih0_t, x_ref[n],
                                preferred_element_type=jnp.float32) + b0b)

    def combine(gates, c_prev):
        # gate rows [i | f | o | g]: one contiguous 3H sigmoid + one H tanh,
        # all sublane-aligned slices (no lane shuffles).
        sig = jax.nn.sigmoid(gates[:3 * H, :])
        g = jnp.tanh(gates[3 * H:, :])
        i = sig[0 * H:1 * H, :]
        f = sig[1 * H:2 * H, :]
        o = sig[2 * H:3 * H, :]
        c = f * c_prev + i * g
        h = o * jnp.tanh(c)
        return h, c

    zeros_h = jnp.zeros((H, TB), jnp.float32)
    c0 = zeros_h
    c1 = zeros_h
    # Software-pipelined recurrent terms (h_{-1} = 0): the W_hh dots for step
    # n+1 are computed as soon as h_n exists, off the step-(n+1) chain.
    pre0 = None                           # W_hh0ᵀ @ h0_{n-1}
    pre1 = b1b                            # W_hh1ᵀ @ h1_{n-1} + b1

    # ---- phase 2: serial note recurrence, state carried in values ------------
    # TODO(synk): nn.LSTM inter-layer dropout(0.1) is identity in eval mode.
    for n in range(N):
        xp = xproj_ref[n]                                   # (4H, TB)
        g0 = xp if n == 0 else xp + pre0
        h0, c0 = combine(g0, c0)
        if n + 1 < N:
            # needed only at step n+1 -> off the critical chain
            pre0 = jnp.dot(whh0_t, h0, preferred_element_type=jnp.float32)

        # layer 1: only the h0-dependent half sits on the chain
        g1 = jnp.dot(wih1_t, h0, preferred_element_type=jnp.float32) + pre1
        h1, c1 = combine(g1, c1)
        if n + 1 < N:
            pre1 = jnp.dot(whh1_t, h1, preferred_element_type=jnp.float32) + b1b

        h1h_ref[:, pl.ds(n * TB, TB)] = h1                  # off the chain

    # ---- phase 3: one batched logits GEMM + sigmoid + lane-dense store -------
    logits = (jnp.dot(wlog_ref[...], h1h_ref[...],
                      preferred_element_type=jnp.float32)
              + blog_ref[...])                              # (NU-1, N*TB)
    probs_ref[...] = jax.nn.sigmoid(logits)


# ------------------------------ wrapper ---------------------------------------
def note_axis_forward(notes, chosen, params, sample_key):
    """Forward pass of note_axis (to_train=True path), eval-mode dropout.

    notes:  (B, T, N, TIME_AXIS_UNITS)
    chosen: (B, T, N, NOTE_UNITS)
    returns (next_notes (B,T,N,NOTE_UNITS-1), sounds (B,T,N,NOTE_UNITS))
    """
    B, T, N, _ = notes.shape
    NU = chosen.shape[-1]
    H = NOTE_AXIS_UNITS

    # TODO(synk): nn.Dropout(p=0.2) on `chosen` is treated as identity (eval mode).
    # shift_chosen = ZeroPad2d((0,0,1,0))(chosen[:, :, :-1, :])
    shift_chosen = jnp.pad(chosen[:, :, :-1, :],
                           ((0, 0), (0, 0), (1, 0), (0, 0)))
    x = jnp.concatenate([notes, shift_chosen], axis=-1)        # (B,T,N,D_in)
    D_in = x.shape[-1]
    D_pad = _round_up(D_in, 8)                                 # zero-pad K dim

    BT = B * T
    x = x.reshape(BT, N, D_in).astype(jnp.float32)
    if D_pad != D_in:
        x = jnp.pad(x, ((0, 0), (0, 0), (0, D_pad - D_in)))

    # Batch tile: lane-width aligned; >= 2 grid steps when BT is large so both
    # v7x TensorCores get work (no effect on single-TC v5e/v6e).
    if BT <= LANE:
        TB = LANE
    else:
        TB = min(MAX_BATCH_TILE, _round_up(-(-BT // 2), LANE))
    BT_pad = _round_up(BT, TB)
    if BT_pad != BT:
        x = jnp.pad(x, ((0, BT_pad - BT), (0, 0), (0, 0)))
    # (N, D_pad, BT_pad): batch in lanes -> lane-dense input DMA, MXU-ready.
    x = jnp.transpose(x, (1, 2, 0))
    G = BT_pad // TB

    # --- parameter prep: gate reorder [i,f,g,o] -> [i,f,o,g]; transpose -------
    def reorder(w):
        i, f, g, o = jnp.split(w, 4, axis=-1)
        return jnp.concatenate([i, f, o, g], axis=-1)

    wih0_t = reorder(params["wih0"]).T                          # (4H, D_in)
    if D_pad != D_in:
        wih0_t = jnp.pad(wih0_t, ((0, 0), (0, D_pad - D_in)))   # (4H, D_pad)
    whh0_t = reorder(params["whh0"]).T                          # (4H, H)
    b0_c = reorder(params["b0"]).T                              # (4H, 1)
    wih1_t = reorder(params["wih1"]).T                          # (4H, H)
    whh1_t = reorder(params["whh1"]).T                          # (4H, H)
    b1_c = reorder(params["b1"]).T                              # (4H, 1)
    wlog_t = params["wlog"].T                                   # (NU-1, H)
    blog_c = params["blog"].T                                   # (NU-1, 1)

    wspec = lambda arr: pl.BlockSpec(arr.shape, lambda i: (0, 0))

    probs = pl.pallas_call(
        _note_axis_kernel,
        out_shape=jax.ShapeDtypeStruct((NU - 1, N * BT_pad), jnp.float32),
        grid_spec=pltpu.PrefetchScalarGridSpec(
            num_scalar_prefetch=0,
            grid=(G,),
            in_specs=[
                pl.BlockSpec((N, D_pad, TB), lambda i: (0, 0, i)),   # x
                wspec(wih0_t), wspec(whh0_t), wspec(b0_c),
                wspec(wih1_t), wspec(whh1_t), wspec(b1_c),
                wspec(wlog_t), wspec(blog_c),
            ],
            out_specs=pl.BlockSpec((NU - 1, N * TB), lambda i: (0, i)),
            scratch_shapes=[
                pltpu.VMEM((N, 4 * H, TB), jnp.float32),   # hoisted input proj
                pltpu.VMEM((H, N * TB), jnp.float32),      # h1 history
            ],
        ),
        compiler_params=pltpu.CompilerParams(
            dimension_semantics=("parallel",)),
    )(x, wih0_t, whh0_t, b0_c, wih1_t, whh1_t, b1_c, wlog_t, blog_c)

    # Un-scramble lane-dense output: (NU-1, G*N*TB) -> (B, T, N, NU-1)
    probs = probs.reshape(NU - 1, G, N, TB)
    probs = jnp.transpose(probs, (1, 3, 2, 0)).reshape(BT_pad, N, NU - 1)[:BT]
    probs = probs.reshape(B, T, N, NU - 1)

    # sample_sound: Bernoulli sample on probs + volume (first) column, in JAX.
    rand = jax.random.uniform(sample_key, probs.shape, dtype=jnp.float32)
    sample = (rand < probs).astype(jnp.float32)
    sounds = jnp.concatenate([sample, sample[..., :1]], axis=-1)
    return probs, sounds


# ---------------------- pure-JAX reference (for checking) ---------------------
def note_axis_reference(notes, chosen, params, sample_key):
    B, T, N, _ = notes.shape
    NU = chosen.shape[-1]
    H = NOTE_AXIS_UNITS
    shift_chosen = jnp.pad(chosen[:, :, :-1, :],
                           ((0, 0), (0, 0), (1, 0), (0, 0)))
    x = jnp.concatenate([notes, shift_chosen], axis=-1).reshape(B * T, N, -1)

    def cell(xn, h, c, wih, whh, b):
        g = xn @ wih + h @ whh + b
        i, f, gg, o = (jax.nn.sigmoid(g[:, :H]), jax.nn.sigmoid(g[:, H:2 * H]),
                       jnp.tanh(g[:, 2 * H:3 * H]), jax.nn.sigmoid(g[:, 3 * H:]))
        c = f * c + i * gg
        return o * jnp.tanh(c), c

    BT = B * T
    h0 = c0 = h1 = c1 = jnp.zeros((BT, H), jnp.float32)
    probs_list = []
    for n in range(N):
        h0, c0 = cell(x[:, n, :], h0, c0, params["wih0"], params["whh0"],
                      params["b0"][0])
        h1, c1 = cell(h0, h1, c1, params["wih1"], params["whh1"],
                      params["b1"][0])
        probs_list.append(jax.nn.sigmoid(h1 @ params["wlog"] + params["blog"][0]))
    probs = jnp.stack(probs_list, axis=1).reshape(B, T, N, NU - 1)

    rand = jax.random.uniform(sample_key, probs.shape, dtype=jnp.float32)
    sample = (rand < probs).astype(jnp.float32)
    sounds = jnp.concatenate([sample, sample[..., :1]], axis=-1)
    return probs, sounds


# ------------------------------ parameters ------------------------------------
def make_params(key):
    H = NOTE_AXIS_UNITS
    k = 1.0 / jnp.sqrt(jnp.float32(H))
    keys = jax.random.split(key, 10)
    u = lambda kk, shape: jax.random.uniform(kk, shape, jnp.float32, -k, k)
    return {
        # weights stored transposed: x @ W  with W: (in, 4H), gate order [i,f,g,o]
        "wih0": u(keys[0], (INPUT_SIZE, 4 * H)),
        "whh0": u(keys[1], (H, 4 * H)),
        "b0":   u(keys[2], (1, 4 * H)) + u(keys[3], (1, 4 * H)),  # b_ih + b_hh
        "wih1": u(keys[4], (H, 4 * H)),
        "whh1": u(keys[5], (H, 4 * H)),
        "b1":   u(keys[6], (1, 4 * H)) + u(keys[7], (1, 4 * H)),
        "wlog": u(keys[8], (H, NOTE_UNITS - 1)),
        "blog": u(keys[9], (1, NOTE_UNITS - 1)),
    }


# --------------------------------- main ----------------------------------------
if __name__ == "__main__":
    key = jax.random.PRNGKey(0)
    k_notes, k_chosen, k_params, k_sample = jax.random.split(key, 4)

    B, T, N = 2, 4, 8
    notes = jax.random.normal(k_notes, (B, T, N, TIME_AXIS_UNITS), jnp.float32)
    chosen = (jax.random.uniform(k_chosen, (B, T, N, NOTE_UNITS)) > 0.5
              ).astype(jnp.float32)
    params = make_params(k_params)

    next_notes, sounds = note_axis_forward(notes, chosen, params, k_sample)
    next_notes, sounds = jax.block_until_ready((next_notes, sounds))

    ref_notes, ref_sounds = note_axis_reference(notes, chosen, params, k_sample)

    assert next_notes.shape == (B, T, N, NOTE_UNITS - 1)
    assert sounds.shape == (B, T, N, NOTE_UNITS)
    assert jnp.allclose(next_notes, ref_notes, rtol=1e-5, atol=1e-5)
    # Samples can only differ where a uniform lands within float error of the
    # probability; accept at most a couple of flipped entries.
    assert int(jnp.sum(sounds != ref_sounds)) <= 2
    # volume column must be a copy of the first sampled column
    assert jnp.array_equal(sounds[..., -1], sounds[..., 0])

    print("KERNEL_OK")
</pallas_src>

<mosaic_0001>
module attributes {stable_mosaic.version = 11 : i64} {
  func.func @_note_axis_kernel(%arg0: i32, %arg1: memref<8x40x128xf32, #tpu.memory_space<vmem>>, %arg2: memref<128x40xf32, #tpu.memory_space<vmem>>, %arg3: memref<128x32xf32, #tpu.memory_space<vmem>>, %arg4: memref<128x1xf32, #tpu.memory_space<vmem>>, %arg5: memref<128x32xf32, #tpu.memory_space<vmem>>, %arg6: memref<128x32xf32, #tpu.memory_space<vmem>>, %arg7: memref<128x1xf32, #tpu.memory_space<vmem>>, %arg8: memref<2x32xf32, #tpu.memory_space<vmem>>, %arg9: memref<2x1xf32, #tpu.memory_space<vmem>>, %arg10: memref<2x1024xf32, #tpu.memory_space<vmem>>, %arg11: memref<8x128x128xf32, #tpu.memory_space<vmem>>, %arg12: memref<32x1024xf32, #tpu.memory_space<vmem>>) attributes {dimension_semantics = [#tpu.dimension_semantics<parallel>], iteration_bounds = array<i64: 1>, scalar_prefetch = 0 : i64, scratch_operands = 2 : i64, tpu.core_type = #tpu.core_type<tc>, window_params = [{transform_indices = @transform_0, window_bounds = array<i64: 8, 40, 128>}, {pipeline_mode = #tpu.pipeline_mode<synchronous>, transform_indices = @transform_1, window_bounds = array<i64: 128, 40>}, {pipeline_mode = #tpu.pipeline_mode<synchronous>, transform_indices = @transform_2, window_bounds = array<i64: 128, 32>}, {pipeline_mode = #tpu.pipeline_mode<synchronous>, transform_indices = @transform_3, window_bounds = array<i64: 128, 1>}, {pipeline_mode = #tpu.pipeline_mode<synchronous>, transform_indices = @transform_4, window_bounds = array<i64: 128, 32>}, {pipeline_mode = #tpu.pipeline_mode<synchronous>, transform_indices = @transform_5, window_bounds = array<i64: 128, 32>}, {pipeline_mode = #tpu.pipeline_mode<synchronous>, transform_indices = @transform_6, window_bounds = array<i64: 128, 1>}, {pipeline_mode = #tpu.pipeline_mode<synchronous>, transform_indices = @transform_7, window_bounds = array<i64: 2, 32>}, {pipeline_mode = #tpu.pipeline_mode<synchronous>, transform_indices = @transform_8, window_bounds = array<i64: 2, 1>}, {transform_indices = @transform_9, window_bounds = array<i64: 2, 1024>}]} {
    %c0 = arith.constant 0 : index
    %c0_0 = arith.constant 0 : index
    %0 = vector.load %arg2[%c0, %c0_0] : memref<128x40xf32, #tpu.memory_space<vmem>>, vector<128x40xf32>
    %c0_1 = arith.constant 0 : index
    %c0_2 = arith.constant 0 : index
    %1 = vector.load %arg3[%c0_1, %c0_2] : memref<128x32xf32, #tpu.memory_space<vmem>>, vector<128x32xf32>
    %c0_3 = arith.constant 0 : index
    %c0_4 = arith.constant 0 : index
    %2 = vector.load %arg5[%c0_3, %c0_4] : memref<128x32xf32, #tpu.memory_space<vmem>>, vector<128x32xf32>
    %c0_5 = arith.constant 0 : index
    %c0_6 = arith.constant 0 : index
    %3 = vector.load %arg6[%c0_5, %c0_6] : memref<128x32xf32, #tpu.memory_space<vmem>>, vector<128x32xf32>
    %c0_7 = arith.constant 0 : index
    %c0_8 = arith.constant 0 : index
    %4 = vector.load %arg4[%c0_7, %c0_8] : memref<128x1xf32, #tpu.memory_space<vmem>>, vector<128x1xf32>
    %5 = vector.shape_cast %4 : vector<128x1xf32> to vector<128x1xf32>
    %6 = vector.broadcast %5 : vector<128x1xf32> to vector<128x128xf32>
    %c0_9 = arith.constant 0 : index
    %c0_10 = arith.constant 0 : index
    %7 = vector.load %arg7[%c0_9, %c0_10] : memref<128x1xf32, #tpu.memory_space<vmem>>, vector<128x1xf32>
    %8 = vector.shape_cast %7 : vector<128x1xf32> to vector<128x1xf32>
    %9 = vector.broadcast %8 : vector<128x1xf32> to vector<128x128xf32>
    %c0_11 = arith.constant 0 : index
    %c0_12 = arith.constant 0 : index
    %c0_13 = arith.constant 0 : index
    %10 = vector.load %arg1[%c0_11, %c0_12, %c0_13] : memref<8x40x128xf32, #tpu.memory_space<vmem>>, vector<1x40x128xf32>
    %11 = vector.shape_cast %10 : vector<1x40x128xf32> to vector<40x128xf32>
    %cst = arith.constant dense<0.000000e+00> : vector<128x128xf32>
    %12 = tpu.matmul %0, %11, %cst {dimension_numbers = #tpu.dot_dimension_numbers<[1], [0], [0], [1], [0, 0, 1, 1], [], []>} : vector<128x40xf32>, vector<40x128xf32>, vector<128x128xf32> -> vector<128x128xf32>
    %13 = arith.addf %12, %6 : vector<128x128xf32>
    %c0_14 = arith.constant 0 : index
    %c0_15 = arith.constant 0 : index
    %c0_16 = arith.constant 0 : index
    %14 = vector.load %arg11[%c0_14, %c0_15, %c0_16] : memref<8x128x128xf32, #tpu.memory_space<vmem>>, vector<1x128x128xf32>
    %15 = vector.shape_cast %14 : vector<1x128x128xf32> to vector<128x128xf32>
    %16 = vector.shape_cast %13 : vector<128x128xf32> to vector<1x128x128xf32>
    tpu.vector_store %arg11[%c0_14, %c0_15, %c0_16], %16 {strides = array<i32>} : memref<8x128x128xf32, #tpu.memory_space<vmem>>, vector<1x128x128xf32>,
    %c1 = arith.constant 1 : index
    %c0_17 = arith.constant 0 : index
    %c0_18 = arith.constant 0 : index
    %17 = vector.load %arg1[%c1, %c0_17, %c0_18] : memref<8x40x128xf32, #tpu.memory_space<vmem>>, vector<1x40x128xf32>
    %18 = vector.shape_cast %17 : vector<1x40x128xf32> to vector<40x128xf32>
    %cst_19 = arith.constant dense<0.000000e+00> : vector<128x128xf32>
    %19 = tpu.matmul %0, %18, %cst_19 {dimension_numbers = #tpu.dot_dimension_numbers<[1], [0], [0], [1], [0, 0, 1, 1], [], []>} : vector<128x40xf32>, vector<40x128xf32>, vector<128x128xf32> -> vector<128x128xf32>
    %20 = arith.addf %19, %6 : vector<128x128xf32>
    %c1_20 = arith.constant 1 : index
    %c0_21 = arith.constant 0 : index
    %c0_22 = arith.constant 0 : index
    %21 = vector.load %arg11[%c1_20, %c0_21, %c0_22] : memref<8x128x128xf32, #tpu.memory_space<vmem>>, vector<1x128x128xf32>
    %22 = vector.shape_cast %21 : vector<1x128x128xf32> to vector<128x128xf32>
    %23 = vector.shape_cast %20 : vector<128x128xf32> to vector<1x128x128xf32>
    tpu.vector_store %arg11[%c1_20, %c0_21, %c0_22], %23 {strides = array<i32>} : memref<8x128x128xf32, #tpu.memory_space<vmem>>, vector<1x128x128xf32>,
    %c2 = arith.constant 2 : index
    %c0_23 = arith.constant 0 : index
    %c0_24 = arith.constant 0 : index
    %24 = vector.load %arg1[%c2, %c0_23, %c0_24] : memref<8x40x128xf32, #tpu.memory_space<vmem>>, vector<1x40x128xf32>
    %25 = vector.shape_cast %24 : vector<1x40x128xf32> to vector<40x128xf32>
    %cst_25 = arith.constant dense<0.000000e+00> : vector<128x128xf32>
    %26 = tpu.matmul %0, %25, %cst_25 {dimension_numbers = #tpu.dot_dimension_numbers<[1], [0], [0], [1], [0, 0, 1, 1], [], []>} : vector<128x40xf32>, vector<40x128xf32>, vector<128x128xf32> -> vector<128x128xf32>
    %27 = arith.addf %26, %6 : vector<128x128xf32>
    %c2_26 = arith.constant 2 : index
    %c0_27 = arith.constant 0 : index
    %c0_28 = arith.constant 0 : index
    %28 = vector.load %arg11[%c2_26, %c0_27, %c0_28] : memref<8x128x128xf32, #tpu.memory_space<vmem>>, vector<1x128x128xf32>
    %29 = vector.shape_cast %28 : vector<1x128x128xf32> to vector<128x128xf32>
    %30 = vector.shape_cast %27 : vector<128x128xf32> to vector<1x128x128xf32>
    tpu.vector_store %arg11[%c2_26, %c0_27, %c0_28], %30 {strides = array<i32>} : memref<8x128x128xf32, #tpu.memory_space<vmem>>, vector<1x128x128xf32>,
    %c3 = arith.constant 3 : index
    %c0_29 = arith.constant 0 : index
    %c0_30 = arith.constant 0 : index
    %31 = vector.load %arg1[%c3, %c0_29, %c0_30] : memref<8x40x128xf32, #tpu.memory_space<vmem>>, vector<1x40x128xf32>
    %32 = vector.shape_cast %31 : vector<1x40x128xf32> to vector<40x128xf32>
    %cst_31 = arith.constant dense<0.000000e+00> : vector<128x128xf32>
    %33 = tpu.matmul %0, %32, %cst_31 {dimension_numbers = #tpu.dot_dimension_numbers<[1], [0], [0], [1], [0, 0, 1, 1], [], []>} : vector<128x40xf32>, vector<40x128xf32>, vector<128x128xf32> -> vector<128x128xf32>
    %34 = arith.addf %33, %6 : vector<128x128xf32>
    %c3_32 = arith.constant 3 : index
    %c0_33 = arith.constant 0 : index
    %c0_34 = arith.constant 0 : index
    %35 = vector.load %arg11[%c3_32, %c0_33, %c0_34] : memref<8x128x128xf32, #tpu.memory_space<vmem>>, vector<1x128x128xf32>
    %36 = vector.shape_cast %35 : vector<1x128x128xf32> to vector<128x128xf32>
    %37 = vector.shape_cast %34 : vector<128x128xf32> to vector<1x128x128xf32>
    tpu.vector_store %arg11[%c3_32, %c0_33, %c0_34], %37 {strides = array<i32>} : memref<8x128x128xf32, #tpu.memory_space<vmem>>, vector<1x128x128xf32>,
    %c4 = arith.constant 4 : index
    %c0_35 = arith.constant 0 : index
    %c0_36 = arith.constant 0 : index
    %38 = vector.load %arg1[%c4, %c0_35, %c0_36] : memref<8x40x128xf32, #tpu.memory_space<vmem>>, vector<1x40x128xf32>
    %39 = vector.shape_cast %38 : vector<1x40x128xf32> to vector<40x128xf32>
    %cst_37 = arith.constant dense<0.000000e+00> : vector<128x128xf32>
    %40 = tpu.matmul %0, %39, %cst_37 {dimension_numbers = #tpu.dot_dimension_numbers<[1], [0], [0], [1], [0, 0, 1, 1], [], []>} : vector<128x40xf32>, vector<40x128xf32>, vector<128x128xf32> -> vector<128x128xf32>
    %41 = arith.addf %40, %6 : vector<128x128xf32>
    %c4_38 = arith.constant 4 : index
    %c0_39 = arith.constant 0 : index
    %c0_40 = arith.constant 0 : index
    %42 = vector.load %arg11[%c4_38, %c0_39, %c0_40] : memref<8x128x128xf32, #tpu.memory_space<vmem>>, vector<1x128x128xf32>
    %43 = vector.shape_cast %42 : vector<1x128x128xf32> to vector<128x128xf32>
    %44 = vector.shape_cast %41 : vector<128x128xf32> to vector<1x128x128xf32>
    tpu.vector_store %arg11[%c4_38, %c0_39, %c0_40], %44 {strides = array<i32>} : memref<8x128x128xf32, #tpu.memory_space<vmem>>, vector<1x128x128xf32>,
    %c5 = arith.constant 5 : index
    %c0_41 = arith.constant 0 : index
    %c0_42 = arith.constant 0 : index
    %45 = vector.load %arg1[%c5, %c0_41, %c0_42] : memref<8x40x128xf32, #tpu.memory_space<vmem>>, vector<1x40x128xf32>
    %46 = vector.shape_cast %45 : vector<1x40x128xf32> to vector<40x128xf32>
    %cst_43 = arith.constant dense<0.000000e+00> : vector<128x128xf32>
    %47 = tpu.matmul %0, %46, %cst_43 {dimension_numbers = #tpu.dot_dimension_numbers<[1], [0], [0], [1], [0, 0, 1, 1], [], []>} : vector<128x40xf32>, vector<40x128xf32>, vector<128x128xf32> -> vector<128x128xf32>
    %48 = arith.addf %47, %6 : vector<128x128xf32>
    %c5_44 = arith.constant 5 : index
    %c0_45 = arith.constant 0 : index
    %c0_46 = arith.constant 0 : index
    %49 = vector.load %arg11[%c5_44, %c0_45, %c0_46] : memref<8x128x128xf32, #tpu.memory_space<vmem>>, vector<1x128x128xf32>
    %50 = vector.shape_cast %49 : vector<1x128x128xf32> to vector<128x128xf32>
    %51 = vector.shape_cast %48 : vector<128x128xf32> to vector<1x128x128xf32>
    tpu.vector_store %arg11[%c5_44, %c0_45, %c0_46], %51 {strides = array<i32>} : memref<8x128x128xf32, #tpu.memory_space<vmem>>, vector<1x128x128xf32>,
    %c6 = arith.constant 6 : index
    %c0_47 = arith.constant 0 : index
    %c0_48 = arith.constant 0 : index
    %52 = vector.load %arg1[%c6, %c0_47, %c0_48] : memref<8x40x128xf32, #tpu.memory_space<vmem>>, vector<1x40x128xf32>
    %53 = vector.shape_cast %52 : vector<1x40x128xf32> to vector<40x128xf32>
    %cst_49 = arith.constant dense<0.000000e+00> : vector<128x128xf32>
    %54 = tpu.matmul %0, %53, %cst_49 {dimension_numbers = #tpu.dot_dimension_numbers<[1], [0], [0], [1], [0, 0, 1, 1], [], []>} : vector<128x40xf32>, vector<40x128xf32>, vector<128x128xf32> -> vector<128x128xf32>
    %55 = arith.addf %54, %6 : vector<128x128xf32>
    %c6_50 = arith.constant 6 : index
    %c0_51 = arith.constant 0 : index
    %c0_52 = arith.constant 0 : index
    %56 = vector.load %arg11[%c6_50, %c0_51, %c0_52] : memref<8x128x128xf32, #tpu.memory_space<vmem>>, vector<1x128x128xf32>
    %57 = vector.shape_cast %56 : vector<1x128x128xf32> to vector<128x128xf32>
    %58 = vector.shape_cast %55 : vector<128x128xf32> to vector<1x128x128xf32>
    tpu.vector_store %arg11[%c6_50, %c0_51, %c0_52], %58 {strides = array<i32>} : memref<8x128x128xf32, #tpu.memory_space<vmem>>, vector<1x128x128xf32>,
    %c7 = arith.constant 7 : index
    %c0_53 = arith.constant 0 : index
    %c0_54 = arith.constant 0 : index
    %59 = vector.load %arg1[%c7, %c0_53, %c0_54] : memref<8x40x128xf32, #tpu.memory_space<vmem>>, vector<1x40x128xf32>
    %60 = vector.shape_cast %59 : vector<1x40x128xf32> to vector<40x128xf32>
    %cst_55 = arith.constant dense<0.000000e+00> : vector<128x128xf32>
    %61 = tpu.matmul %0, %60, %cst_55 {dimension_numbers = #tpu.dot_dimension_numbers<[1], [0], [0], [1], [0, 0, 1, 1], [], []>} : vector<128x40xf32>, vector<40x128xf32>, vector<128x128xf32> -> vector<128x128xf32>
    %62 = arith.addf %61, %6 : vector<128x128xf32>
    %c7_56 = arith.constant 7 : index
    %c0_57 = arith.constant 0 : index
    %c0_58 = arith.constant 0 : index
    %63 = vector.load %arg11[%c7_56, %c0_57, %c0_58] : memref<8x128x128xf32, #tpu.memory_space<vmem>>, vector<1x128x128xf32>
    %64 = vector.shape_cast %63 : vector<1x128x128xf32> to vector<128x128xf32>
    %65 = vector.shape_cast %62 : vector<128x128xf32> to vector<1x128x128xf32>
    tpu.vector_store %arg11[%c7_56, %c0_57, %c0_58], %65 {strides = array<i32>} : memref<8x128x128xf32, #tpu.memory_space<vmem>>, vector<1x128x128xf32>,
    %cst_59 = arith.constant 0.000000e+00 : f32
    %66 = vector.broadcast %cst_59 : f32 to vector<32x128xf32>
    %c0_60 = arith.constant 0 : index
    %c0_61 = arith.constant 0 : index
    %c0_62 = arith.constant 0 : index
    %67 = vector.load %arg11[%c0_60, %c0_61, %c0_62] : memref<8x128x128xf32, #tpu.memory_space<vmem>>, vector<1x128x128xf32>
    %68 = vector.shape_cast %67 : vector<1x128x128xf32> to vector<128x128xf32>
    %69 = vector.extract_strided_slice %68 {offsets = [0, 0], sizes = [96, 128], strides = [1, 1]} : vector<128x128xf32> to vector<96x128xf32>
    %70 = arith.negf %69 : vector<96x128xf32>
    %71 = math.exp %70 : vector<96x128xf32>
    %cst_63 = arith.constant 1.000000e+00 : f32
    %72 = vector.broadcast %cst_63 : f32 to vector<96x128xf32>
    %73 = arith.addf %72, %71 : vector<96x128xf32>
    %74 = arith.divf %72, %73 : vector<96x128xf32>
    %75 = vector.extract_strided_slice %68 {offsets = [96, 0], sizes = [32, 128], strides = [1, 1]} : vector<128x128xf32> to vector<32x128xf32>
    %76 = math.tanh %75 : vector<32x128xf32>
    %77 = vector.extract_strided_slice %74 {offsets = [0, 0], sizes = [32, 128], strides = [1, 1]} : vector<96x128xf32> to vector<32x128xf32>
    %78 = vector.extract_strided_slice %74 {offsets = [32, 0], sizes = [32, 128], strides = [1, 1]} : vector<96x128xf32> to vector<32x128xf32>
    %79 = vector.extract_strided_slice %74 {offsets = [64, 0], sizes = [32, 128], strides = [1, 1]} : vector<96x128xf32> to vector<32x128xf32>
    %80 = arith.mulf %78, %66 : vector<32x128xf32>
    %81 = arith.mulf %77, %76 : vector<32x128xf32>
    %82 = arith.addf %80, %81 : vector<32x128xf32>
    %83 = math.tanh %82 : vector<32x128xf32>
    %84 = arith.mulf %79, %83 : vector<32x128xf32>
    %cst_64 = arith.constant dense<0.000000e+00> : vector<128x128xf32>
    %85 = tpu.matmul %1, %84, %cst_64 {dimension_numbers = #tpu.dot_dimension_numbers<[1], [0], [0], [1], [0, 0, 1, 1], [], []>} : vector<128x32xf32>, vector<32x128xf32>, vector<128x128xf32> -> vector<128x128xf32>
    %cst_65 = arith.constant dense<0.000000e+00> : vector<128x128xf32>
    %86 = tpu.matmul %2, %84, %cst_65 {dimension_numbers = #tpu.dot_dimension_numbers<[1], [0], [0], [1], [0, 0, 1, 1], [], []>} : vector<128x32xf32>, vector<32x128xf32>, vector<128x128xf32> -> vector<128x128xf32>
    %87 = arith.addf %86, %9 : vector<128x128xf32>
    %88 = vector.extract_strided_slice %87 {offsets = [0, 0], sizes = [96, 128], strides = [1, 1]} : vector<128x128xf32> to vector<96x128xf32>
    %89 = arith.negf %88 : vector<96x128xf32>
    %90 = math.exp %89 : vector<96x128xf32>
    %cst_66 = arith.constant 1.000000e+00 : f32
    %91 = vector.broadcast %cst_66 : f32 to vector<96x128xf32>
    %92 = arith.addf %91, %90 : vector<96x128xf32>
    %93 = arith.divf %91, %92 : vector<96x128xf32>
    %94 = vector.extract_strided_slice %87 {offsets = [96, 0], sizes = [32, 128], strides = [1, 1]} : vector<128x128xf32> to vector<32x128xf32>
    %95 = math.tanh %94 : vector<32x128xf32>
    %96 = vector.extract_strided_slice %93 {offsets = [0, 0], sizes = [32, 128], strides = [1, 1]} : vector<96x128xf32> to vector<32x128xf32>
    %97 = vector.extract_strided_slice %93 {offsets = [32, 0], sizes = [32, 128], strides = [1, 1]} : vector<96x128xf32> to vector<32x128xf32>
    %98 = vector.extract_strided_slice %93 {offsets = [64, 0], sizes = [32, 128], strides = [1, 1]} : vector<96x128xf32> to vector<32x128xf32>
    %99 = arith.mulf %97, %66 : vector<32x128xf32>
    %100 = arith.mulf %96, %95 : vector<32x128xf32>
    %101 = arith.addf %99, %100 : vector<32x128xf32>
    %102 = math.tanh %101 : vector<32x128xf32>
    %103 = arith.mulf %98, %102 : vector<32x128xf32>
    %cst_67 = arith.constant dense<0.000000e+00> : vector<128x128xf32>
    %104 = tpu.matmul %3, %103, %cst_67 {dimension_numbers = #tpu.dot_dimension_numbers<[1], [0], [0], [1], [0, 0, 1, 1], [], []>} : vector<128x32xf32>, vector<32x128xf32>, vector<128x128xf32> -> vector<128x128xf32>
    %105 = arith.addf %104, %9 : vector<128x128xf32>
    %c0_68 = arith.constant 0 : index
    %c0_69 = arith.constant 0 : index
    %106 = vector.load %arg12[%c0_68, %c0_69] : memref<32x1024xf32, #tpu.memory_space<vmem>>, vector<32x128xf32>
    tpu.vector_store %arg12[%c0_68, %c0_69], %103 {strides = array<i32>} : memref<32x1024xf32, #tpu.memory_space<vmem>>, vector<32x128xf32>,
    %c1_70 = arith.constant 1 : index
    %c0_71 = arith.constant 0 : index
    %c0_72 = arith.constant 0 : index
    %107 = vector.load %arg11[%c1_70, %c0_71, %c0_72] : memref<8x128x128xf32, #tpu.memory_space<vmem>>, vector<1x128x128xf32>
    %108 = vector.shape_cast %107 : vector<1x128x128xf32> to vector<128x128xf32>
    %109 = arith.addf %108, %85 : vector<128x128xf32>
    %110 = vector.extract_strided_slice %109 {offsets = [0, 0], sizes = [96, 128], strides = [1, 1]} : vector<128x128xf32> to vector<96x128xf32>
    %111 = arith.negf %110 : vector<96x128xf32>
    %112 = math.exp %111 : vector<96x128xf32>
    %cst_73 = arith.constant 1.000000e+00 : f32
    %113 = vector.broadcast %cst_73 : f32 to vector<96x128xf32>
    %114 = arith.addf %113, %112 : vector<96x128xf32>
    %115 = arith.divf %113, %114 : vector<96x128xf32>
    %116 = vector.extract_strided_slice %109 {offsets = [96, 0], sizes = [32, 128], strides = [1, 1]} : vector<128x128xf32> to vector<32x128xf32>
    %117 = math.tanh %116 : vector<32x128xf32>
    %118 = vector.extract_strided_slice %115 {offsets = [0, 0], sizes = [32, 128], strides = [1, 1]} : vector<96x128xf32> to vector<32x128xf32>
    %119 = vector.extract_strided_slice %115 {offsets = [32, 0], sizes = [32, 128], strides = [1, 1]} : vector<96x128xf32> to vector<32x128xf32>
    %120 = vector.extract_strided_slice %115 {offsets = [64, 0], sizes = [32, 128], strides = [1, 1]} : vector<96x128xf32> to vector<32x128xf32>
    %121 = arith.mulf %119, %82 : vector<32x128xf32>
    %122 = arith.mulf %118, %117 : vector<32x128xf32>
    %123 = arith.addf %121, %122 : vector<32x128xf32>
    %124 = math.tanh %123 : vector<32x128xf32>
    %125 = arith.mulf %120, %124 : vector<32x128xf32>
    %cst_74 = arith.constant dense<0.000000e+00> : vector<128x128xf32>
    %126 = tpu.matmul %1, %125, %cst_74 {dimension_numbers = #tpu.dot_dimension_numbers<[1], [0], [0], [1], [0, 0, 1, 1], [], []>} : vector<128x32xf32>, vector<32x128xf32>, vector<128x128xf32> -> vector<128x128xf32>
    %cst_75 = arith.constant dense<0.000000e+00> : vector<128x128xf32>
    %127 = tpu.matmul %2, %125, %cst_75 {dimension_numbers = #tpu.dot_dimension_numbers<[1], [0], [0], [1], [0, 0, 1, 1], [], []>} : vector<128x32xf32>, vector<32x128xf32>, vector<128x128xf32> -> vector<128x128xf32>
    %128 = arith.addf %127, %105 : vector<128x128xf32>
    %129 = vector.extract_strided_slice %128 {offsets = [0, 0], sizes = [96, 128], strides = [1, 1]} : vector<128x128xf32> to vector<96x128xf32>
    %130 = arith.negf %129 : vector<96x128xf32>
    %131 = math.exp %130 : vector<96x128xf32>
    %cst_76 = arith.constant 1.000000e+00 : f32
    %132 = vector.broadcast %cst_76 : f32 to vector<96x128xf32>
    %133 = arith.addf %132, %131 : vector<96x128xf32>
    %134 = arith.divf %132, %133 : vector<96x128xf32>
    %135 = vector.extract_strided_slice %128 {offsets = [96, 0], sizes = [32, 128], strides = [1, 1]} : vector<128x128xf32> to vector<32x128xf32>
    %136 = math.tanh %135 : vector<32x128xf32>
    %137 = vector.extract_strided_slice %134 {offsets = [0, 0], sizes = [32, 128], strides = [1, 1]} : vector<96x128xf32> to vector<32x128xf32>
    %138 = vector.extract_strided_slice %134 {offsets = [32, 0], sizes = [32, 128], strides = [1, 1]} : vector<96x128xf32> to vector<32x128xf32>
    %139 = vector.extract_strided_slice %134 {offsets = [64, 0], sizes = [32, 128], strides = [1, 1]} : vector<96x128xf32> to vector<32x128xf32>
    %140 = arith.mulf %138, %101 : vector<32x128xf32>
    %141 = arith.mulf %137, %136 : vector<32x128xf32>
    %142 = arith.addf %140, %141 : vector<32x128xf32>
    %143 = math.tanh %142 : vector<32x128xf32>
    %144 = arith.mulf %139, %143 : vector<32x128xf32>
    %cst_77 = arith.constant dense<0.000000e+00> : vector<128x128xf32>
    %145 = tpu.matmul %3, %144, %cst_77 {dimension_numbers = #tpu.dot_dimension_numbers<[1], [0], [0], [1], [0, 0, 1, 1], [], []>} : vector<128x32xf32>, vector<32x128xf32>, vector<128x128xf32> -> vector<128x128xf32>
    %146 = arith.addf %145, %9 : vector<128x128xf32>
    %c0_78 = arith.constant 0 : index
    %c128 = arith.constant 128 : index
    %147 = vector.load %arg12[%c0_78, %c128] : memref<32x1024xf32, #tpu.memory_space<vmem>>, vector<32x128xf32>
    tpu.vector_store %arg12[%c0_78, %c128], %144 {strides = array<i32>} : memref<32x1024xf32, #tpu.memory_space<vmem>>, vector<32x128xf32>,
    %c2_79 = arith.constant 2 : index
    %c0_80 = arith.constant 0 : index
    %c0_81 = arith.constant 0 : index
    %148 = vector.load %arg11[%c2_79, %c0_80, %c0_81] : memref<8x128x128xf32, #tpu.memory_space<vmem>>, vector<1x128x128xf32>
    %149 = vector.shape_cast %148 : vector<1x128x128xf32> to vector<128x128xf32>
    %150 = arith.addf %149, %126 : vector<128x128xf32>
    %151 = vector.extract_strided_slice %150 {offsets = [0, 0], sizes = [96, 128], strides = [1, 1]} : vector<128x128xf32> to vector<96x128xf32>
    %152 = arith.negf %151 : vector<96x128xf32>
    %153 = math.exp %152 : vector<96x128xf32>
    %cst_82 = arith.constant 1.000000e+00 : f32
    %154 = vector.broadcast %cst_82 : f32 to vector<96x128xf32>
    %155 = arith.addf %154, %153 : vector<96x128xf32>
    %156 = arith.divf %154, %155 : vector<96x128xf32>
    %157 = vector.extract_strided_slice %150 {offsets = [96, 0], sizes = [32, 128], strides = [1, 1]} : vector<128x128xf32> to vector<32x128xf32>
    %158 = math.tanh %157 : vector<32x128xf32>
    %159 = vector.extract_strided_slice %156 {offsets = [0, 0], sizes = [32, 128], strides = [1, 1]} : vector<96x128xf32> to vector<32x128xf32>
    %160 = vector.extract_strided_slice %156 {offsets = [32, 0], sizes = [32, 128], strides = [1, 1]} : vector<96x128xf32> to vector<32x128xf32>
    %161 = vector.extract_strided_slice %156 {offsets = [64, 0], sizes = [32, 128], strides = [1, 1]} : vector<96x128xf32> to vector<32x128xf32>
    %162 = arith.mulf %160, %123 : vector<32x128xf32>
    %163 = arith.mulf %159, %158 : vector<32x128xf32>
    %164 = arith.addf %162, %163 : vector<32x128xf32>
    %165 = math.tanh %164 : vector<32x128xf32>
    %166 = arith.mulf %161, %165 : vector<32x128xf32>
    %cst_83 = arith.constant dense<0.000000e+00> : vector<128x128xf32>
    %167 = tpu.matmul %1, %166, %cst_83 {dimension_numbers = #tpu.dot_dimension_numbers<[1], [0], [0], [1], [0, 0, 1, 1], [], []>} : vector<128x32xf32>, vector<32x128xf32>, vector<128x128xf32> -> vector<128x128xf32>
    %cst_84 = arith.constant dense<0.000000e+00> : vector<128x128xf32>
    %168 = tpu.matmul %2, %166, %cst_84 {dimension_numbers = #tpu.dot_dimension_numbers<[1], [0], [0], [1], [0, 0, 1, 1], [], []>} : vector<128x32xf32>, vector<32x128xf32>, vector<128x128xf32> -> vector<128x128xf32>
    %169 = arith.addf %168, %146 : vector<128x128xf32>
    %170 = vector.extract_strided_slice %169 {offsets = [0, 0], sizes = [96, 128], strides = [1, 1]} : vector<128x128xf32> to vector<96x128xf32>
    %171 = arith.negf %170 : vector<96x128xf32>
    %172 = math.exp %171 : vector<96x128xf32>
    %cst_85 = arith.constant 1.000000e+00 : f32
    %173 = vector.broadcast %cst_85 : f32 to vector<96x128xf32>
    %174 = arith.addf %173, %172 : vector<96x128xf32>
    %175 = arith.divf %173, %174 : vector<96x128xf32>
    %176 = vector.extract_strided_slice %169 {offsets = [96, 0], sizes = [32, 128], strides = [1, 1]} : vector<128x128xf32> to vector<32x128xf32>
    %177 = math.tanh %176 : vector<32x128xf32>
    %178 = vector.extract_strided_slice %175 {offsets = [0, 0], sizes = [32, 128], strides = [1, 1]} : vector<96x128xf32> to vector<32x128xf32>
    %179 = vector.extract_strided_slice %175 {offsets = [32, 0], sizes = [32, 128], strides = [1, 1]} : vector<96x128xf32> to vector<32x128xf32>
    %180 = vector.extract_strided_slice %175 {offsets = [64, 0], sizes = [32, 128], strides = [1, 1]} : vector<96x128xf32> to vector<32x128xf32>
    %181 = arith.mulf %179, %142 : vector<32x128xf32>
    %182 = arith.mulf %178, %177 : vector<32x128xf32>
    %183 = arith.addf %181, %182 : vector<32x128xf32>
    %184 = math.tanh %183 : vector<32x128xf32>
    %185 = arith.mulf %180, %184 : vector<32x128xf32>
    %cst_86 = arith.constant dense<0.000000e+00> : vector<128x128xf32>
    %186 = tpu.matmul %3, %185, %cst_86 {dimension_numbers = #tpu.dot_dimension_numbers<[1], [0], [0], [1], [0, 0, 1, 1], [], []>} : vector<128x32xf32>, vector<32x128xf32>, vector<128x128xf32> -> vector<128x128xf32>
    %187 = arith.addf %186, %9 : vector<128x128xf32>
    %c0_87 = arith.constant 0 : index
    %c256 = arith.constant 256 : index
    %188 = vector.load %arg12[%c0_87, %c256] : memref<32x1024xf32, #tpu.memory_space<vmem>>, vector<32x128xf32>
    tpu.vector_store %arg12[%c0_87, %c256], %185 {strides = array<i32>} : memref<32x1024xf32, #tpu.memory_space<vmem>>, vector<32x128xf32>,
    %c3_88 = arith.constant 3 : index
    %c0_89 = arith.constant 0 : index
    %c0_90 = arith.constant 0 : index
    %189 = vector.load %arg11[%c3_88, %c0_89, %c0_90] : memref<8x128x128xf32, #tpu.memory_space<vmem>>, vector<1x128x128xf32>
    %190 = vector.shape_cast %189 : vector<1x128x128xf32> to vector<128x128xf32>
    %191 = arith.addf %190, %167 : vector<128x128xf32>
    %192 = vector.extract_strided_slice %191 {offsets = [0, 0], sizes = [96, 128], strides = [1, 1]} : vector<128x128xf32> to vector<96x128xf32>
    %193 = arith.negf %192 : vector<96x128xf32>
    %194 = math.exp %193 : vector<96x128xf32>
    %cst_91 = arith.constant 1.000000e+00 : f32
    %195 = vector.broadcast %cst_91 : f32 to vector<96x128xf32>
    %196 = arith.addf %195, %194 : vector<96x128xf32>
    %197 = arith.divf %195, %196 : vector<96x128xf32>
    %198 = vector.extract_strided_slice %191 {offsets = [96, 0], sizes = [32, 128], strides = [1, 1]} : vector<128x128xf32> to vector<32x128xf32>
    %199 = math.tanh %198 : vector<32x128xf32>
    %200 = vector.extract_strided_slice %197 {offsets = [0, 0], sizes = [32, 128], strides = [1, 1]} : vector<96x128xf32> to vector<32x128xf32>
    %201 = vector.extract_strided_slice %197 {offsets = [32, 0], sizes = [32, 128], strides = [1, 1]} : vector<96x128xf32> to vector<32x128xf32>
    %202 = vector.extract_strided_slice %197 {offsets = [64, 0], sizes = [32, 128], strides = [1, 1]} : vector<96x128xf32> to vector<32x128xf32>
    %203 = arith.mulf %201, %164 : vector<32x128xf32>
    %204 = arith.mulf %200, %199 : vector<32x128xf32>
    %205 = arith.addf %203, %204 : vector<32x128xf32>
    %206 = math.tanh %205 : vector<32x128xf32>
    %207 = arith.mulf %202, %206 : vector<32x128xf32>
    %cst_92 = arith.constant dense<0.000000e+00> : vector<128x128xf32>
    %208 = tpu.matmul %1, %207, %cst_92 {dimension_numbers = #tpu.dot_dimension_numbers<[1], [0], [0], [1], [0, 0, 1, 1], [], []>} : vector<128x32xf32>, vector<32x128xf32>, vector<128x128xf32> -> vector<128x128xf32>
    %cst_93 = arith.constant dense<0.000000e+00> : vector<128x128xf32>
    %209 = tpu.matmul %2, %207, %cst_93 {dimension_numbers = #tpu.dot_dimension_numbers<[1], [0], [0], [1], [0, 0, 1, 1], [], []>} : vector<128x32xf32>, vector<32x128xf32>, vector<128x128xf32> -> vector<128x128xf32>
    %210 = arith.addf %209, %187 : vector<128x128xf32>
    %211 = vector.extract_strided_slice %210 {offsets = [0, 0], sizes = [96, 128], strides = [1, 1]} : vector<128x128xf32> to vector<96x128xf32>
    %212 = arith.negf %211 : vector<96x128xf32>
    %213 = math.exp %212 : vector<96x128xf32>
    %cst_94 = arith.constant 1.000000e+00 : f32
    %214 = vector.broadcast %cst_94 : f32 to vector<96x128xf32>
    %215 = arith.addf %214, %213 : vector<96x128xf32>
    %216 = arith.divf %214, %215 : vector<96x128xf32>
    %217 = vector.extract_strided_slice %210 {offsets = [96, 0], sizes = [32, 128], strides = [1, 1]} : vector<128x128xf32> to vector<32x128xf32>
    %218 = math.tanh %217 : vector<32x128xf32>
    %219 = vector.extract_strided_slice %216 {offsets = [0, 0], sizes = [32, 128], strides = [1, 1]} : vector<96x128xf32> to vector<32x128xf32>
    %220 = vector.extract_strided_slice %216 {offsets = [32, 0], sizes = [32, 128], strides = [1, 1]} : vector<96x128xf32> to vector<32x128xf32>
    %221 = vector.extract_strided_slice %216 {offsets = [64, 0], sizes = [32, 128], strides = [1, 1]} : vector<96x128xf32> to vector<32x128xf32>
    %222 = arith.mulf %220, %183 : vector<32x128xf32>
    %223 = arith.mulf %219, %218 : vector<32x128xf32>
    %224 = arith.addf %222, %223 : vector<32x128xf32>
    %225 = math.tanh %224 : vector<32x128xf32>
    %226 = arith.mulf %221, %225 : vector<32x128xf32>
    %cst_95 = arith.constant dense<0.000000e+00> : vector<128x128xf32>
    %227 = tpu.matmul %3, %226, %cst_95 {dimension_numbers = #tpu.dot_dimension_numbers<[1], [0], [0], [1], [0, 0, 1, 1], [], []>} : vector<128x32xf32>, vector<32x128xf32>, vector<128x128xf32> -> vector<128x128xf32>
    %228 = arith.addf %227, %9 : vector<128x128xf32>
    %c0_96 = arith.constant 0 : index
    %c384 = arith.constant 384 : index
    %229 = vector.load %arg12[%c0_96, %c384] : memref<32x1024xf32, #tpu.memory_space<vmem>>, vector<32x128xf32>
    tpu.vector_store %arg12[%c0_96, %c384], %226 {strides = array<i32>} : memref<32x1024xf32, #tpu.memory_space<vmem>>, vector<32x128xf32>,
    %c4_97 = arith.constant 4 : index
    %c0_98 = arith.constant 0 : index
    %c0_99 = arith.constant 0 : index
    %230 = vector.load %arg11[%c4_97, %c0_98, %c0_99] : memref<8x128x128xf32, #tpu.memory_space<vmem>>, vector<1x128x128xf32>
    %231 = vector.shape_cast %230 : vector<1x128x128xf32> to vector<128x128xf32>
    %232 = arith.addf %231, %208 : vector<128x128xf32>
    %233 = vector.extract_strided_slice %232 {offsets = [0, 0], sizes = [96, 128], strides = [1, 1]} : vector<128x128xf32> to vector<96x128xf32>
    %234 = arith.negf %233 : vector<96x128xf32>
    %235 = math.exp %234 : vector<96x128xf32>
    %cst_100 = arith.constant 1.000000e+00 : f32
    %236 = vector.broadcast %cst_100 : f32 to vector<96x128xf32>
    %237 = arith.addf %236, %235 : vector<96x128xf32>
    %238 = arith.divf %236, %237 : vector<96x128xf32>
    %239 = vector.extract_strided_slice %232 {offsets = [96, 0], sizes = [32, 128], strides = [1, 1]} : vector<128x128xf32> to vector<32x128xf32>
    %240 = math.tanh %239 : vector<32x128xf32>
    %241 = vector.extract_strided_slice %238 {offsets = [0, 0], sizes = [32, 128], strides = [1, 1]} : vector<96x128xf32> to vector<32x128xf32>
    %242 = vector.extract_strided_slice %238 {offsets = [32, 0], sizes = [32, 128], strides = [1, 1]} : vector<96x128xf32> to vector<32x128xf32>
    %243 = vector.extract_strided_slice %238 {offsets = [64, 0], sizes = [32, 128], strides = [1, 1]} : vector<96x128xf32> to vector<32x128xf32>
    %244 = arith.mulf %242, %205 : vector<32x128xf32>
    %245 = arith.mulf %241, %240 : vector<32x128xf32>
    %246 = arith.addf %244, %245 : vector<32x128xf32>
    %247 = math.tanh %246 : vector<32x128xf32>
    %248 = arith.mulf %243, %247 : vector<32x128xf32>
    %cst_101 = arith.constant dense<0.000000e+00> : vector<128x128xf32>
    %249 = tpu.matmul %1, %248, %cst_101 {dimension_numbers = #tpu.dot_dimension_numbers<[1], [0], [0], [1], [0, 0, 1, 1], [], []>} : vector<128x32xf32>, vector<32x128xf32>, vector<128x128xf32> -> vector<128x128xf32>
    %cst_102 = arith.constant dense<0.000000e+00> : vector<128x128xf32>
    %250 = tpu.matmul %2, %248, %cst_102 {dimension_numbers = #tpu.dot_dimension_numbers<[1], [0], [0], [1], [0, 0, 1, 1], [], []>} : vector<128x32xf32>, vector<32x128xf32>, vector<128x128xf32> -> vector<128x128xf32>
    %251 = arith.addf %250, %228 : vector<128x128xf32>
    %252 = vector.extract_strided_slice %251 {offsets = [0, 0], sizes = [96, 128], strides = [1, 1]} : vector<128x128xf32> to vector<96x128xf32>
    %253 = arith.negf %252 : vector<96x128xf32>
    %254 = math.exp %253 : vector<96x128xf32>
    %cst_103 = arith.constant 1.000000e+00 : f32
    %255 = vector.broadcast %cst_103 : f32 to vector<96x128xf32>
    %256 = arith.addf %255, %254 : vector<96x128xf32>
    %257 = arith.divf %255, %256 : vector<96x128xf32>
    %258 = vector.extract_strided_slice %251 {offsets = [96, 0], sizes = [32, 128], strides = [1, 1]} : vector<128x128xf32> to vector<32x128xf32>
    %259 = math.tanh %258 : vector<32x128xf32>
    %260 = vector.extract_strided_slice %257 {offsets = [0, 0], sizes = [32, 128], strides = [1, 1]} : vector<96x128xf32> to vector<32x128xf32>
    %261 = vector.extract_strided_slice %257 {offsets = [32, 0], sizes = [32, 128], strides = [1, 1]} : vector<96x128xf32> to vector<32x128xf32>
    %262 = vector.extract_strided_slice %257 {offsets = [64, 0], sizes = [32, 128], strides = [1, 1]} : vector<96x128xf32> to vector<32x128xf32>
    %263 = arith.mulf %261, %224 : vector<32x128xf32>
    %264 = arith.mulf %260, %259 : vector<32x128xf32>
    %265 = arith.addf %263, %264 : vector<32x128xf32>
    %266 = math.tanh %265 : vector<32x128xf32>
    %267 = arith.mulf %262, %266 : vector<32x128xf32>
    %cst_104 = arith.constant dense<0.000000e+00> : vector<128x128xf32>
    %268 = tpu.matmul %3, %267, %cst_104 {dimension_numbers = #tpu.dot_dimension_numbers<[1], [0], [0], [1], [0, 0, 1, 1], [], []>} : vector<128x32xf32>, vector<32x128xf32>, vector<128x128xf32> -> vector<128x128xf32>
    %269 = arith.addf %268, %9 : vector<128x128xf32>
    %c0_105 = arith.constant 0 : index
    %c512 = arith.constant 512 : index
    %270 = vector.load %arg12[%c0_105, %c512] : memref<32x1024xf32, #tpu.memory_space<vmem>>, vector<32x128xf32>
    tpu.vector_store %arg12[%c0_105, %c512], %267 {strides = array<i32>} : memref<32x1024xf32, #tpu.memory_space<vmem>>, vector<32x128xf32>,
    %c5_106 = arith.constant 5 : index
    %c0_107 = arith.constant 0 : index
    %c0_108 = arith.constant 0 : index
    %271 = vector.load %arg11[%c5_106, %c0_107, %c0_108] : memref<8x128x128xf32, #tpu.memory_space<vmem>>, vector<1x128x128xf32>
    %272 = vector.shape_cast %271 : vector<1x128x128xf32> to vector<128x128xf32>
    %273 = arith.addf %272, %249 : vector<128x128xf32>
    %274 = vector.extract_strided_slice %273 {offsets = [0, 0], sizes = [96, 128], strides = [1, 1]} : vector<128x128xf32> to vector<96x128xf32>
    %275 = arith.negf %274 : vector<96x128xf32>
    %276 = math.exp %275 : vector<96x128xf32>
    %cst_109 = arith.constant 1.000000e+00 : f32
    %277 = vector.broadcast %cst_109 : f32 to vector<96x128xf32>
    %278 = arith.addf %277, %276 : vector<96x128xf32>
    %279 = arith.divf %277, %278 : vector<96x128xf32>
    %280 = vector.extract_strided_slice %273 {offsets = [96, 0], sizes = [32, 128], strides = [1, 1]} : vector<128x128xf32> to vector<32x128xf32>
    %281 = math.tanh %280 : vector<32x128xf32>
    %282 = vector.extract_strided_slice %279 {offsets = [0, 0], sizes = [32, 128], strides = [1, 1]} : vector<96x128xf32> to vector<32x128xf32>
    %283 = vector.extract_strided_slice %279 {offsets = [32, 0], sizes = [32, 128], strides = [1, 1]} : vector<96x128xf32> to vector<32x128xf32>
    %284 = vector.extract_strided_slice %279 {offsets = [64, 0], sizes = [32, 128], strides = [1, 1]} : vector<96x128xf32> to vector<32x128xf32>
    %285 = arith.mulf %283, %246 : vector<32x128xf32>
    %286 = arith.mulf %282, %281 : vector<32x128xf32>
    %287 = arith.addf %285, %286 : vector<32x128xf32>
    %288 = math.tanh %287 : vector<32x128xf32>
    %289 = arith.mulf %284, %288 : vector<32x128xf32>
    %cst_110 = arith.constant dense<0.000000e+00> : vector<128x128xf32>
    %290 = tpu.matmul %1, %289, %cst_110 {dimension_numbers = #tpu.dot_dimension_numbers<[1], [0], [0], [1], [0, 0, 1, 1], [], []>} : vector<128x32xf32>, vector<32x128xf32>, vector<128x128xf32> -> vector<128x128xf32>
    %cst_111 = arith.constant dense<0.000000e+00> : vector<128x128xf32>
    %291 = tpu.matmul %2, %289, %cst_111 {dimension_numbers = #tpu.dot_dimension_numbers<[1], [0], [0], [1], [0, 0, 1, 1], [], []>} : vector<128x32xf32>, vector<32x128xf32>, vector<128x128xf32> -> vector<128x128xf32>
    %292 = arith.addf %291, %269 : vector<128x128xf32>
    %293 = vector.extract_strided_slice %292 {offsets = [0, 0], sizes = [96, 128], strides = [1, 1]} : vector<128x128xf32> to vector<96x128xf32>
    %294 = arith.negf %293 : vector<96x128xf32>
    %295 = math.exp %294 : vector<96x128xf32>
    %cst_112 = arith.constant 1.000000e+00 : f32
    %296 = vector.broadcast %cst_112 : f32 to vector<96x128xf32>
    %297 = arith.addf %296, %295 : vector<96x128xf32>
    %298 = arith.divf %296, %297 : vector<96x128xf32>
    %299 = vector.extract_strided_slice %292 {offsets = [96, 0], sizes = [32, 128], strides = [1, 1]} : vector<128x128xf32> to vector<32x128xf32>
    %300 = math.tanh %299 : vector<32x128xf32>
    %301 = vector.extract_strided_slice %298 {offsets = [0, 0], sizes = [32, 128], strides = [1, 1]} : vector<96x128xf32> to vector<32x128xf32>
    %302 = vector.extract_strided_slice %298 {offsets = [32, 0], sizes = [32, 128], strides = [1, 1]} : vector<96x128xf32> to vector<32x128xf32>
    %303 = vector.extract_strided_slice %298 {offsets = [64, 0], sizes = [32, 128], strides = [1, 1]} : vector<96x128xf32> to vector<32x128xf32>
    %304 = arith.mulf %302, %265 : vector<32x128xf32>
    %305 = arith.mulf %301, %300 : vector<32x128xf32>
    %306 = arith.addf %304, %305 : vector<32x128xf32>
    %307 = math.tanh %306 : vector<32x128xf32>
    %308 = arith.mulf %303, %307 : vector<32x128xf32>
    %cst_113 = arith.constant dense<0.000000e+00> : vector<128x128xf32>
    %309 = tpu.matmul %3, %308, %cst_113 {dimension_numbers = #tpu.dot_dimension_numbers<[1], [0], [0], [1], [0, 0, 1, 1], [], []>} : vector<128x32xf32>, vector<32x128xf32>, vector<128x128xf32> -> vector<128x128xf32>
    %310 = arith.addf %309, %9 : vector<128x128xf32>
    %c0_114 = arith.constant 0 : index
    %c640 = arith.constant 640 : index
    %311 = vector.load %arg12[%c0_114, %c640] : memref<32x1024xf32, #tpu.memory_space<vmem>>, vector<32x128xf32>
    tpu.vector_store %arg12[%c0_114, %c640], %308 {strides = array<i32>} : memref<32x1024xf32, #tpu.memory_space<vmem>>, vector<32x128xf32>,
    %c6_115 = arith.constant 6 : index
    %c0_116 = arith.constant 0 : index
    %c0_117 = arith.constant 0 : index
    %312 = vector.load %arg11[%c6_115, %c0_116, %c0_117] : memref<8x128x128xf32, #tpu.memory_space<vmem>>, vector<1x128x128xf32>
    %313 = vector.shape_cast %312 : vector<1x128x128xf32> to vector<128x128xf32>
    %314 = arith.addf %313, %290 : vector<128x128xf32>
    %315 = vector.extract_strided_slice %314 {offsets = [0, 0], sizes = [96, 128], strides = [1, 1]} : vector<128x128xf32> to vector<96x128xf32>
    %316 = arith.negf %315 : vector<96x128xf32>
    %317 = math.exp %316 : vector<96x128xf32>
    %cst_118 = arith.constant 1.000000e+00 : f32
    %318 = vector.broadcast %cst_118 : f32 to vector<96x128xf32>
    %319 = arith.addf %318, %317 : vector<96x128xf32>
    %320 = arith.divf %318, %319 : vector<96x128xf32>
    %321 = vector.extract_strided_slice %314 {offsets = [96, 0], sizes = [32, 128], strides = [1, 1]} : vector<128x128xf32> to vector<32x128xf32>
    %322 = math.tanh %321 : vector<32x128xf32>
    %323 = vector.extract_strided_slice %320 {offsets = [0, 0], sizes = [32, 128], strides = [1, 1]} : vector<96x128xf32> to vector<32x128xf32>
    %324 = vector.extract_strided_slice %320 {offsets = [32, 0], sizes = [32, 128], strides = [1, 1]} : vector<96x128xf32> to vector<32x128xf32>
    %325 = vector.extract_strided_slice %320 {offsets = [64, 0], sizes = [32, 128], strides = [1, 1]} : vector<96x128xf32> to vector<32x128xf32>
    %326 = arith.mulf %324, %287 : vector<32x128xf32>
    %327 = arith.mulf %323, %322 : vector<32x128xf32>
    %328 = arith.addf %326, %327 : vector<32x128xf32>
    %329 = math.tanh %328 : vector<32x128xf32>
    %330 = arith.mulf %325, %329 : vector<32x128xf32>
    %cst_119 = arith.constant dense<0.000000e+00> : vector<128x128xf32>
    %331 = tpu.matmul %1, %330, %cst_119 {dimension_numbers = #tpu.dot_dimension_numbers<[1], [0], [0], [1], [0, 0, 1, 1], [], []>} : vector<128x32xf32>, vector<32x128xf32>, vector<128x128xf32> -> vector<128x128xf32>
    %cst_120 = arith.constant dense<0.000000e+00> : vector<128x128xf32>
    %332 = tpu.matmul %2, %330, %cst_120 {dimension_numbers = #tpu.dot_dimension_numbers<[1], [0], [0], [1], [0, 0, 1, 1], [], []>} : vector<128x32xf32>, vector<32x128xf32>, vector<128x128xf32> -> vector<128x128xf32>
    %333 = arith.addf %332, %310 : vector<128x128xf32>
    %334 = vector.extract_strided_slice %333 {offsets = [0, 0], sizes = [96, 128], strides = [1, 1]} : vector<128x128xf32> to vector<96x128xf32>
    %335 = arith.negf %334 : vector<96x128xf32>
    %336 = math.exp %335 : vector<96x128xf32>
    %cst_121 = arith.constant 1.000000e+00 : f32
    %337 = vector.broadcast %cst_121 : f32 to vector<96x128xf32>
    %338 = arith.addf %337, %336 : vector<96x128xf32>
    %339 = arith.divf %337, %338 : vector<96x128xf32>
    %340 = vector.extract_strided_slice %333 {offsets = [96, 0], sizes = [32, 128], strides = [1, 1]} : vector<128x128xf32> to vector<32x128xf32>
    %341 = math.tanh %340 : vector<32x128xf32>
    %342 = vector.extract_strided_slice %339 {offsets = [0, 0], sizes = [32, 128], strides = [1, 1]} : vector<96x128xf32> to vector<32x128xf32>
    %343 = vector.extract_strided_slice %339 {offsets = [32, 0], sizes = [32, 128], strides = [1, 1]} : vector<96x128xf32> to vector<32x128xf32>
    %344 = vector.extract_strided_slice %339 {offsets = [64, 0], sizes = [32, 128], strides = [1, 1]} : vector<96x128xf32> to vector<32x128xf32>
    %345 = arith.mulf %343, %306 : vector<32x128xf32>
    %346 = arith.mulf %342, %341 : vector<32x128xf32>
    %347 = arith.addf %345, %346 : vector<32x128xf32>
    %348 = math.tanh %347 : vector<32x128xf32>
    %349 = arith.mulf %344, %348 : vector<32x128xf32>
    %cst_122 = arith.constant dense<0.000000e+00> : vector<128x128xf32>
    %350 = tpu.matmul %3, %349, %cst_122 {dimension_numbers = #tpu.dot_dimension_numbers<[1], [0], [0], [1], [0, 0, 1, 1], [], []>} : vector<128x32xf32>, vector<32x128xf32>, vector<128x128xf32> -> vector<128x128xf32>
    %351 = arith.addf %350, %9 : vector<128x128xf32>
    %c0_123 = arith.constant 0 : index
    %c768 = arith.constant 768 : index
    %352 = vector.load %arg12[%c0_123, %c768] : memref<32x1024xf32, #tpu.memory_space<vmem>>, vector<32x128xf32>
    tpu.vector_store %arg12[%c0_123, %c768], %349 {strides = array<i32>} : memref<32x1024xf32, #tpu.memory_space<vmem>>, vector<32x128xf32>,
    %c7_124 = arith.constant 7 : index
    %c0_125 = arith.constant 0 : index
    %c0_126 = arith.constant 0 : index
    %353 = vector.load %arg11[%c7_124, %c0_125, %c0_126] : memref<8x128x128xf32, #tpu.memory_space<vmem>>, vector<1x128x128xf32>
    %354 = vector.shape_cast %353 : vector<1x128x128xf32> to vector<128x128xf32>
    %355 = arith.addf %354, %331 : vector<128x128xf32>
    %356 = vector.extract_strided_slice %355 {offsets = [0, 0], sizes = [96, 128], strides = [1, 1]} : vector<128x128xf32> to vector<96x128xf32>
    %357 = arith.negf %356 : vector<96x128xf32>
    %358 = math.exp %357 : vector<96x128xf32>
    %cst_127 = arith.constant 1.000000e+00 : f32
    %359 = vector.broadcast %cst_127 : f32 to vector<96x128xf32>
    %360 = arith.addf %359, %358 : vector<96x128xf32>
    %361 = arith.divf %359, %360 : vector<96x128xf32>
    %362 = vector.extract_strided_slice %355 {offsets = [96, 0], sizes = [32, 128], strides = [1, 1]} : vector<128x128xf32> to vector<32x128xf32>
    %363 = math.tanh %362 : vector<32x128xf32>
    %364 = vector.extract_strided_slice %361 {offsets = [0, 0], sizes = [32, 128], strides = [1, 1]} : vector<96x128xf32> to vector<32x128xf32>
    %365 = vector.extract_strided_slice %361 {offsets = [32, 0], sizes = [32, 128], strides = [1, 1]} : vector<96x128xf32> to vector<32x128xf32>
    %366 = vector.extract_strided_slice %361 {offsets = [64, 0], sizes = [32, 128], strides = [1, 1]} : vector<96x128xf32> to vector<32x128xf32>
    %367 = arith.mulf %365, %328 : vector<32x128xf32>
    %368 = arith.mulf %364, %363 : vector<32x128xf32>
    %369 = arith.addf %367, %368 : vector<32x128xf32>
    %370 = math.tanh %369 : vector<32x128xf32>
    %371 = arith.mulf %366, %370 : vector<32x128xf32>
    %cst_128 = arith.constant dense<0.000000e+00> : vector<128x128xf32>
    %372 = tpu.matmul %2, %371, %cst_128 {dimension_numbers = #tpu.dot_dimension_numbers<[1], [0], [0], [1], [0, 0, 1, 1], [], []>} : vector<128x32xf32>, vector<32x128xf32>, vector<128x128xf32> -> vector<128x128xf32>
    %373 = arith.addf %372, %351 : vector<128x128xf32>
    %374 = vector.extract_strided_slice %373 {offsets = [0, 0], sizes = [96, 128], strides = [1, 1]} : vector<128x128xf32> to vector<96x128xf32>
    %375 = arith.negf %374 : vector<96x128xf32>
    %376 = math.exp %375 : vector<96x128xf32>
    %cst_129 = arith.constant 1.000000e+00 : f32
    %377 = vector.broadcast %cst_129 : f32 to vector<96x128xf32>
    %378 = arith.addf %377, %376 : vector<96x128xf32>
    %379 = arith.divf %377, %378 : vector<96x128xf32>
    %380 = vector.extract_strided_slice %373 {offsets = [96, 0], sizes = [32, 128], strides = [1, 1]} : vector<128x128xf32> to vector<32x128xf32>
    %381 = math.tanh %380 : vector<32x128xf32>
    %382 = vector.extract_strided_slice %379 {offsets = [0, 0], sizes = [32, 128], strides = [1, 1]} : vector<96x128xf32> to vector<32x128xf32>
    %383 = vector.extract_strided_slice %379 {offsets = [32, 0], sizes = [32, 128], strides = [1, 1]} : vector<96x128xf32> to vector<32x128xf32>
    %384 = vector.extract_strided_slice %379 {offsets = [64, 0], sizes = [32, 128], strides = [1, 1]} : vector<96x128xf32> to vector<32x128xf32>
    %385 = arith.mulf %383, %347 : vector<32x128xf32>
    %386 = arith.mulf %382, %381 : vector<32x128xf32>
    %387 = arith.addf %385, %386 : vector<32x128xf32>
    %388 = math.tanh %387 : vector<32x128xf32>
    %389 = arith.mulf %384, %388 : vector<32x128xf32>
    %c0_130 = arith.constant 0 : index
    %c896 = arith.constant 896 : index
    %390 = vector.load %arg12[%c0_130, %c896] : memref<32x1024xf32, #tpu.memory_space<vmem>>, vector<32x128xf32>
    tpu.vector_store %arg12[%c0_130, %c896], %389 {strides = array<i32>} : memref<32x1024xf32, #tpu.memory_space<vmem>>, vector<32x128xf32>,
    %c0_131 = arith.constant 0 : index
    %c0_132 = arith.constant 0 : index
    %391 = vector.load %arg8[%c0_131, %c0_132] : memref<2x32xf32, #tpu.memory_space<vmem>>, vector<2x32xf32>
    %c0_133 = arith.constant 0 : index
    %c0_134 = arith.constant 0 : index
    %392 = vector.load %arg12[%c0_133, %c0_134] : memref<32x1024xf32, #tpu.memory_space<vmem>>, vector<32x1024xf32>
    %cst_135 = arith.constant dense<0.000000e+00> : vector<2x1024xf32>
    %393 = tpu.matmul %391, %392, %cst_135 {dimension_numbers = #tpu.dot_dimension_numbers<[1], [0], [0], [1], [0, 0, 1, 1], [], []>} : vector<2x32xf32>, vector<32x1024xf32>, vector<2x1024xf32> -> vector<2x1024xf32>
    %c0_136 = arith.constant 0 : index
    %c0_137 = arith.constant 0 : index
    %394 = vector.load %arg9[%c0_136, %c0_137] : memref<2x1xf32, #tpu.memory_space<vmem>>, vector<2x1xf32>
    %395 = vector.broadcast %394 : vector<2x1xf32> to vector<2x1024xf32>
    %396 = arith.addf %393, %395 : vector<2x1024xf32>
    %397 = arith.negf %396 : vector<2x1024xf32>
    %398 = math.exp %397 : vector<2x1024xf32>
    %cst_138 = arith.constant 1.000000e+00 : f32
    %399 = vector.broadcast %cst_138 : f32 to vector<2x1024xf32>
    %400 = arith.addf %399, %398 : vector<2x1024xf32>
    %401 = arith.divf %399, %400 : vector<2x1024xf32>
    %c0_139 = arith.constant 0 : index
    %c0_140 = arith.constant 0 : index
    %402 = vector.load %arg10[%c0_139, %c0_140] : memref<2x1024xf32, #tpu.memory_space<vmem>>, vector<2x1024xf32>
    tpu.vector_store %arg10[%c0_139, %c0_140], %401 {strides = array<i32>} : memref<2x1024xf32, #tpu.memory_space<vmem>>, vector<2x1024xf32>,
    return
  }
  func.func @transform_0(%arg0: i32) -> (i32, i32, i32) {
    %c0_i32 = arith.constant 0 : i32
    %c0_i32_0 = arith.constant 0 : i32
    %c0_i32_1 = arith.constant 0 : i32
    return %c0_i32, %c0_i32_0, %arg0 : i32, i32, i32
  }
  func.func @transform_1(%arg0: i32) -> (i32, i32) {
    %c0_i32 = arith.constant 0 : i32
    %c0_i32_0 = arith.constant 0 : i32
    %c0_i32_1 = arith.constant 0 : i32
    return %c0_i32, %c0_i32_0 : i32, i32
  }
  func.func @transform_2(%arg0: i32) -> (i32, i32) {
    %c0_i32 = arith.constant 0 : i32
    %c0_i32_0 = arith.constant 0 : i32
    %c0_i32_1 = arith.constant 0 : i32
    return %c0_i32, %c0_i32_0 : i32, i32
  }
  func.func @transform_3(%arg0: i32) -> (i32, i32) {
    %c0_i32 = arith.constant 0 : i32
    %c0_i32_0 = arith.constant 0 : i32
    %c0_i32_1 = arith.constant 0 : i32
    return %c0_i32, %c0_i32_0 : i32, i32
  }
  func.func @transform_4(%arg0: i32) -> (i32, i32) {
    %c0_i32 = arith.constant 0 : i32
    %c0_i32_0 = arith.constant 0 : i32
    %c0_i32_1 = arith.constant 0 : i32
    return %c0_i32, %c0_i32_0 : i32, i32
  }
  func.func @transform_5(%arg0: i32) -> (i32, i32) {
    %c0_i32 = arith.constant 0 : i32
    %c0_i32_0 = arith.constant 0 : i32
    %c0_i32_1 = arith.constant 0 : i32
    return %c0_i32, %c0_i32_0 : i32, i32
  }
  func.func @transform_6(%arg0: i32) -> (i32, i32) {
    %c0_i32 = arith.constant 0 : i32
    %c0_i32_0 = arith.constant 0 : i32
    %c0_i32_1 = arith.constant 0 : i32
    return %c0_i32, %c0_i32_0 : i32, i32
  }
  func.func @transform_7(%arg0: i32) -> (i32, i32) {
    %c0_i32 = arith.constant 0 : i32
    %c0_i32_0 = arith.constant 0 : i32
    %c0_i32_1 = arith.constant 0 : i32
    return %c0_i32, %c0_i32_0 : i32, i32
  }
  func.func @transform_8(%arg0: i32) -> (i32, i32) {
    %c0_i32 = arith.constant 0 : i32
    %c0_i32_0 = arith.constant 0 : i32
    %c0_i32_1 = arith.constant 0 : i32
    return %c0_i32, %c0_i32_0 : i32, i32
  }
  func.func @transform_9(%arg0: i32) -> (i32, i32) {
    %c0_i32 = arith.constant 0 : i32
    %c0_i32_0 = arith.constant 0 : i32
    return %c0_i32, %arg0 : i32, i32
  }
}

</mosaic_0001>

<bundles_post_ra>
// kernel: tpu_custom_call.1
= control target key start
LH: loop header
LB: loop body
LE: loop exit
PB: predicated region body
PF: predicated region fallthrough
CT: control target
= control target key end

     0   :  { %vm294_vm0 = vcmask 326656   ;;  %v11517_v6 = vmov 0   ;;  %s14489_s0 = inlined_call_operand.vmem [shape: f32[8,40,128], index: 0, kind: input, shape index: {}]   ;;  %s14490_s1 = inlined_call_operand.vmem [shape: f32[128,40], index: 1, kind: input, shape index: {}]   ;;  %s14491_s2 = inlined_call_operand.vmem [shape: f32[128,32], index: 2, kind: input, shape index: {}]   ;;  %s14492_s3 = inlined_call_operand.vmem [shape: f32[128,1], index: 3, kind: input, shape index: {}]   ;;  %s14493_s4 = inlined_call_operand.vmem [shape: f32[128,32], index: 4, kind: input, shape index: {}]   ;;  %s14494_s5 = inlined_call_operand.vmem [shape: f32[128,32], index: 5, kind: input, shape index: {}]   ;;  %s14495_s6 = inlined_call_operand.vmem [shape: f32[128,1], index: 6, kind: input, shape index: {}]   ;;  %s14496_s7 = inlined_call_operand.vmem [shape: f32[2,32], index: 7, kind: input, shape index: {}]   ;;  %s14497_s8 = inlined_call_operand.vmem [shape: f32[2,1], index: 8, kind: input, shape index: {}]   ;;  %s14498_s9 = inlined_call_operand.hbm [shape: f32[2,1024], index: 9, kind: output, shape index: {}]  }
   0x1   :  { %v289_v0 = vld [vmem:[%s14489_s0] sm:$0xff]  ;;  %v290_v1 = vld [vmem:[%s14489_s0 + $0x8] sm:$0xff]  ;;  %v291_v2 = vld [vmem:[%s14489_s0 + $0x10] sm:$0xff]  ;;  %10290 = vset.pattern.permute.xlu0 %v11517_v6  ;;  %10291 = vset.pattern.permute.xlu1 %v11517_v6 }
   0x2   :  { %v9560_v3 = vpack.c.bf16 %v290_v1, %v289_v0  ;;  %v292_v4 = vld [vmem:[%s14489_s0 + $0x18] sm:$0xff]  ;;  %v11586_v5 = vld [vmem:[%s14490_s1] sm:$0xff]  ;;  %v11593_v8 = vld [vmem:[%s14490_s1 + $0x30] sm:$0xff] }
   0x3   :  { %v9564_v7 = vpack.c.bf16 %v292_v4, %v291_v2  ;;  %8594 = vmatprep.mubr.msk.f32.mxu0 %vm294_vm0, %v11586_v5  ;;  %v293_v9 = vld [vmem:[%s14489_s0 + $0x20] sm:$0xff]  ;;  %8603 = vmatprep.mubr.msk.f32.mxu1 %vm294_vm0, %v11593_v8  ;;  %v11609_v12 = vld [vmem:[%s14490_s1 + $0x8] sm:$0xff]  ;;  %v11614_v13 = vld [vmem:[%s14490_s1 + $0x38] sm:$0xff] }
   0x4   :  { %9561 = vmatprep.subr.bf16.mxu0 %v9560_v3  ;;  %9832 = vmatprep.subr.bf16.mxu1 %v9560_v3  ;;  %v97_v10 = vld [vmem:[%s14492_s3] sm:$0xff]  ;;  %v11619_v14 = vld [vmem:[%s14490_s1 + $0x10] sm:$0xff]  ;;  %v98_v16 = vld [vmem:[%s14492_s3 + $0x8] sm:$0xff] }
   0x5   :  { %9563 = vmatpush3.bf16.msra.mxu0 %v9560_v3  ;;  %9835 = vmatpush3.bf16.msra.mxu1 %v9560_v3  ;;  %v101_v11 = vld [vmem:[%s14492_s3 + $0x20] sm:$0xff]  ;;  %v102_v17 = vld [vmem:[%s14492_s3 + $0x28] sm:$0xff]  ;;  %v11643_v18 = vld [vmem:[%s14490_s1 + $0x18] sm:$0xff] }
   0x6   :  { %9565 = vmatprep.subr.bf16.mxu0 %v9564_v7  ;;  %9833 = vmatprep.subr.bf16.mxu1 %v9564_v7  ;;  %v11624_v15 = vld [vmem:[%s14490_s1 + $0x40] sm:$0xff]  ;;  %v11648_v19 = vld [vmem:[%s14490_s1 + $0x48] sm:$0xff]  ;;  %v11658_v21 = vld [vmem:[%s14490_s1 + $0x50] sm:$0xff] }
   0x7   :  { %115 = vperm.xlu0 %10290, %v97_v10   ;;  %135 = vperm.xlu1 %10291, %v101_v11   ;;  %v11653_v20 = vld [vmem:[%s14490_s1 + $0x20] sm:$0xff]  ;;  %v99_v22 = vld [vmem:[%s14492_s3 + $0x10] sm:$0xff]  ;;  %v100_v23 = vld [vmem:[%s14492_s3 + $0x18] sm:$0xff] }
   0x8   :  { %v11673_v24 = vld [vmem:[%s14490_s1 + $0x28] sm:$0xff]  ;;  %v11678_v25 = vld [vmem:[%s14490_s1 + $0x58] sm:$0xff]  ;;  %v7274_v27 = vld [vmem:[%s14489_s0 + $0x30] sm:$0xff] }
   0x9   :  { %9567 = vmatpush3.bf16.msra.mxu0 %v9564_v7  ;;  %9836 = vmatpush3.bf16.msra.mxu1 %v9564_v7  ;;  %v7273_v26 = vld [vmem:[%s14489_s0 + $0x28] sm:$0xff]  ;;  %v7275_v28 = vld [vmem:[%s14489_s0 + $0x38] sm:$0xff]  ;;  %v11696_v29 = vld [vmem:[%s14490_s1 + $0x60] sm:$0xff] }
   0xa   :  { %8592 = vmatprep.subr.mxu0 %v293_v9  ;;  %9834 = vmatprep.subr.mxu1 %v293_v9  ;;  %v9568_v30 = vpack.c.bf16 %v7274_v27, %v7273_v26  ;;  %v7276_v31 = vld [vmem:[%s14489_s0 + $0x40] sm:$0xff] }
   0xb   :  { %120 = vperm.xlu0 %10290, %v98_v16   ;;  %140 = vperm.xlu1 %10291, %v102_v17  }
   0xd   :  { %8593 = vmatpush3.msra.mxu0 %v293_v9  ;;  %9837 = vmatpush3.msra.mxu1 %v293_v9 }
   0xe   :  { %8595 = vmatmul.mubr.msk.f32.vlgmr.msra.gmra.mrb[0].mxu0 %vm294_vm0, %v11609_v12  ;;  %8604 = vmatmul.mubr.msk.f32.vlgmr.msra.gmra.mrb[0].mxu1 %vm294_vm0, %v11614_v13 }
   0xf   :  { %8597 = vmatprep.mubr.msk.f32.mxu0 %vm294_vm0, %v11619_v14  ;;  %8606 = vmatprep.mubr.msk.f32.mxu1 %vm294_vm0, %v11624_v15 }
  0x10   :  { %125 = vperm.xlu0 %10290, %v99_v22   ;;  %130 = vperm.xlu1 %10291, %v100_v23  }
  0x12   :  { %8598 = vmatmul.mubr.msk.f32.gmra.mrb[2].mxu0 %vm294_vm0, %v11643_v18  ;;  %8607 = vmatmul.mubr.msk.f32.gmra.mrb[2].mxu1 %vm294_vm0, %v11648_v19 }
  0x13   :  { %8600 = vmatprep.mubr.msk.f32.mxu0 %vm294_vm0, %v11653_v20  ;;  %8609 = vmatprep.mubr.msk.f32.mxu1 %vm294_vm0, %v11658_v21 }
  0x14   :  { %14 = vsyncpa [#allocation5], 0  ;;  %v103_v32 = vld [vmem:[%s14492_s3 + $0x30] sm:$0xff]  ;;  %v104_v33 = vld [vmem:[%s14492_s3 + $0x38] sm:$0xff]  ;;  %v9572_v34 = vpack.c.bf16 %v7276_v31, %v7275_v28  ;;  %9569 = vmatprep.subr.bf16.mxu1 %v9568_v30  ;;  %vm1792_vm1 = vcmask 261120  }
  0x15   :  { %v11716_v35 = vld [vmem:[%s14490_s1 + $0x68] sm:$0xff]  ;;  %v11721_v36 = vld [vmem:[%s14490_s1 + $0x70] sm:$0xff]  ;;  %145 = vperm.xlu0 %10290, %v103_v32   ;;  %150 = vperm.xlu1 %10291, %v104_v33   ;;  %v105_v37 = vld [vmem:[%s14492_s3 + $0x40] sm:$0xff] }
  0x16   :  { %8601 = vmatmul.mubr.msk.f32.gmra.mrb[4].mxu0 %vm294_vm0, %v11673_v24  ;;  %8610 = vmatmul.mubr.msk.f32.gmra.mrb[4].mxu1 %vm294_vm0, %v11678_v25  ;;  %v106_v38 = vld [vmem:[%s14492_s3 + $0x48] sm:$0xff]  ;;  %v11738_v39 = vld [vmem:[%s14490_s1 + $0x78] sm:$0xff]  ;;  %v109_v41 = vld [vmem:[%s14492_s3 + $0x60] sm:$0xff] }
  0x17   :  { %8612 = vmatprep.mubr.msk.f32.mxu1 %vm294_vm0, %v11696_v29  ;;  %9571 = vmatpush3.bf16.msra.mxu1 %v9568_v30  ;;  %v7277_v40 = vld [vmem:[%s14489_s0 + $0x48] sm:$0xff]  ;;  %v7294_v43 = vld [vmem:[%s14489_s0 + $0x50] sm:$0xff]  ;;  %v7295_v44 = vld [vmem:[%s14489_s0 + $0x58] sm:$0xff] }
  0x18   :  { %8662 = vmatprep.mubr.msk.f32.mxu0 %vm294_vm0, %v11586_v5  ;;  %9573 = vmatprep.subr.bf16.mxu1 %v9572_v34  ;;  %v110_v42 = vld [vmem:[%s14492_s3 + $0x68] sm:$0xff]  ;;  %v7315_v45 = vld [vmem:[%s14489_s0 + $0x78] sm:$0xff]  ;;  %v9576_v46 = vpack.c.bf16 %v7295_v44, %v7294_v43  ;;  %v7316_v47 = vld [vmem:[%s14489_s0 + $0x80] sm:$0xff] }
  0x19   :  { %155 = vperm.xlu0 %10290, %v105_v37   ;;  %160 = vperm.xlu1 %10291, %v106_v38   ;;  %v107_v48 = vld [vmem:[%s14492_s3 + $0x50] sm:$0xff]  ;;  %v108_v49 = vld [vmem:[%s14492_s3 + $0x58] sm:$0xff]  ;;  %v9584_v50 = vpack.c.bf16 %v7316_v47, %v7315_v45  ;;  %v7296_v51 = vld [vmem:[%s14489_s0 + $0x60] sm:$0xff] }
  0x1a   :  { %8613 = vmatmul.mubr.msk.f32.gmra.mrb[6].mxu1 %vm294_vm0, %v11716_v35  ;;  %9577 = vmatprep.subr.bf16.mxu0 %v9576_v46  ;;  %v7297_v52 = vld [vmem:[%s14489_s0 + $0x68] sm:$0xff]  ;;  %v7318_v55 = vld [vmem:[%s14489_s0 + $0x90] sm:$0xff]  ;;  %v112_v57 = vld [vmem:[%s14492_s3 + $0x78] sm:$0xff] }
  0x1b   :  { %8615 = vmatprep.mubr.msk.f32.mxu1 %vm294_vm0, %v11721_v36  ;;  %9575 = vmatpush3.bf16.msra.mxu1 %v9572_v34  ;;  %v7317_v53 = vld [vmem:[%s14489_s0 + $0x88] sm:$0xff]  ;;  %v9580_v54 = vpack.c.bf16 %v7297_v52, %v7296_v51  ;;  %v111_v56 = vld [vmem:[%s14492_s3 + $0x70] sm:$0xff]  ;;  %v7319_v60 = vld [vmem:[%s14489_s0 + $0x98] sm:$0xff] }
  0x1c   :  { %8626 = vmatprep.subr.mxu1 %v7277_v40  ;;  %9579 = vmatpush3.bf16.msra.mxu0 %v9576_v46  ;;  %v9588_v58 = vpack.c.bf16 %v7318_v55, %v7317_v53  ;;  %v7298_v59 = vld [vmem:[%s14489_s0 + $0x70] sm:$0xff]  ;;  %v193_v61 = vld [vmem:[%s14495_s6] sm:$0xff]  ;;  %v194_v62 = vld [vmem:[%s14495_s6 + $0x8] sm:$0xff] }
  0x1d   :  { %175 = vperm.xlu0 %10290, %v109_v41   ;;  %180 = vperm.xlu1 %10291, %v110_v42   ;;  %v197_v63 = vld [vmem:[%s14495_s6 + $0x20] sm:$0xff]  ;;  %v198_v0 = vld [vmem:[%s14495_s6 + $0x28] sm:$0xff]  ;;  %v195_v1 = vld [vmem:[%s14495_s6 + $0x10] sm:$0xff] }
  0x1e   :  { %8616 = vmatmul.mubr.msk.f32.gmra.mrb[8].mxu1 %vm294_vm0, %v11738_v39  ;;  %9581 = vmatprep.subr.bf16.mxu0 %v9580_v54  ;;  %v196_v2 = vld [vmem:[%s14495_s6 + $0x18] sm:$0xff]  ;;  %v199_v3 = vld [vmem:[%s14495_s6 + $0x30] sm:$0xff]  ;;  %v201_v6 = vld [vmem:[%s14495_s6 + $0x40] sm:$0xff] }
  0x1f   :  { %8628 = vmatprep.mubr.msk.f32.mxu1 %vm294_vm0, %v11586_v5  ;;  %8627 = vmatpush3.msra.mxu1 %v7277_v40  ;;  %v200_v4 = vld [vmem:[%s14495_s6 + $0x38] sm:$0xff]  ;;  %v202_v7 = vld [vmem:[%s14495_s6 + $0x48] sm:$0xff]  ;;  %v205_v9 = vld [vmem:[%s14495_s6 + $0x60] sm:$0xff] }
  0x20   :  { %9585 = vmatprep.subr.bf16.mxu1 %v9584_v50  ;;  %9583 = vmatpush3.bf16.msra.mxu0 %v9580_v54  ;;  %v206_v10 = vld [vmem:[%s14495_s6 + $0x68] sm:$0xff]  ;;  %v7336_v11 = vld [vmem:[%s14489_s0 + $0xa0] sm:$0xff]  ;;  %v7358_v23 = vld [vmem:[%s14489_s0 + $0xd0] sm:$0xff] }
  0x21   :  { %165 = vperm.xlu0 %10290, %v107_v48   ;;  %170 = vperm.xlu1 %10291, %v108_v49   ;;  %v7337_v16 = vld [vmem:[%s14489_s0 + $0xa8] sm:$0xff]  ;;  %v203_v26 = vld [vmem:[%s14495_s6 + $0x50] sm:$0xff]  ;;  %v204_v27 = vld [vmem:[%s14495_s6 + $0x58] sm:$0xff] }
  0x22   :  { %8629 = vmatmul.mubr.msk.f32.vlgmr.msra.gmra.mrb[10].mxu1 %vm294_vm0, %v11609_v12  ;;  %8660 = vmatprep.subr.mxu0 %v7298_v59  ;;  %v7357_v17 = vld [vmem:[%s14489_s0 + $0xc8] sm:$0xff]  ;;  %v9592_v22 = vpack.c.bf16 %v7337_v16, %v7336_v11  ;;  %v7338_v30 = vld [vmem:[%s14489_s0 + $0xb0] sm:$0xff]  ;;  %v7339_v31 = vld [vmem:[%s14489_s0 + $0xb8] sm:$0xff] }
  0x23   :  { %8631 = vmatprep.mubr.msk.f32.mxu1 %vm294_vm0, %v11619_v14  ;;  %9587 = vmatpush3.bf16.msra.mxu1 %v9584_v50  ;;  %v9600_v28 = vpack.c.bf16 %v7358_v23, %v7357_v17  ;;  %v7359_v32 = vld [vmem:[%s14489_s0 + $0xd8] sm:$0xff]  ;;  %v7360_v33 = vld [vmem:[%s14489_s0 + $0xe0] sm:$0xff]  ;;  %v207_v34 = vld [vmem:[%s14495_s6 + $0x70] sm:$0xff]  ;;  %v9596_v38 = vpack.c.bf16 %v7339_v31, %v7338_v30 }
  0x24   :  { %9589 = vmatprep.subr.bf16.mxu1 %v9588_v58  ;;  %8661 = vmatpush3.msra.mxu0 %v7298_v59  ;;  %v208_v37 = vld [vmem:[%s14495_s6 + $0x78] sm:$0xff]  ;;  %v9604_v40 = vpack.c.bf16 %v7360_v33, %v7359_v32  ;;  %v6856_v41 = vld [vmem:[%s14497_s8] sm:$0x3]  ;;  %v7361_v43 = vld [vmem:[%s14489_s0 + $0xe8] sm:$0xff] }
  0x25   :  { %185 = vperm.xlu0 %10290, %v111_v56   ;;  %190 = vperm.xlu1 %10291, %v112_v57   ;;  %v7340_v42 = vld [vmem:[%s14489_s0 + $0xc0] sm:$0xff]  ;;  %v7378_v44 = vld [vmem:[%s14489_s0 + $0xf0] sm:$0xff]  ;;  %v7379_v45 = vld [vmem:[%s14489_s0 + $0xf8] sm:$0xff] }
  0x26   :  { %8632 = vmatmul.mubr.msk.f32.gmra.mrb[12].mxu1 %vm294_vm0, %v11643_v18  ;;  %8663 = vmatmul.mubr.msk.f32.vlgmr.msra.gmra.mrb[6].mxu0 %vm294_vm0, %v11609_v12  ;;  %v7399_v46 = vld [vmem:[%s14489_s0 + $0x118] sm:$0xff]  ;;  %v9608_v47 = vpack.c.bf16 %v7379_v45, %v7378_v44  ;;  %v7400_v48 = vld [vmem:[%s14489_s0 + $0x120] sm:$0xff]  ;;  %v7381_v50 = vld [vmem:[%s14489_s0 + $0x108] sm:$0xff] }
  0x27   :  { %8634 = vmatprep.mubr.msk.f32.mxu1 %vm294_vm0, %v11653_v20  ;;  %9591 = vmatpush3.bf16.msra.mxu1 %v9588_v58  ;;  %v9616_v49 = vpack.c.bf16 %v7400_v48, %v7399_v46  ;;  %v7401_v51 = vld [vmem:[%s14489_s0 + $0x128] sm:$0xff]  ;;  %v7402_v53 = vld [vmem:[%s14489_s0 + $0x130] sm:$0xff]  ;;  %v7403_v56 = vld [vmem:[%s14489_s0 + $0x138] sm:$0xff] }
  0x28   :  { %8694 = vmatprep.subr.mxu1 %v7319_v60  ;;  %8665 = vmatprep.mubr.msk.f32.mxu0 %vm294_vm0, %v11619_v14  ;;  %v9620_v54 = vpack.c.bf16 %v7402_v53, %v7401_v51  ;;  %v7382_v55 = vld [vmem:[%s14489_s0 + $0x110] sm:$0xff] }
  0x29   :  { %211 = vperm.xlu0 %10290, %v193_v61   ;;  %216 = vperm.xlu1 %10291, %v194_v62  }
  0x2a   :  { %8635 = vmatmul.mubr.msk.f32.gmra.mrb[14].mxu1 %vm294_vm0, %v11673_v24  ;;  %8666 = vmatmul.mubr.msk.f32.gmra.mrb[8].mxu0 %vm294_vm0, %v11643_v18 }
  0x2b   :  { %8637 = vmatprep.mubr.msk.f32.mxu1 %vm294_vm0, %v11593_v8  ;;  %8695 = vmatpush3.msra.mxu1 %v7319_v60 }
  0x2c   :  { %8668 = vmatprep.mubr.msk.f32.mxu0 %vm294_vm0, %v11653_v20  ;;  %9593 = vmatprep.subr.bf16.mxu0 %v9592_v22 }
  0x2d   :  { %231 = vperm.xlu0 %10290, %v197_v63   ;;  %236 = vperm.xlu1 %10291, %v198_v0  }
  0x2e   :  { %8638 = vmatmul.mubr.msk.f32.gmra.mrb[16].mxu1 %vm294_vm0, %v11614_v13  ;;  %8669 = vmatmul.mubr.msk.f32.gmra.mrb[10].mxu0 %vm294_vm0, %v11673_v24 }
  0x2f   :  { %8640 = vmatprep.mubr.msk.f32.mxu1 %vm294_vm0, %v11624_v15  ;;  %8671 = vmatprep.mubr.msk.f32.mxu0 %vm294_vm0, %v11593_v8 }
  0x30   :  { %9601 = vmatprep.subr.bf16.mxu1 %v9600_v28  ;;  %9595 = vmatpush3.bf16.msra.mxu0 %v9592_v22 }
  0x31   :  { %221 = vperm.xlu0 %10290, %v195_v1   ;;  %226 = vperm.xlu1 %10291, %v196_v2  }
  0x32   :  { %8641 = vmatmul.mubr.msk.f32.gmra.mrb[18].mxu1 %vm294_vm0, %v11648_v19  ;;  %8672 = vmatmul.mubr.msk.f32.gmra.mrb[12].mxu0 %vm294_vm0, %v11614_v13 }
  0x33   :  { %8643 = vmatprep.mubr.msk.f32.mxu1 %vm294_vm0, %v11658_v21  ;;  %8674 = vmatprep.mubr.msk.f32.mxu0 %vm294_vm0, %v11624_v15 }
  0x34   :  { %9597 = vmatprep.subr.bf16.mxu0 %v9596_v38 }
  0x35   :  { %241 = vperm.xlu0 %10290, %v199_v3   ;;  %246 = vperm.xlu1 %10291, %v200_v4  }
  0x36   :  { %8644 = vmatmul.mubr.msk.f32.gmra.mrb[20].mxu1 %vm294_vm0, %v11678_v25  ;;  %8675 = vmatmul.mubr.msk.f32.gmra.mrb[14].mxu0 %vm294_vm0, %v11648_v19 }
  0x37   :  { %8646 = vmatprep.mubr.msk.f32.mxu1 %vm294_vm0, %v11696_v29  ;;  %8677 = vmatprep.mubr.msk.f32.mxu0 %vm294_vm0, %v11658_v21 }
  0x38   :  { %9599 = vmatpush3.bf16.msra.mxu0 %v9596_v38 }
  0x39   :  { %251 = vperm.xlu0 %10290, %v201_v6   ;;  %256 = vperm.xlu1 %10291, %v202_v7  }
  0x3a   :  { %8647 = vmatmul.mubr.msk.f32.gmra.mrb[22].mxu1 %vm294_vm0, %v11716_v35  ;;  %8678 = vmatmul.mubr.msk.f32.gmra.mrb[16].mxu0 %vm294_vm0, %v11678_v25 }
  0x3b   :  { %8649 = vmatprep.mubr.msk.f32.mxu1 %vm294_vm0, %v11721_v36  ;;  %8680 = vmatprep.mubr.msk.f32.mxu0 %vm294_vm0, %v11696_v29 }
  0x3c   :  { %8728 = vmatprep.subr.mxu0 %v7340_v42 }
  0x3d   :  { %271 = vperm.xlu0 %10290, %v205_v9   ;;  %276 = vperm.xlu1 %10291, %v206_v10  }
  0x3e   :  { %8650 = vmatmul.mubr.msk.f32.gmra.mrb[24].mxu1 %vm294_vm0, %v11738_v39  ;;  %8681 = vmatmul.mubr.msk.f32.gmra.mrb[18].mxu0 %vm294_vm0, %v11716_v35 }
  0x3f   :  { %8696 = vmatprep.mubr.msk.f32.mxu1 %vm294_vm0, %v11586_v5  ;;  %8683 = vmatprep.mubr.msk.f32.mxu0 %vm294_vm0, %v11721_v36 }
  0x40   :  { %8729 = vmatpush3.msra.mxu0 %v7340_v42 }
  0x41   :  { %261 = vperm.xlu0 %10290, %v203_v26   ;;  %266 = vperm.xlu1 %10291, %v204_v27  }
  0x42   :  { %8697 = vmatmul.mubr.msk.f32.vlgmr.msra.gmra.mrb[26].mxu1 %vm294_vm0, %v11609_v12  ;;  %8684 = vmatmul.mubr.msk.f32.gmra.mrb[20].mxu0 %vm294_vm0, %v11738_v39 }
  0x43   :  { %8699 = vmatprep.mubr.msk.f32.mxu1 %vm294_vm0, %v11619_v14  ;;  %9603 = vmatpush3.bf16.msra.mxu1 %v9600_v28 }
  0x44   :  { %9605 = vmatprep.subr.bf16.mxu1 %v9604_v40  ;;  %8730 = vmatprep.mubr.msk.f32.mxu0 %vm294_vm0, %v11586_v5 }
  0x45   :  { %281 = vperm.xlu0 %10290, %v207_v34   ;;  %286 = vperm.xlu1 %10291, %v208_v37  }
  0x46   :  { %8700 = vmatmul.mubr.msk.f32.gmra.mrb[28].mxu1 %vm294_vm0, %v11643_v18  ;;  %8731 = vmatmul.mubr.msk.f32.vlgmr.msra.gmra.mrb[22].mxu0 %vm294_vm0, %v11609_v12 }
  0x47   :  { %8702 = vmatprep.mubr.msk.f32.mxu1 %vm294_vm0, %v11653_v20  ;;  %9607 = vmatpush3.bf16.msra.mxu1 %v9604_v40 }
  0x48   :  { %8762 = vmatprep.subr.mxu1 %v7361_v43  ;;  %8733 = vmatprep.mubr.msk.f32.mxu0 %vm294_vm0, %v11619_v14 }
  0x49   :  { %6859 = vperm.xlu0 %10290, %v6856_v41   ;;  %9609 = vmatprep.subr.bf16.mxu0 %v9608_v47 }
  0x4a   :  { %8703 = vmatmul.mubr.msk.f32.gmra.mrb[30].mxu1 %vm294_vm0, %v11673_v24  ;;  %8734 = vmatmul.mubr.msk.f32.gmra.mrb[24].mxu0 %vm294_vm0, %v11643_v18 }
  0x4b   :  { %8705 = vmatprep.mubr.msk.f32.mxu1 %vm294_vm0, %v11593_v8  ;;  %8763 = vmatpush3.msra.mxu1 %v7361_v43 }
  0x4c   :  { %8736 = vmatprep.mubr.msk.f32.mxu0 %vm294_vm0, %v11653_v20  ;;  %9617 = vmatprep.subr.bf16.mxu1 %v9616_v49 }
  0x4d   :  { %9611 = vmatpush3.bf16.msra.mxu0 %v9608_v47 }
  0x4e   :  { %8706 = vmatmul.mubr.msk.f32.gmra.mrb[32].mxu1 %vm294_vm0, %v11614_v13  ;;  %8737 = vmatmul.mubr.msk.f32.gmra.mrb[26].mxu0 %vm294_vm0, %v11673_v24 }
  0x4f   :  { %8708 = vmatprep.mubr.msk.f32.mxu1 %vm294_vm0, %v11624_v15  ;;  %8739 = vmatprep.mubr.msk.f32.mxu0 %vm294_vm0, %v11593_v8 }
  0x52   :  { %8709 = vmatmul.mubr.msk.f32.gmra.mrb[34].mxu1 %vm294_vm0, %v11648_v19  ;;  %8740 = vmatmul.mubr.msk.f32.gmra.mrb[28].mxu0 %vm294_vm0, %v11614_v13 }
  0x53   :  { %8711 = vmatprep.mubr.msk.f32.mxu1 %vm294_vm0, %v11658_v21  ;;  %8742 = vmatprep.mubr.msk.f32.mxu0 %vm294_vm0, %v11624_v15 }
  0x56   :  { %8712 = vmatmul.mubr.msk.f32.gmra.mrb[36].mxu1 %vm294_vm0, %v11678_v25  ;;  %8743 = vmatmul.mubr.msk.f32.gmra.mrb[30].mxu0 %vm294_vm0, %v11648_v19 }
  0x57   :  { %8714 = vmatprep.mubr.msk.f32.mxu1 %vm294_vm0, %v11696_v29  ;;  %8745 = vmatprep.mubr.msk.f32.mxu0 %vm294_vm0, %v11658_v21 }
  0x5a   :  { %8715 = vmatmul.mubr.msk.f32.gmra.mrb[38].mxu1 %vm294_vm0, %v11716_v35  ;;  %8746 = vmatmul.mubr.msk.f32.gmra.mrb[32].mxu0 %vm294_vm0, %v11678_v25 }
  0x5b   :  { %8717 = vmatprep.mubr.msk.f32.mxu1 %vm294_vm0, %v11721_v36  ;;  %8748 = vmatprep.mubr.msk.f32.mxu0 %vm294_vm0, %v11696_v29 }
  0x5e   :  { %8718 = vmatmul.mubr.msk.f32.gmra.mrb[40].mxu1 %vm294_vm0, %v11738_v39  ;;  %8749 = vmatmul.mubr.msk.f32.gmra.mrb[34].mxu0 %vm294_vm0, %v11716_v35 }
  0x5f   :  { %8764 = vmatprep.mubr.msk.f32.mxu1 %vm294_vm0, %v11586_v5  ;;  %8751 = vmatprep.mubr.msk.f32.mxu0 %vm294_vm0, %v11721_v36 }
  0x62   :  { %8765 = vmatmul.mubr.msk.f32.vlgmr.msra.gmra.mrb[42].mxu1 %vm294_vm0, %v11609_v12  ;;  %8752 = vmatmul.mubr.msk.f32.gmra.mrb[36].mxu0 %vm294_vm0, %v11738_v39 }
  0x63   :  { %8767 = vmatprep.mubr.msk.f32.mxu1 %vm294_vm0, %v11619_v14  ;;  %8798 = vmatprep.mubr.msk.f32.mxu0 %vm294_vm0, %v11586_v5 }
  0x64   :  { %9619 = vmatpush3.bf16.msra.mxu1 %v9616_v49 }
  0x65   :  { %9621 = vmatprep.subr.bf16.mxu1 %v9620_v54 }
  0x66   :  { %8768 = vmatmul.mubr.msk.f32.gmra.mrb[44].mxu1 %vm294_vm0, %v11643_v18 }
  0x67   :  { %8770 = vmatprep.mubr.msk.f32.mxu1 %vm294_vm0, %v11653_v20 }
  0x68   :  { %9623 = vmatpush3.bf16.msra.mxu1 %v9620_v54 }
  0x69   :  { %8830 = vmatprep.subr.mxu1 %v7403_v56 }
  0x6a   :  { %8771 = vmatmul.mubr.msk.f32.gmra.mrb[46].mxu1 %vm294_vm0, %v11673_v24 }
  0x6b   :  { %8773 = vmatprep.mubr.msk.f32.mxu1 %vm294_vm0, %v11593_v8 }
  0x6c   :  { %8831 = vmatpush3.msra.mxu1 %v7403_v56 }
  0x6e   :  { %8774 = vmatmul.mubr.msk.f32.gmra.mrb[48].mxu1 %vm294_vm0, %v11614_v13 }
  0x6f   :  { %8776 = vmatprep.mubr.msk.f32.mxu1 %vm294_vm0, %v11624_v15 }
  0x72   :  { %8777 = vmatmul.mubr.msk.f32.gmra.mrb[50].mxu1 %vm294_vm0, %v11648_v19 }
  0x73   :  { %8779 = vmatprep.mubr.msk.f32.mxu1 %vm294_vm0, %v11658_v21 }
  0x76   :  { %8780 = vmatmul.mubr.msk.f32.gmra.mrb[52].mxu1 %vm294_vm0, %v11678_v25 }
  0x77   :  { %8782 = vmatprep.mubr.msk.f32.mxu1 %vm294_vm0, %v11696_v29 }
  0x7a   :  { %8783 = vmatmul.mubr.msk.f32.gmra.mrb[54].mxu1 %vm294_vm0, %v11716_v35 }
  0x7b   :  { %8785 = vmatprep.mubr.msk.f32.mxu1 %vm294_vm0, %v11721_v36 }
  0x7e   :  { %8786 = vmatmul.mubr.msk.f32.gmra.mrb[56].mxu1 %vm294_vm0, %v11738_v39 }
  0x7f   :  { %8832 = vmatprep.mubr.msk.f32.mxu1 %vm294_vm0, %v11586_v5  ;;  %v7380_v5 = vld [vmem:[%s14489_s0 + $0x100] sm:$0xff] }
  0x80   :  { %v9612_v52 = vpack.c.bf16 %v7381_v50, %v7380_v5 }
  0x82   :  { %9613 = vmatprep.subr.bf16.mxu0 %v9612_v52  ;;  %8833 = vmatmul.mubr.msk.f32.vlgmr.msra.gmra.mrb[58].mxu1 %vm294_vm0, %v11609_v12 }
  0x83   :  { %9615 = vmatpush3.bf16.msra.mxu0 %v9612_v52  ;;  %8835 = vmatprep.mubr.msk.f32.mxu1 %vm294_vm0, %v11619_v14 }
  0x84   :  { %8796 = vmatprep.subr.mxu0 %v7382_v55 }
  0x86   :  { %8836 = vmatmul.mubr.msk.f32.gmra.mrb[60].mxu1 %vm294_vm0, %v11643_v18 }
  0x87   :  { %8797 = vmatpush3.msra.mxu0 %v7382_v55  ;;  %8838 = vmatprep.mubr.msk.f32.mxu1 %vm294_vm0, %v11653_v20 }
  0x88   :  { %8799 = vmatmul.mubr.msk.f32.vlgmr.msra.gmra.mrb[38].mxu0 %vm294_vm0, %v11609_v12  ;;  %v49_v12 = vld [vmem:[%s14491_s2] sm:$0xff] }
  0x89   :  { %8801 = vmatprep.mubr.msk.f32.mxu0 %vm294_vm0, %v11619_v14  ;;  %v12136_v14 = vpop.permute.xlu1 %135 }
  0x8a   :  { %8839 = vmatmul.mubr.msk.f32.gmra.mrb[62].mxu1 %vm294_vm0, %v11673_v24  ;;  %14623 = vst [vmem:[#allocation8_spill] sm:$0xff] %v12136_v14 }
  0x8b   :  { %8841 = vmatprep.mubr.msk.f32.mxu1 %vm294_vm0, %v11593_v8 }
  0x8c   :  { %8802 = vmatmul.mubr.msk.f32.gmra.mrb[40].mxu0 %vm294_vm0, %v11643_v18 }
  0x8d   :  { %8804 = vmatprep.mubr.msk.f32.mxu0 %vm294_vm0, %v11653_v20  ;;  %v12140_v18 = vpop.permute.xlu1 %140 }
  0x8e   :  { %8842 = vmatmul.mubr.msk.f32.gmra.mrb[64].mxu1 %vm294_vm0, %v11614_v13  ;;  %14625 = vst [vmem:[#allocation10_spill] sm:$0xff] %v12140_v18 }
  0x8f   :  { %8844 = vmatprep.mubr.msk.f32.mxu1 %vm294_vm0, %v11624_v15 }
  0x90   :  { %8805 = vmatmul.mubr.msk.f32.gmra.mrb[42].mxu0 %vm294_vm0, %v11673_v24 }
  0x91   :  { %8807 = vmatprep.mubr.msk.f32.mxu0 %vm294_vm0, %v11593_v8  ;;  %v65_v8 = vld [vmem:[%s14493_s4] sm:$0xff]  ;;  %v12144_v20 = vpop.permute.xlu1 %130 }
  0x92   :  { %8845 = vmatmul.mubr.msk.f32.gmra.mrb[66].mxu1 %vm294_vm0, %v11648_v19  ;;  %14627 = vst [vmem:[#allocation12_spill] sm:$0xff] %v12144_v20 }
  0x93   :  { %8847 = vmatprep.mubr.msk.f32.mxu1 %vm294_vm0, %v11658_v21 }
  0x94   :  { %8808 = vmatmul.mubr.msk.f32.gmra.mrb[44].mxu0 %vm294_vm0, %v11614_v13  ;;  %v12134_v13 = vpop.permute.xlu0 %115 }
  0x95   :  { %8810 = vmatprep.mubr.msk.f32.mxu0 %vm294_vm0, %v11624_v15  ;;  %14622 = vst [vmem:[#allocation7_spill] sm:$0xff] %v12134_v13  ;;  %v12148_v24 = vpop.permute.xlu1 %150 }
  0x96   :  { %8848 = vmatmul.mubr.msk.f32.gmra.mrb[68].mxu1 %vm294_vm0, %v11678_v25  ;;  %14629 = vst [vmem:[#allocation14_spill] sm:$0xff] %v12148_v24 }
  0x97   :  { %8850 = vmatprep.mubr.msk.f32.mxu1 %vm294_vm0, %v11696_v29 }
  0x98   :  { %8811 = vmatmul.mubr.msk.f32.gmra.mrb[46].mxu0 %vm294_vm0, %v11648_v19  ;;  %v12138_v15 = vpop.permute.xlu0 %120 }
  0x99   :  { %8813 = vmatprep.mubr.msk.f32.mxu0 %vm294_vm0, %v11658_v21  ;;  %14624 = vst [vmem:[#allocation9_spill] sm:$0xff] %v12138_v15 }
  0x9a   :  { %8851 = vmatmul.mubr.msk.f32.gmra.mrb[70].mxu1 %vm294_vm0, %v11716_v35 }
  0x9b   :  { %8853 = vmatprep.mubr.msk.f32.mxu1 %vm294_vm0, %v11721_v36 }
  0x9c   :  { %8814 = vmatmul.mubr.msk.f32.gmra.mrb[48].mxu0 %vm294_vm0, %v11678_v25  ;;  %v12142_v19 = vpop.permute.xlu0 %125 }
  0x9d   :  { %8816 = vmatprep.mubr.msk.f32.mxu0 %vm294_vm0, %v11696_v29  ;;  %14626 = vst [vmem:[#allocation11_spill] sm:$0xff] %v12142_v19  ;;  %v12152_v29 = vpop.permute.xlu1 %160 }
  0x9e   :  { %8854 = vmatmul.mubr.msk.f32.gmra.mrb[72].mxu1 %vm294_vm0, %v11738_v39  ;;  %14631 = vst [vmem:[#allocation16_spill] sm:$0xff] %v12152_v29 }
  0x9f   :  { %8864 = vmatprep.mubr.msk.f32.mxu1 %vm1792_vm1, %v49_v12 }
  0xa0   :  { %8817 = vmatmul.mubr.msk.f32.gmra.mrb[50].mxu0 %vm294_vm0, %v11716_v35  ;;  %v12146_v21 = vpop.permute.xlu0 %145 }
  0xa1   :  { %8819 = vmatprep.mubr.msk.f32.mxu0 %vm294_vm0, %v11721_v36  ;;  %14628 = vst [vmem:[#allocation13_spill] sm:$0xff] %v12146_v21  ;;  %v12159_v9 = vpop.permute.xlu1 %180 }
  0xa2   :  { %14632 = vst [vmem:[#allocation17_spill] sm:$0xff] %v12159_v9 }
  0xa4   :  { %8820 = vmatmul.mubr.msk.f32.gmra.mrb[52].mxu0 %vm294_vm0, %v11738_v39  ;;  %v12150_v25 = vpop.permute.xlu0 %155 }
  0xa5   :  { %8896 = vmatprep.mubr.msk.f32.mxu0 %vm1792_vm1, %v65_v8  ;;  %14630 = vst [vmem:[#allocation15_spill] sm:$0xff] %v12150_v25  ;;  %v12167_v33 = vpop.permute.xlu1 %170 }
  0xa6   :  { %14634 = vst [vmem:[#allocation19_spill] sm:$0xff] %v12167_v33 }
  0xa8   :  { %v12162_v11 = vpop.permute.xlu0 %175 }
  0xa9   :  { %14633 = vst [vmem:[#allocation18_spill] sm:$0xff] %v12162_v11 }
  0xac   :  { %v12170_v40 = vpop.permute.xlu0 %165 }
  0xad   :  { %14635 = vst [vmem:[#allocation20_spill] sm:$0xff] %v12170_v40 }
  0xe1   :  { %v8596_v35 = vpop.f32.mrb[0].mxu0  ;;  %v8605_v36 = vpop.f32.mrb[0].mxu1 }
  0xe2   :  { %v415_v39 = vadd.f32 %v8596_v35, %v12138_v15  ;;  %v445_v57 = vadd.f32 %v8605_v36, %v12148_v24  ;;  %v409_v58 = vpop.f32.mrb[1].mxu0  ;;  %v439_v59 = vpop.f32.mrb[1].mxu1 }
  0xe3   :  { %v410_v60 = vadd.f32 %v409_v58, %v12134_v13  ;;  %v440_v61 = vadd.f32 %v439_v59, %v12146_v21 }
  0xe4   :  { %v7421_v62 = vmul.f32 -1.442695, %v415_v39  ;;  %v7427_v63 = vmul.f32 -1.442695, %v445_v57 }
  0xe5   :  { %v7420_v0 = vmul.f32 -1.442695, %v410_v60  ;;  %v7426_v1 = vmul.f32 -1.442695, %v440_v61  ;;  %v8599_v2 = vpop.f32.mrb[2].mxu0  ;;  %v8608_v3 = vpop.f32.mrb[2].mxu1 }
  0xe6   :  { %10292 = vpow2.f32 %v7421_v62  ;;  %v425_v4 = vadd.f32 %v8599_v2, %v12144_v20  ;;  %v419_v6 = vpop.f32.mrb[3].mxu0  ;;  %v449_v7 = vpop.f32.mrb[3].mxu1  ;;  %v455_v31 = vadd.f32 %v8608_v3, %v12152_v29 }
  0xe7   :  { %10294 = vpow2.f32 %v7427_v63  ;;  %v420_v10 = vadd.f32 %v419_v6, %v12142_v19  ;;  %v450_v34 = vadd.f32 %v449_v7, %v12150_v25  ;;  %v12175_v60 = vpop.permute.xlu1 %190 }
  0xe8   :  { %10296 = vpow2.f32 %v7420_v0  ;;  %v7423_v16 = vmul.f32 -1.442695, %v425_v4  ;;  %v7429_v46 = vmul.f32 -1.442695, %v455_v31  ;;  %14636 = vst [vmem:[#allocation21_spill] sm:$0xff] %v12175_v60  ;;  %v12178_v0 = vpop.permute.xlu0 %185 }
  0xe9   :  { %10298 = vpow2.f32 %v7426_v1  ;;  %v7422_v17 = vmul.f32 -1.442695, %v420_v10  ;;  %v8602_v22 = vpop.f32.mrb[4].mxu0  ;;  %v8611_v23 = vpop.f32.mrb[4].mxu1  ;;  %v7428_v49 = vmul.f32 -1.442695, %v450_v34 }
  0xea   :  { %v435_v26 = vadd.f32 %v8602_v22, %v12140_v18  ;;  %v429_v27 = vpop.f32.mrb[5].mxu0  ;;  %v459_v28 = vpop.f32.mrb[5].mxu1  ;;  %10300 = vpow2.f32 %v7423_v16  ;;  %v465_v41 = vadd.f32 %v8611_v23, %v12167_v33  ;;  %14637 = vst [vmem:[#allocation22_spill] sm:$0xff] %v12178_v0 }
  0xeb   :  { %v430_v30 = vadd.f32 %v429_v27, %v12136_v14  ;;  %10302 = vpow2.f32 %v7422_v17  ;;  %v460_v44 = vadd.f32 %v459_v28, %v12170_v40 }
  0xec   :  { %v7425_v32 = vmul.f32 -1.442695, %v435_v26  ;;  %v7431_v51 = vmul.f32 -1.442695, %v465_v41 }
  0xed   :  { %v7424_v37 = vmul.f32 -1.442695, %v430_v30  ;;  %v8614_v38 = vpop.f32.mrb[6].mxu1  ;;  %v7430_v54 = vmul.f32 -1.442695, %v460_v44 }
  0xee   :  { %10304 = vpow2.f32 %v7425_v32  ;;  %v475_v42 = vadd.f32 %v8614_v38, %v12159_v9  ;;  %v469_v43 = vpop.f32.mrb[7].mxu1 }
  0xef   :  { %10306 = vpow2.f32 %v7424_v37  ;;  %v470_v62 = vadd.f32 %v469_v43, %v12162_v11 }
  0xf0   :  { %v10293_v45 = vpop.eup %10292  ;;  %10308 = vtanh.f32 %v475_v42 }
  0xf1   :  { %v10295_v47 = vpop.eup %10294  ;;  %v1733_v48 = vadd.f32 1.0, %v10293_v45  ;;  %v8617_v5 = vpop.f32.mrb[8].mxu1 }
  0xf2   :  { %v10297_v50 = vpop.eup %10296  ;;  %v479_v52 = vpop.f32.mrb[9].mxu1  ;;  %v1739_v55 = vadd.f32 1.0, %v10295_v47  ;;  %v485_v1 = vadd.f32 %v8617_v5, %v12175_v60 }
  0xf3   :  { %v10299_v53 = vpop.eup %10298  ;;  %10310 = vrcp.f32 %v1733_v48  ;;  %v1732_v8 = vadd.f32 1.0, %v10297_v50  ;;  %v480_v3 = vadd.f32 %v479_v52, %v12178_v0 }
  0xf4   :  { %10312 = vpow2.f32 %v7429_v46  ;;  %v10301_v56 = vpop.eup %10300  ;;  %v1738_v12 = vadd.f32 1.0, %v10299_v53 }
  0xf5   :  { %10314 = vpow2.f32 %v7428_v49  ;;  %v10303_v35 = vpop.eup %10302  ;;  %v1735_v39 = vadd.f32 1.0, %v10301_v56 }
  0xf6   :  { %10316 = vpow2.f32 %v7431_v51  ;;  %v1734_v59 = vadd.f32 1.0, %v10303_v35 }
  0xf7   :  { %10318 = vpow2.f32 %v7430_v54 }
  0xf8   :  { %v10305_v36 = vpop.eup %10304  ;;  %10320 = vrcp.f32 %v1739_v55 }
  0xf9   :  { %10322 = vrcp.f32 %v1732_v8  ;;  %v1737_v57 = vadd.f32 1.0, %v10305_v36  ;;  %v10307_v58 = vpop.eup %10306 }
  0xfa   :  { %10324 = vrcp.f32 %v1738_v12  ;;  %v1736_v61 = vadd.f32 1.0, %v10307_v58  ;;  %v10309_v63 = vpop.eup %10308 }
  0xfb   :  { %10326 = vrcp.f32 %v1737_v57 }
  0xfc   :  { %10328 = vrcp.f32 %v1735_v39 }
  0xfd   :  { %v10311_v2 = vpop.eup %10310  ;;  %10330 = vrcp.f32 %v1736_v61 }
  0xfe   :  { %v10313_v4 = vpop.eup %10312  ;;  %10332 = vrcp.f32 %v1734_v59  ;;  %v1777_v6 = vmul.f32 %v10311_v2, %v10309_v63  ;;  %v12197_v63 = vld [vmem:[%s14491_s2 + $0x8] sm:$0xff]  ;;  %v12207_v2 = vld [vmem:[%s14491_s2 + $0x10] sm:$0xff] }
  0xff   :  { %v10315_v7 = vpop.eup %10314  ;;  %10334 = vtanh.f32 %v470_v62  ;;  %v1741_v27 = vadd.f32 1.0, %v10313_v4  ;;  %v12225_v4 = vld [vmem:[%s14491_s2 + $0x18] sm:$0xff] }
 0x100   :  { %v10317_v10 = vpop.eup %10316  ;;  %10336 = vtanh.f32 %v485_v1  ;;  %v1740_v32 = vadd.f32 1.0, %v10315_v7  ;;  %v12202_v1 = vld [vmem:[%s14493_s4 + $0x8] sm:$0xff]  ;;  %v12235_v7 = vld [vmem:[%s14491_s2 + $0x20] sm:$0xff] }
 0x101   :  { %v10319_v16 = vpop.eup %10318  ;;  %10338 = vtanh.f32 %v480_v3  ;;  %v1743_v37 = vadd.f32 1.0, %v10317_v10  ;;  %14638 = vst [vmem:[#allocation23_spill] sm:$0xff] %v12202_v1  ;;  %v12212_v3 = vld [vmem:[%s14493_s4 + $0x10] sm:$0xff]  ;;  %v12240_v10 = vld [vmem:[%s14493_s4 + $0x20] sm:$0xff] }
 0x102   :  { %v10321_v17 = vpop.eup %10320  ;;  %10340 = vrcp.f32 %v1741_v27  ;;  %v1742_v43 = vadd.f32 1.0, %v10319_v16  ;;  %14639 = vst [vmem:[#allocation24_spill] sm:$0xff] %v12212_v3  ;;  %14641 = vst [vmem:[#allocation26_spill] sm:$0xff] %v12240_v10  ;;  %v12253_v16 = vld [vmem:[%s14491_s2 + $0x28] sm:$0xff]  ;;  %v12286_v27 = vld [vmem:[%s14493_s4 + $0x38] sm:$0xff] }
 0x103   :  { %v10323_v22 = vpop.eup %10322  ;;  %v1775_v47 = vmul.f32 0.0, %v10321_v17  ;;  %v12258_v17 = vld [vmem:[%s14493_s4 + $0x28] sm:$0xff]  ;;  %14644 = vst [vmem:[#allocation29_spill] sm:$0xff] %v12286_v27 }
 0x104   :  { %v10325_v23 = vpop.eup %10324  ;;  %14642 = vst [vmem:[#allocation27_spill] sm:$0xff] %v12258_v17 }
 0x105   :  { %v10327_v26 = vpop.eup %10326  ;;  %v1774_v49 = vmul.f32 0.0, %v10325_v23  ;;  %v12268_v23 = vld [vmem:[%s14493_s4 + $0x30] sm:$0xff] }
 0x106   :  { %v10329_v28 = vpop.eup %10328  ;;  %v1773_v30 = vmul.f32 0.0, %v10327_v26  ;;  %14643 = vst [vmem:[#allocation28_spill] sm:$0xff] %v12268_v23  ;;  %v12281_v26 = vld [vmem:[%s14491_s2 + $0x38] sm:$0xff] }
 0x107   :  { %v10331_v31 = vpop.eup %10330 }
 0x108   :  { %v10333_v34 = vpop.eup %10332  ;;  %v1772_v38 = vmul.f32 0.0, %v10331_v31  ;;  %v12182_v41 = vadd.f32 %v1777_v6, %v1773_v30  ;;  %v12230_v6 = vld [vmem:[%s14493_s4 + $0x18] sm:$0xff]  ;;  %v12296_v30 = vld [vmem:[%s14493_s4 + $0x40] sm:$0xff]  ;;  %v12309_v31 = vld [vmem:[%s14491_s2 + $0x48] sm:$0xff] }
 0x109   :  { %v10335_v42 = vpop.eup %10334  ;;  %14640 = vst [vmem:[#allocation25_spill] sm:$0xff] %v12230_v6  ;;  %14645 = vst [vmem:[#allocation30_spill] sm:$0xff] %v12296_v30 }
 0x10a   :  { %v10337_v44 = vpop.eup %10336  ;;  %10342 = vtanh.f32 %v12182_v41  ;;  %v1776_v45 = vmul.f32 %v10335_v42, %v10323_v22  ;;  %v12263_v22 = vld [vmem:[%s14491_s2 + $0x30] sm:$0xff]  ;;  %v12342_v42 = vld [vmem:[%s14493_s4 + $0x58] sm:$0xff] }
 0x10b   :  { %v10339_v46 = vpop.eup %10338  ;;  %10344 = vrcp.f32 %v1740_v32  ;;  %v1779_v48 = vmul.f32 %v10337_v44, %v10329_v28  ;;  %v12291_v28 = vld [vmem:[%s14491_s2 + $0x40] sm:$0xff]  ;;  %v12314_v32 = vld [vmem:[%s14493_s4 + $0x48] sm:$0xff]  ;;  %14648 = vst [vmem:[#allocation33_spill] sm:$0xff] %v12342_v42 }
 0x10c   :  { %10346 = vrcp.f32 %v1743_v37  ;;  %v12185_v5 = vadd.f32 %v1776_v45, %v1772_v38  ;;  %v1778_v50 = vmul.f32 %v10339_v46, %v10333_v34  ;;  %v10341_v53 = vpop.eup %10340  ;;  %14646 = vst [vmem:[#allocation31_spill] sm:$0xff] %v12314_v32  ;;  %v12319_v34 = vld [vmem:[%s14491_s2 + $0x50] sm:$0xff]  ;;  %v12337_v38 = vld [vmem:[%s14491_s2 + $0x58] sm:$0xff]  ;;  %v12352_v44 = vld [vmem:[%s14493_s4 + $0x60] sm:$0xff] }
 0x10d   :  { %10348 = vrcp.f32 %v1742_v43  ;;  %v12187_v51 = vadd.f32 %v1779_v48, %v1775_v47  ;;  %v12324_v37 = vld [vmem:[%s14493_s4 + $0x50] sm:$0xff]  ;;  %v12347_v43 = vld [vmem:[%s14491_s2 + $0x60] sm:$0xff]  ;;  %14649 = vst [vmem:[#allocation34_spill] sm:$0xff] %v12352_v44  ;;  %v12365_v45 = vld [vmem:[%s14491_s2 + $0x68] sm:$0xff] }
 0x10e   :  { %10350 = vtanh.f32 %v12185_v5  ;;  %v12190_v52 = vadd.f32 %v1778_v50, %v1774_v49  ;;  %14647 = vst [vmem:[#allocation32_spill] sm:$0xff] %v12324_v37  ;;  %v12370_v46 = vld [vmem:[%s14493_s4 + $0x68] sm:$0xff]  ;;  %v12375_v47 = vld [vmem:[%s14491_s2 + $0x70] sm:$0xff]  ;;  %v12393_v49 = vld [vmem:[%s14491_s2 + $0x78] sm:$0xff] }
 0x10f   :  { %10352 = vtanh.f32 %v12187_v51  ;;  %14650 = vst [vmem:[#allocation35_spill] sm:$0xff] %v12370_v46  ;;  %v12380_v48 = vld [vmem:[%s14493_s4 + $0x70] sm:$0xff]  ;;  %14652 = vst [vmem:[#allocation37_spill] sm:$0xff] %v12393_v49  ;;  %v12398_v50 = vld [vmem:[%s14493_s4 + $0x78] sm:$0xff] }
 0x110   :  { %10354 = vtanh.f32 %v12190_v52  ;;  %14651 = vst [vmem:[#allocation36_spill] sm:$0xff] %v12380_v48  ;;  %14653 = vst [vmem:[#allocation38_spill] sm:$0xff] %v12398_v50 }
 0x114   :  { %v10343_v54 = vpop.eup %10342 }
 0x115   :  { %v10345_v55 = vpop.eup %10344  ;;  %v1789_v12 = vmul.f32 %v10343_v54, %v10341_v53  ;;  %v12407_v53 = vld [vmem:[%s14494_s5] sm:$0xff]  ;;  %v12413_v54 = vpop.permute.xlu0 %211 }
 0x116   :  { %v10347_v56 = vpop.eup %10346  ;;  %14654 = vst [vmem:[#allocation39_spill] sm:$0xff] %v12407_v53  ;;  %14655 = vst [vmem:[#allocation40_spill] sm:$0xff] %v12413_v54 }
 0x117   :  { %v10349_v8 = vpop.eup %10348 }
 0x118   :  { %v10351_v35 = vpop.eup %10350 }
 0x119   :  { %v10353_v36 = vpop.eup %10352  ;;  %v1788_v39 = vmul.f32 %v10351_v35, %v10345_v55  ;;  %v12415_v55 = vpop.permute.xlu1 %216 }
 0x11a   :  { %v10355_v57 = vpop.eup %10354  ;;  %v1791_v58 = vmul.f32 %v10353_v36, %v10347_v56  ;;  %14656 = vst [vmem:[#allocation41_spill] sm:$0xff] %v12415_v55  ;;  %v12417_v56 = vpop.permute.xlu0 %231 }
 0x11b   :  { %v9624_v59 = vpack.c.bf16 %v1789_v12, %v1788_v39  ;;  %v1790_v61 = vmul.f32 %v10355_v57, %v10349_v8  ;;  %14657 = vst [vmem:[#allocation42_spill] sm:$0xff] %v12417_v56 }
 0x11d   :  { %9625 = vmatprep.subr.bf16.mxu1 %v9624_v59  ;;  %9633 = vmatprep.subr.bf16.mxu0 %v9624_v59  ;;  %v9628_v62 = vpack.c.bf16 %v1791_v58, %v1790_v61  ;;  %v12419_v8 = vpop.permute.xlu1 %236 }
 0x11e   :  { %9627 = vmatpush3.bf16.msra.mxu1 %v9624_v59  ;;  %9635 = vmatpush3.bf16.msra.mxu0 %v9624_v59  ;;  %14658 = vst [vmem:[#allocation43_spill] sm:$0xff] %v12419_v8 }
 0x11f   :  { %9629 = vmatprep.subr.bf16.mxu1 %v9628_v62  ;;  %9637 = vmatprep.subr.bf16.mxu0 %v9628_v62 }
 0x122   :  { %9631 = vmatpush3.bf16.msra.mxu1 %v9628_v62  ;;  %9639 = vmatpush3.bf16.msra.mxu0 %v9628_v62 }
 0x125   :  { %8865 = vmatmul.mubr.msk.f32.vlgmr.msra.gmra.mrb[10].mxu1 %vm1792_vm1, %v12197_v63  ;;  %8897 = vmatmul.mubr.msk.f32.vlgmr.msra.gmra.mrb[54].mxu0 %vm1792_vm1, %v12202_v1 }
 0x126   :  { %8867 = vmatprep.mubr.msk.f32.mxu1 %vm1792_vm1, %v12207_v2  ;;  %8899 = vmatprep.mubr.msk.f32.mxu0 %vm1792_vm1, %v12212_v3 }
 0x129   :  { %8868 = vmatmul.mubr.msk.f32.gmra.mrb[12].mxu1 %vm1792_vm1, %v12225_v4  ;;  %8900 = vmatmul.mubr.msk.f32.gmra.mrb[56].mxu0 %vm1792_vm1, %v12230_v6 }
 0x12a   :  { %8870 = vmatprep.mubr.msk.f32.mxu1 %vm1792_vm1, %v12235_v7  ;;  %8902 = vmatprep.mubr.msk.f32.mxu0 %vm1792_vm1, %v12240_v10 }
 0x12d   :  { %8871 = vmatmul.mubr.msk.f32.gmra.mrb[14].mxu1 %vm1792_vm1, %v12253_v16  ;;  %8903 = vmatmul.mubr.msk.f32.gmra.mrb[58].mxu0 %vm1792_vm1, %v12258_v17 }
 0x12e   :  { %8873 = vmatprep.mubr.msk.f32.mxu1 %vm1792_vm1, %v12263_v22  ;;  %8905 = vmatprep.mubr.msk.f32.mxu0 %vm1792_vm1, %v12268_v23 }
 0x131   :  { %8874 = vmatmul.mubr.msk.f32.gmra.mrb[16].mxu1 %vm1792_vm1, %v12281_v26  ;;  %8906 = vmatmul.mubr.msk.f32.gmra.mrb[60].mxu0 %vm1792_vm1, %v12286_v27 }
 0x132   :  { %8876 = vmatprep.mubr.msk.f32.mxu1 %vm1792_vm1, %v12291_v28  ;;  %8908 = vmatprep.mubr.msk.f32.mxu0 %vm1792_vm1, %v12296_v30 }
 0x135   :  { %8877 = vmatmul.mubr.msk.f32.gmra.mrb[18].mxu1 %vm1792_vm1, %v12309_v31  ;;  %8909 = vmatmul.mubr.msk.f32.gmra.mrb[62].mxu0 %vm1792_vm1, %v12314_v32 }
 0x136   :  { %8879 = vmatprep.mubr.msk.f32.mxu1 %vm1792_vm1, %v12319_v34  ;;  %8911 = vmatprep.mubr.msk.f32.mxu0 %vm1792_vm1, %v12324_v37  ;;  %v12428_v37 = vpop.permute.xlu0 %221 }
 0x137   :  { %14660 = vst [vmem:[#allocation45_spill] sm:$0xff] %v12428_v37 }
 0x139   :  { %8880 = vmatmul.mubr.msk.f32.gmra.mrb[20].mxu1 %vm1792_vm1, %v12337_v38  ;;  %8912 = vmatmul.mubr.msk.f32.gmra.mrb[64].mxu0 %vm1792_vm1, %v12342_v42 }
 0x13a   :  { %8882 = vmatprep.mubr.msk.f32.mxu1 %vm1792_vm1, %v12347_v43  ;;  %8914 = vmatprep.mubr.msk.f32.mxu0 %vm1792_vm1, %v12352_v44 }
 0x13d   :  { %8883 = vmatmul.mubr.msk.f32.gmra.mrb[22].mxu1 %vm1792_vm1, %v12365_v45  ;;  %8915 = vmatmul.mubr.msk.f32.gmra.mrb[66].mxu0 %vm1792_vm1, %v12370_v46  ;;  %v12425_v46 = vpop.permute.xlu1 %226 }
 0x13e   :  { %8885 = vmatprep.mubr.msk.f32.mxu1 %vm1792_vm1, %v12375_v47  ;;  %8917 = vmatprep.mubr.msk.f32.mxu0 %vm1792_vm1, %v12380_v48  ;;  %14659 = vst [vmem:[#allocation44_spill] sm:$0xff] %v12425_v46 }
 0x141   :  { %8886 = vmatmul.mubr.msk.f32.gmra.mrb[24].mxu1 %vm1792_vm1, %v12393_v49  ;;  %8918 = vmatmul.mubr.msk.f32.gmra.mrb[68].mxu0 %vm1792_vm1, %v12398_v50 }
 0x142   :  { %8928 = vmatprep.mubr.msk.f32.mxu0 %vm1792_vm1, %v12407_v53  ;;  %9024 = vmatprep.mubr.msk.f32.mxu1 %vm1792_vm1, %v12407_v53 }
 0x1f8   :  { %v8866_v12 = vpop.f32.mrb[10].mxu1  ;;  %v8898_v35 = vpop.f32.mrb[54].mxu0 }
 0x1f9   :  { %v1907_v36 = vpop.f32.mrb[11].mxu1  ;;  %v2100_v39 = vpop.f32.mrb[55].mxu0  ;;  %v9838_v57 = vadd.f32 %v8866_v12, %v12138_v15  ;;  %v2106_v58 = vadd.f32 %v8898_v35, %v12415_v55 }
 0x1fa   :  { %v9839_v59 = vadd.f32 %v1907_v36, %v12134_v13  ;;  %v2101_v53 = vadd.f32 %v2100_v39, %v12413_v54 }
 0x1fb   :  { %v7493_v44 = vmul.f32 -1.442695, %v9838_v57  ;;  %v7465_v32 = vmul.f32 -1.442695, %v2106_v58 }
 0x1fc   :  { %v8869_v61 = vpop.f32.mrb[12].mxu1  ;;  %v8901_v62 = vpop.f32.mrb[56].mxu0  ;;  %v7492_v15 = vmul.f32 -1.442695, %v9839_v59  ;;  %v7464_v13 = vmul.f32 -1.442695, %v2101_v53 }
 0x1fd   :  { %v1917_v50 = vpop.f32.mrb[13].mxu1  ;;  %v2110_v48 = vpop.f32.mrb[57].mxu0  ;;  %v9840_v42 = vadd.f32 %v8869_v61, %v12144_v20  ;;  %v2116_v12 = vadd.f32 %v8901_v62, %v12425_v46  ;;  %10356 = vpow2.f32 %v7493_v44 }
 0x1fe   :  { %v9841_v35 = vadd.f32 %v1917_v50, %v12142_v19  ;;  %v2111_v39 = vadd.f32 %v2110_v48, %v12428_v37  ;;  %10358 = vpow2.f32 %v7465_v32 }
 0x1ff   :  { %v7495_v27 = vmul.f32 -1.442695, %v9840_v42  ;;  %v7467_v61 = vmul.f32 -1.442695, %v2116_v12  ;;  %10360 = vpow2.f32 %v7492_v15 }
 0x200   :  { %v8872_v36 = vpop.f32.mrb[14].mxu1  ;;  %v8904_v55 = vpop.f32.mrb[58].mxu0  ;;  %v7494_v58 = vmul.f32 -1.442695, %v9841_v35  ;;  %10362 = vpow2.f32 %v7464_v13  ;;  %v7466_v59 = vmul.f32 -1.442695, %v2111_v39 }
 0x201   :  { %v1927_v54 = vpop.f32.mrb[15].mxu1  ;;  %v2120_v30 = vpop.f32.mrb[59].mxu0  ;;  %v9842_v57 = vadd.f32 %v8872_v36, %v12140_v18  ;;  %v2126_v50 = vadd.f32 %v8904_v55, %v12419_v8  ;;  %10364 = vpow2.f32 %v7495_v27 }
 0x202   :  { %v9843_v44 = vadd.f32 %v1927_v54, %v12136_v14  ;;  %10366 = vpow2.f32 %v7467_v61  ;;  %v2121_v32 = vadd.f32 %v2120_v30, %v12417_v56  ;;  %v12448_v54 = vpop.permute.xlu1 %246  ;;  %v12458_v8 = vpop.permute.xlu0 %241 }
 0x203   :  { %v7497_v48 = vmul.f32 -1.442695, %v9842_v57  ;;  %10368 = vpow2.f32 %v7494_v58  ;;  %v7469_v15 = vmul.f32 -1.442695, %v2126_v50  ;;  %14661 = vst [vmem:[#allocation46_spill] sm:$0xff] %v12448_v54  ;;  %14662 = vst [vmem:[#allocation47_spill] sm:$0xff] %v12458_v8 }
 0x204   :  { %v8875_v20 = vpop.f32.mrb[16].mxu1  ;;  %v8907_v62 = vpop.f32.mrb[60].mxu0  ;;  %10370 = vpow2.f32 %v7466_v59  ;;  %v7496_v55 = vmul.f32 -1.442695, %v9843_v44  ;;  %v7468_v61 = vmul.f32 -1.442695, %v2121_v32 }
 0x205   :  { %v1937_v46 = vpop.f32.mrb[17].mxu1  ;;  %v12435_v53 = vpop.f32.mrb[61].mxu0  ;;  %10372 = vpow2.f32 %v7497_v48  ;;  %v9844_v35 = vadd.f32 %v8875_v20, %v12148_v24  ;;  %v2136_v6 = vadd.f32 %v8907_v62, %v12448_v54 }
 0x206   :  { %10374 = vpow2.f32 %v7469_v15  ;;  %v12464_v17 = vpop.permute.xlu1 %256  ;;  %v12476_v49 = vpop.permute.xlu0 %251 }
 0x207   :  { %v10357_v36 = vpop.eup %10356  ;;  %10376 = vpow2.f32 %v7496_v55  ;;  %v7499_v50 = vmul.f32 -1.442695, %v9844_v35  ;;  %14663 = vst [vmem:[#allocation48_spill] sm:$0xff] %v12464_v17  ;;  %14664 = vst [vmem:[#allocation49_spill] sm:$0xff] %v12476_v49  ;;  %v7471_v62 = vmul.f32 -1.442695, %v2136_v6 }
 0x208   :  { %v12438_v42 = vpop.f32.mrb[18].mxu1  ;;  %v12441_v12 = vpop.f32.mrb[62].mxu0  ;;  %v2541_v44 = vadd.f32 1.0, %v10357_v36  ;;  %10378 = vpow2.f32 %v7468_v61 }
 0x209   :  { %v12443_v13 = vpop.f32.mrb[19].mxu1  ;;  %v12446_v27 = vpop.f32.mrb[63].mxu0  ;;  %10380 = vpow2.f32 %v7499_v50  ;;  %v9845_v50 = vadd.f32 %v1937_v46, %v12146_v21  ;;  %v9846_v46 = vadd.f32 %v12438_v42, %v12152_v29  ;;  %v2146_v42 = vadd.f32 %v12441_v12, %v12464_v17 }
 0x20a   :  { %v10359_v57 = vpop.eup %10358  ;;  %10382 = vrcp.f32 %v2541_v44  ;;  %v12486_v6 = vpop.permute.xlu0 %271 }
 0x20b   :  { %v10361_v59 = vpop.eup %10360  ;;  %v2216_v37 = vadd.f32 1.0, %v10359_v57  ;;  %14666 = vst [vmem:[#allocation51_spill] sm:$0xff] %v12486_v6 }
 0x20c   :  { %v12450_v39 = vpop.f32.mrb[20].mxu1  ;;  %v12452_v58 = vpop.f32.mrb[64].mxu0  ;;  %v2540_v18 = vadd.f32 1.0, %v10361_v59 }
 0x20d   :  { %v12454_v30 = vpop.f32.mrb[21].mxu1  ;;  %v12456_v48 = vpop.f32.mrb[65].mxu0  ;;  %10384 = vrcp.f32 %v2216_v37 }
 0x20e   :  { %v10363_v20 = vpop.eup %10362  ;;  %10386 = vrcp.f32 %v2540_v18  ;;  %v2131_v18 = vadd.f32 %v12435_v53, %v12458_v8 }
 0x20f   :  { %v10365_v56 = vpop.eup %10364  ;;  %v2215_v23 = vadd.f32 1.0, %v10363_v20 }
 0x210   :  { %v8884_v24 = vpop.f32.mrb[22].mxu1  ;;  %v10367_v14 = vpop.eup %10366  ;;  %v2543_v36 = vadd.f32 1.0, %v10365_v56 }
 0x211   :  { %v8916_v15 = vpop.f32.mrb[66].mxu0  ;;  %v12460_v32 = vpop.f32.mrb[23].mxu1  ;;  %v2218_v57 = vadd.f32 1.0, %v10367_v14  ;;  %10388 = vrcp.f32 %v2215_v23 }
 0x212   :  { %v10369_v19 = vpop.eup %10368  ;;  %v12462_v55 = vpop.f32.mrb[67].mxu0  ;;  %10390 = vrcp.f32 %v2543_v36 }
 0x213   :  { %v10371_v35 = vpop.eup %10370  ;;  %v2542_v3 = vadd.f32 1.0, %v10369_v19  ;;  %10392 = vrcp.f32 %v2218_v57  ;;  %v7498_v19 = vmul.f32 -1.442695, %v9845_v50  ;;  %v9850_v50 = vadd.f32 %v8884_v24, %v12159_v9 }
 0x214   :  { %v10373_v10 = vpop.eup %10372  ;;  %v12467_v59 = vpop.f32.mrb[24].mxu1  ;;  %v2217_v44 = vadd.f32 1.0, %v10371_v35 }
 0x215   :  { %v12469_v61 = vpop.f32.mrb[68].mxu0  ;;  %v12472_v20 = vpop.f32.mrb[25].mxu1  ;;  %v2545_v14 = vadd.f32 1.0, %v10373_v10  ;;  %10394 = vrcp.f32 %v2542_v3  ;;  %v7470_v10 = vmul.f32 -1.442695, %v2131_v18 }
 0x216   :  { %v12474_v1 = vpop.f32.mrb[69].mxu0  ;;  %v10375_v56 = vpop.eup %10374  ;;  %10396 = vrcp.f32 %v2217_v44  ;;  %v7501_v3 = vmul.f32 -1.442695, %v9846_v46 }
 0x217   :  { %v10377_v37 = vpop.eup %10376  ;;  %v2220_v54 = vadd.f32 1.0, %v10375_v56  ;;  %v12482_v35 = vpop.permute.xlu1 %276  ;;  %10398 = vrcp.f32 %v2545_v14  ;;  %v9847_v56 = vadd.f32 %v12443_v13, %v12150_v25  ;;  %v7473_v13 = vmul.f32 -1.442695, %v2146_v42 }
 0x218   :  { %v10379_v23 = vpop.eup %10378  ;;  %14665 = vst [vmem:[#allocation50_spill] sm:$0xff] %v12482_v35  ;;  %v2544_v21 = vadd.f32 1.0, %v10377_v37  ;;  %10400 = vpow2.f32 %v7471_v62  ;;  %v2166_v14 = vadd.f32 %v8916_v15, %v12482_v35 }
 0x219   :  { %v10381_v36 = vpop.eup %10380  ;;  %10402 = vpow2.f32 %v7498_v19  ;;  %v2219_v62 = vadd.f32 1.0, %v10379_v23  ;;  %v12514_v23 = vpop.permute.xlu0 %261 }
 0x21a   :  { %v12484_v57 = vpop.eup %10382  ;;  %10404 = vrcp.f32 %v2220_v54  ;;  %v2141_v54 = vadd.f32 %v12446_v27, %v12476_v49  ;;  %v2547_v24 = vadd.f32 1.0, %v10381_v36  ;;  %v7500_v27 = vmul.f32 -1.442695, %v9847_v56 }
 0x21b   :  { %v12488_v53 = vpop.eup %10384  ;;  %10406 = vrcp.f32 %v2544_v21  ;;  %v12504_v12 = vpop.permute.xlu1 %266  ;;  %v9848_v21 = vadd.f32 %v12450_v39, %v12167_v33 }
 0x21c   :  { %v12493_v44 = vpop.eup %10386  ;;  %10408 = vpow2.f32 %v7470_v10  ;;  %14667 = vst [vmem:[#allocation52_spill] sm:$0xff] %v12504_v12  ;;  %v2156_v15 = vadd.f32 %v12452_v58, %v12504_v12  ;;  %v9849_v10 = vadd.f32 %v12454_v30, %v12170_v40  ;;  %v7472_v39 = vmul.f32 -1.442695, %v2141_v54 }
 0x21d   :  { %v12498_v37 = vpop.eup %10388  ;;  %10410 = vpow2.f32 %v7501_v3  ;;  %v2151_v3 = vadd.f32 %v12456_v48, %v12514_v23  ;;  %v7503_v58 = vmul.f32 -1.442695, %v9848_v21 }
 0x21e   :  { %v12502_v18 = vpop.eup %10390  ;;  %10412 = vtanh.f32 %v9850_v50  ;;  %v7475_v35 = vmul.f32 -1.442695, %v2156_v15  ;;  %v7502_v56 = vmul.f32 -1.442695, %v9849_v10  ;;  %v2161_v15 = vadd.f32 %v12462_v55, %v12486_v6 }
 0x21f   :  { %v12508_v19 = vpop.eup %10392  ;;  %10414 = vtanh.f32 %v2166_v14  ;;  %v7474_v30 = vmul.f32 -1.442695, %v2151_v3 }
 0x220   :  { %v12512_v46 = vpop.eup %10394  ;;  %10416 = vrcp.f32 %v2219_v62 }
 0x221   :  { %v12518_v36 = vpop.eup %10396  ;;  %10418 = vrcp.f32 %v2547_v24  ;;  %v9851_v24 = vadd.f32 %v12460_v32, %v12162_v11 }
 0x222   :  { %v10399_v42 = vpop.eup %10398  ;;  %10420 = vpow2.f32 %v7473_v13 }
 0x223   :  { %v10401_v50 = vpop.eup %10400  ;;  %10422 = vpow2.f32 %v7500_v27  ;;  %v2581_v48 = vmul.f32 %v10399_v42, %v12182_v41  ;;  %v12529_v42 = vpop.permute.xlu1 %286 }
 0x224   :  { %v10403_v12 = vpop.eup %10402  ;;  %10424 = vpow2.f32 %v7472_v39  ;;  %v2222_v17 = vadd.f32 1.0, %v10401_v50  ;;  %14668 = vst [vmem:[#allocation53_spill] sm:$0xff] %v12529_v42 }
 0x225   :  { %v10405_v49 = vpop.eup %10404  ;;  %10426 = vpow2.f32 %v7503_v58  ;;  %v2546_v54 = vadd.f32 1.0, %v10403_v12 }
 0x226   :  { %v10407_v14 = vpop.eup %10406  ;;  %10428 = vpow2.f32 %v7475_v35  ;;  %v2256_v13 = vmul.f32 0.0, %v10405_v49  ;;  %v9852_v49 = vadd.f32 %v12467_v59, %v12175_v60 }
 0x227   :  { %v10409_v62 = vpop.eup %10408  ;;  %10430 = vpow2.f32 %v7502_v56 }
 0x228   :  { %v10411_v8 = vpop.eup %10410  ;;  %10432 = vpow2.f32 %v7474_v30  ;;  %v2221_v10 = vadd.f32 1.0, %v10409_v62 }
 0x229   :  { %v10413_v21 = vpop.eup %10412  ;;  %10434 = vrcp.f32 %v2222_v17  ;;  %v2549_v35 = vadd.f32 1.0, %v10411_v8  ;;  %v2176_v17 = vadd.f32 %v12469_v61, %v12529_v42  ;;  %v12539_v8 = vpop.permute.xlu0 %281 }
 0x22a   :  { %v10415_v27 = vpop.eup %10414  ;;  %v2585_v39 = vmul.f32 %v10413_v21, %v12484_v57  ;;  %10436 = vrcp.f32 %v2546_v54  ;;  %14669 = vst [vmem:[#allocation54_spill] sm:$0xff] %v12539_v8  ;;  %v2171_v56 = vadd.f32 %v12474_v1, %v12539_v8 }
 0x22b   :  { %v10417_v12 = vpop.eup %10416  ;;  %v2260_v41 = vmul.f32 %v10415_v27, %v12488_v53  ;;  %10438 = vtanh.f32 %v9851_v24  ;;  %v9853_v53 = vadd.f32 %v12472_v20, %v12178_v0  ;;  %v2580_v20 = vmul.f32 %v10407_v14, %v12185_v5 }
 0x22c   :  { %v10419_v3 = vpop.eup %10418  ;;  %v12531_v32 = vadd.f32 %v2585_v39, %v2581_v48  ;;  %10440 = vtanh.f32 %v2161_v15  ;;  %v2255_v1 = vmul.f32 0.0, %v10417_v12 }
 0x22d   :  { %v10421_v55 = vpop.eup %10420  ;;  %v12535_v58 = vadd.f32 %v2260_v41, %v2256_v13  ;;  %10442 = vrcp.f32 %v2221_v10 }
 0x22e   :  { %v10423_v57 = vpop.eup %10422  ;;  %10444 = vrcp.f32 %v2549_v35  ;;  %v2224_v30 = vadd.f32 1.0, %v10421_v55 }
 0x22f   :  { %v10425_v50 = vpop.eup %10424  ;;  %10446 = vtanh.f32 %v9852_v49  ;;  %v2548_v54 = vadd.f32 1.0, %v10423_v57 }
 0x230   :  { %v10427_v59 = vpop.eup %10426  ;;  %10448 = vtanh.f32 %v2176_v17  ;;  %v2223_v61 = vadd.f32 1.0, %v10425_v50  ;;  %v2583_v17 = vmul.f32 %v10419_v3, %v12187_v51 }
 0x231   :  { %v10429_v62 = vpop.eup %10428  ;;  %10450 = vtanh.f32 %v9853_v53  ;;  %v2551_v15 = vadd.f32 1.0, %v10427_v59 }
 0x232   :  { %v10431_v48 = vpop.eup %10430  ;;  %10452 = vtanh.f32 %v2171_v56  ;;  %v2226_v10 = vadd.f32 1.0, %v10429_v62 }
 0x233   :  { %v10433_v24 = vpop.eup %10432  ;;  %10454 = vrcp.f32 %v2224_v30  ;;  %v2550_v5 = vadd.f32 1.0, %v10431_v48 }
 0x234   :  { %v10435_v21 = vpop.eup %10434  ;;  %10456 = vrcp.f32 %v2548_v54  ;;  %v2225_v53 = vadd.f32 1.0, %v10433_v24 }
 0x235   :  { %v10437_v13 = vpop.eup %10436  ;;  %10458 = vrcp.f32 %v2223_v61  ;;  %v2258_v57 = vmul.f32 0.0, %v10435_v21 }
 0x236   :  { %v10439_v27 = vpop.eup %10438  ;;  %10460 = vtanh.f32 %v12531_v32 }
 0x237   :  { %v10441_v39 = vpop.eup %10440  ;;  %v2584_v35 = vmul.f32 %v10439_v27, %v12493_v44  ;;  %10462 = vtanh.f32 %v12535_v58  ;;  %v2582_v44 = vmul.f32 %v10437_v13, %v12190_v52 }
 0x238   :  { %v10443_v41 = vpop.eup %10442  ;;  %v2259_v49 = vmul.f32 %v10441_v39, %v12498_v37  ;;  %10464 = vrcp.f32 %v2551_v15 }
 0x239   :  { %v10445_v55 = vpop.eup %10444  ;;  %v12551_v14 = vadd.f32 %v2584_v35, %v2580_v20  ;;  %10466 = vrcp.f32 %v2226_v10  ;;  %v2257_v30 = vmul.f32 0.0, %v10443_v41 }
 0x23a   :  { %v10447_v12 = vpop.eup %10446  ;;  %v12553_v50 = vadd.f32 %v2259_v49, %v2255_v1 }
 0x23b   :  { %v10449_v56 = vpop.eup %10448  ;;  %10468 = vtanh.f32 %v12551_v14  ;;  %v2587_v37 = vmul.f32 %v10447_v12, %v12502_v18 }
 0x23c   :  { %v10451_v59 = vpop.eup %10450  ;;  %10470 = vtanh.f32 %v12553_v50  ;;  %v2262_v51 = vmul.f32 %v10449_v56, %v12508_v19 }
 0x23d   :  { %v10453_v3 = vpop.eup %10452  ;;  %10472 = vrcp.f32 %v2550_v5  ;;  %v12560_v62 = vadd.f32 %v2587_v37, %v2583_v17  ;;  %v2586_v54 = vmul.f32 %v10451_v59, %v12512_v46 }
 0x23e   :  { %v10455_v48 = vpop.eup %10454  ;;  %10474 = vrcp.f32 %v2225_v53  ;;  %v12563_v61 = vadd.f32 %v2262_v51, %v2258_v57  ;;  %v2261_v52 = vmul.f32 %v10453_v3, %v12518_v36  ;;  %v12585_v3 = vld [vmem:[%s14494_s5 + $0x8] sm:$0xff] }
 0x23f   :  { %v10457_v24 = vpop.eup %10456  ;;  %10476 = vtanh.f32 %v12560_v62  ;;  %v12567_v18 = vadd.f32 %v2586_v54, %v2582_v44  ;;  %v12590_v54 = vld [vmem:[%s14494_s5 + $0x10] sm:$0xff] }
 0x240   :  { %v10459_v21 = vpop.eup %10458  ;;  %10478 = vtanh.f32 %v12563_v61  ;;  %v12570_v19 = vadd.f32 %v2261_v52, %v2257_v30  ;;  %v12604_v52 = vld [vmem:[%s14494_s5 + $0x20] sm:$0xff] }
 0x241   :  { %v10461_v13 = vpop.eup %10460  ;;  %10480 = vtanh.f32 %v12567_v18 }
 0x242   :  { %v10463_v46 = vpop.eup %10462  ;;  %10482 = vtanh.f32 %v12570_v19  ;;  %v2597_v27 = vmul.f32 %v10461_v13, %v10445_v55  ;;  %v12627_v13 = vld [vmem:[%s14494_s5 + $0x38] sm:$0xff] }
 0x243   :  { %v10465_v20 = vpop.eup %10464  ;;  %v2272_v1 = vmul.f32 %v10463_v46, %v10455_v48  ;;  %v12599_v48 = vld [vmem:[%s14494_s5 + $0x18] sm:$0xff]  ;;  %v12632_v46 = vld [vmem:[%s14494_s5 + $0x40] sm:$0xff] }
 0x244   :  { %v10467_v15 = vpop.eup %10466 }
 0x245   :  { %v10469_v36 = vpop.eup %10468 }
 0x246   :  { %v10471_v10 = vpop.eup %10470  ;;  %v2596_v39 = vmul.f32 %v10469_v36, %v10457_v24  ;;  %v12613_v24 = vld [vmem:[%s14494_s5 + $0x28] sm:$0xff]  ;;  %v12660_v36 = vld [vmem:[%s14494_s5 + $0x60] sm:$0xff] }
 0x247   :  { %v10473_v35 = vpop.eup %10472  ;;  %v2271_v41 = vmul.f32 %v10471_v10, %v10459_v21  ;;  %v12618_v21 = vld [vmem:[%s14494_s5 + $0x30] sm:$0xff] }
 0x248   :  { %v10475_v49 = vpop.eup %10474  ;;  %v9648_v17 = vpack.c.bf16 %v2597_v27, %v2596_v39  ;;  %v12655_v27 = vld [vmem:[%s14494_s5 + $0x58] sm:$0xff]  ;;  %v12674_v10 = vld [vmem:[%s14494_s5 + $0x70] sm:$0xff] }
 0x249   :  { %v10477_v5 = vpop.eup %10476  ;;  %v12574_v12 = vpack.c.bf16 %v2272_v1, %v2271_v41  ;;  %v12669_v1 = vld [vmem:[%s14494_s5 + $0x68] sm:$0xff]  ;;  %v12683_v39 = vld [vmem:[%s14494_s5 + $0x78] sm:$0xff]  ;;  %v14685_v41 = vld [vmem:[#allocation35_spill] sm:$0xff] }
 0x24a   :  { %v10479_v57 = vpop.eup %10478  ;;  %v2599_v53 = vmul.f32 %v10477_v5, %v10465_v20  ;;  %v12641_v20 = vld [vmem:[%s14494_s5 + $0x48] sm:$0xff]  ;;  %v14688_v5 = vld [vmem:[#allocation39_spill] sm:$0xff] }
 0x24b   :  { %14670 = vst [vmem:[#allocation55_spill] sm:$0xff] %v12574_v12  ;;  %v10481_v56 = vpop.eup %10480  ;;  %9641 = vmatprep.subr.bf16.mxu0 %v12574_v12  ;;  %v2274_v44 = vmul.f32 %v10479_v57, %v10467_v15  ;;  %v12646_v15 = vld [vmem:[%s14494_s5 + $0x50] sm:$0xff] }
 0x24c   :  { %v10483_v37 = vpop.eup %10482  ;;  %9643 = vmatpush3.bf16.msra.mxu0 %v12574_v12  ;;  %v2598_v55 = vmul.f32 %v10481_v56, %v10473_v35  ;;  %v12690_v35 = vld [vmem:[%s14491_s2] sm:$0xff] }
 0x24d   :  { %v2273_v59 = vmul.f32 %v10483_v37, %v10475_v49  ;;  %v14686_v49 = vld [vmem:[#allocation36_spill] sm:$0xff]  ;;  %v14690_v37 = vld [vmem:[#allocation7_spill] sm:$0xff] }
 0x24e   :  { %v9652_v30 = vpack.c.bf16 %v2599_v53, %v2598_v55  ;;  %v14689_v53 = vld [vmem:[#allocation9_spill] sm:$0xff] }
 0x24f   :  { %v12578_v51 = vpack.c.bf16 %v2274_v44, %v2273_v59 }
 0x251   :  { %14671 = vst [vmem:[#allocation56_spill] sm:$0xff] %v12578_v51  ;;  %9645 = vmatprep.subr.bf16.mxu0 %v12578_v51 }
 0x252   :  { %9647 = vmatpush3.bf16.msra.mxu0 %v12578_v51 }
 0x253   :  { %9649 = vmatprep.subr.bf16.mxu0 %v9648_v17 }
 0x255   :  { %8929 = vmatmul.mubr.msk.f32.vlgmr.msra.gmra.mrb[70].mxu0 %vm1792_vm1, %v12585_v3 }
 0x256   :  { %9651 = vmatpush3.bf16.msra.mxu0 %v9648_v17  ;;  %8931 = vmatprep.mubr.msk.f32.mxu0 %vm1792_vm1, %v12590_v54 }
 0x257   :  { %9653 = vmatprep.subr.bf16.mxu0 %v9652_v30 }
 0x259   :  { %8932 = vmatmul.mubr.msk.f32.gmra.mrb[72].mxu0 %vm1792_vm1, %v12599_v48 }
 0x25a   :  { %9655 = vmatpush3.bf16.msra.mxu0 %v9652_v30  ;;  %8934 = vmatprep.mubr.msk.f32.mxu0 %vm1792_vm1, %v12604_v52 }
 0x25b   :  { %9657 = vmatprep.subr.bf16.mxu0 %v9648_v17 }
 0x25d   :  { %8935 = vmatmul.mubr.msk.f32.gmra.mrb[74].mxu0 %vm1792_vm1, %v12613_v24 }
 0x25e   :  { %8937 = vmatprep.mubr.msk.f32.mxu0 %vm1792_vm1, %v12618_v21 }
 0x261   :  { %8938 = vmatmul.mubr.msk.f32.gmra.mrb[76].mxu0 %vm1792_vm1, %v12627_v13 }
 0x262   :  { %8940 = vmatprep.mubr.msk.f32.mxu0 %vm1792_vm1, %v12632_v46 }
 0x265   :  { %8941 = vmatmul.mubr.msk.f32.gmra.mrb[78].mxu0 %vm1792_vm1, %v12641_v20 }
 0x266   :  { %8943 = vmatprep.mubr.msk.f32.mxu0 %vm1792_vm1, %v12646_v15 }
 0x269   :  { %8944 = vmatmul.mubr.msk.f32.gmra.mrb[80].mxu0 %vm1792_vm1, %v12655_v27 }
 0x26a   :  { %8946 = vmatprep.mubr.msk.f32.mxu0 %vm1792_vm1, %v12660_v36 }
 0x26d   :  { %8947 = vmatmul.mubr.msk.f32.gmra.mrb[82].mxu0 %vm1792_vm1, %v12669_v1 }
 0x26e   :  { %8949 = vmatprep.mubr.msk.f32.mxu0 %vm1792_vm1, %v12674_v10 }
 0x271   :  { %8950 = vmatmul.mubr.msk.f32.gmra.mrb[84].mxu0 %vm1792_vm1, %v12683_v39 }
 0x272   :  { %8960 = vmatprep.mubr.msk.f32.mxu0 %vm1792_vm1, %v12690_v35 }
 0x275   :  { %8961 = vmatmul.mubr.msk.f32.vlgmr.msra.gmra.mrb[6].mxu0 %vm1792_vm1, %v12197_v63  ;;  %v14672_v63 = vld [vmem:[#allocation37_spill] sm:$0xff] }
 0x276   :  { %9659 = vmatpush3.bf16.msra.mxu0 %v9648_v17  ;;  %8963 = vmatprep.mubr.msk.f32.mxu0 %vm1792_vm1, %v12207_v2  ;;  %v12727_v2 = vld [vmem:[%s14493_s4] sm:$0xff]  ;;  %v14687_v17 = vld [vmem:[#allocation38_spill] sm:$0xff] }
 0x277   :  { %9661 = vmatprep.subr.bf16.mxu0 %v9652_v30 }
 0x279   :  { %8964 = vmatmul.mubr.msk.f32.gmra.mrb[8].mxu0 %vm1792_vm1, %v12225_v4  ;;  %v14673_v4 = vld [vmem:[#allocation23_spill] sm:$0xff] }
 0x27a   :  { %9663 = vmatpush3.bf16.msra.mxu0 %v9652_v30  ;;  %8966 = vmatprep.mubr.msk.f32.mxu0 %vm1792_vm1, %v12235_v7  ;;  %v14674_v7 = vld [vmem:[#allocation24_spill] sm:$0xff] }
 0x27d   :  { %8967 = vmatmul.mubr.msk.f32.gmra.mrb[10].mxu0 %vm1792_vm1, %v12253_v16  ;;  %v14675_v16 = vld [vmem:[#allocation25_spill] sm:$0xff] }
 0x27e   :  { %8969 = vmatprep.mubr.msk.f32.mxu0 %vm1792_vm1, %v12263_v22  ;;  %v14676_v22 = vld [vmem:[#allocation26_spill] sm:$0xff] }
 0x281   :  { %8970 = vmatmul.mubr.msk.f32.gmra.mrb[12].mxu0 %vm1792_vm1, %v12281_v26  ;;  %v14677_v26 = vld [vmem:[#allocation27_spill] sm:$0xff] }
 0x282   :  { %8972 = vmatprep.mubr.msk.f32.mxu0 %vm1792_vm1, %v12291_v28  ;;  %v14678_v28 = vld [vmem:[#allocation28_spill] sm:$0xff] }
 0x285   :  { %8973 = vmatmul.mubr.msk.f32.gmra.mrb[14].mxu0 %vm1792_vm1, %v12309_v31  ;;  %v14679_v31 = vld [vmem:[#allocation29_spill] sm:$0xff] }
 0x286   :  { %8975 = vmatprep.mubr.msk.f32.mxu0 %vm1792_vm1, %v12319_v34  ;;  %v14680_v34 = vld [vmem:[#allocation30_spill] sm:$0xff] }
 0x289   :  { %8976 = vmatmul.mubr.msk.f32.gmra.mrb[16].mxu0 %vm1792_vm1, %v12337_v38  ;;  %v14681_v38 = vld [vmem:[#allocation31_spill] sm:$0xff] }
 0x28a   :  { %8978 = vmatprep.mubr.msk.f32.mxu0 %vm1792_vm1, %v12347_v43  ;;  %v14682_v43 = vld [vmem:[#allocation32_spill] sm:$0xff] }
 0x28d   :  { %8979 = vmatmul.mubr.msk.f32.gmra.mrb[18].mxu0 %vm1792_vm1, %v12365_v45  ;;  %v14683_v45 = vld [vmem:[#allocation33_spill] sm:$0xff] }
 0x28e   :  { %8981 = vmatprep.mubr.msk.f32.mxu0 %vm1792_vm1, %v12375_v47  ;;  %v14684_v47 = vld [vmem:[#allocation34_spill] sm:$0xff] }
 0x291   :  { %8982 = vmatmul.mubr.msk.f32.gmra.mrb[20].mxu0 %vm1792_vm1, %v14672_v63 }
 0x292   :  { %8992 = vmatprep.mubr.msk.f32.mxu0 %vm1792_vm1, %v12727_v2 }
 0x295   :  { %8993 = vmatmul.mubr.msk.f32.vlgmr.msra.gmra.mrb[70].mxu0 %vm1792_vm1, %v14673_v4  ;;  %v14691_v4 = vld [vmem:[#allocation12_spill] sm:$0xff] }
 0x296   :  { %8995 = vmatprep.mubr.msk.f32.mxu0 %vm1792_vm1, %v14674_v7 }
 0x299   :  { %8996 = vmatmul.mubr.msk.f32.gmra.mrb[72].mxu0 %vm1792_vm1, %v14675_v16 }
 0x29a   :  { %8998 = vmatprep.mubr.msk.f32.mxu0 %vm1792_vm1, %v14676_v22 }
 0x29d   :  { %8999 = vmatmul.mubr.msk.f32.gmra.mrb[74].mxu0 %vm1792_vm1, %v14677_v26  ;;  %v14692_v26 = vld [vmem:[#allocation11_spill] sm:$0xff] }
 0x29e   :  { %9001 = vmatprep.mubr.msk.f32.mxu0 %vm1792_vm1, %v14678_v28 }
 0x2a1   :  { %9002 = vmatmul.mubr.msk.f32.gmra.mrb[76].mxu0 %vm1792_vm1, %v14679_v31 }
 0x2a2   :  { %9004 = vmatprep.mubr.msk.f32.mxu0 %vm1792_vm1, %v14680_v34  ;;  %v14693_v34 = vld [vmem:[#allocation10_spill] sm:$0xff] }
 0x2a5   :  { %9005 = vmatmul.mubr.msk.f32.gmra.mrb[78].mxu0 %vm1792_vm1, %v14681_v38 }
 0x2a6   :  { %9007 = vmatprep.mubr.msk.f32.mxu0 %vm1792_vm1, %v14682_v43 }
 0x2a9   :  { %9008 = vmatmul.mubr.msk.f32.gmra.mrb[80].mxu0 %vm1792_vm1, %v14683_v45  ;;  %v14694_v45 = vld [vmem:[#allocation8_spill] sm:$0xff] }
 0x2aa   :  { %9010 = vmatprep.mubr.msk.f32.mxu0 %vm1792_vm1, %v14684_v47 }
 0x2ad   :  { %9011 = vmatmul.mubr.msk.f32.gmra.mrb[82].mxu0 %vm1792_vm1, %v14685_v41 }
 0x2ae   :  { %9013 = vmatprep.mubr.msk.f32.mxu0 %vm1792_vm1, %v14686_v49 }
 0x2b1   :  { %9014 = vmatmul.mubr.msk.f32.gmra.mrb[84].mxu0 %vm1792_vm1, %v14687_v17 }
 0x2b2   :  { %9120 = vmatprep.mubr.msk.f32.mxu0 %vm1792_vm1, %v14688_v5 }
 0x348   :  { %v8962_v57 = vpop.f32.mrb[6].mxu0 }
 0x349   :  { %v9854_v56 = vadd.f32 %v8962_v57, %v14689_v53  ;;  %v2666_v44 = vpop.f32.mrb[7].mxu0  ;;  %v14695_v57 = vld [vmem:[#allocation14_spill] sm:$0xff] }
 0x34a   :  { %v9855_v55 = vadd.f32 %v2666_v44, %v14690_v37 }
 0x34b   :  { %v7565_v59 = vmul.f32 -1.442695, %v9854_v56 }
 0x34c   :  { %v7564_v30 = vmul.f32 -1.442695, %v9855_v55  ;;  %v8965_v63 = vpop.f32.mrb[8].mxu0  ;;  %v14696_v55 = vld [vmem:[#allocation13_spill] sm:$0xff] }
 0x34d   :  { %10484 = vpow2.f32 %v7565_v59  ;;  %v9856_v7 = vadd.f32 %v8965_v63, %v14691_v4  ;;  %v2676_v16 = vpop.f32.mrb[9].mxu0 }
 0x34e   :  { %10486 = vpow2.f32 %v7564_v30  ;;  %v9857_v28 = vadd.f32 %v2676_v16, %v14692_v26 }
 0x34f   :  { %v7567_v22 = vmul.f32 -1.442695, %v9856_v7 }
 0x350   :  { %v8968_v31 = vpop.f32.mrb[10].mxu0  ;;  %v7566_v49 = vmul.f32 -1.442695, %v9857_v28 }
 0x351   :  { %10488 = vpow2.f32 %v7567_v22  ;;  %v9858_v38 = vadd.f32 %v8968_v31, %v14693_v34  ;;  %v2686_v43 = vpop.f32.mrb[11].mxu0 }
 0x352   :  { %v9859_v47 = vadd.f32 %v2686_v43, %v14694_v45 }
 0x353   :  { %v7569_v41 = vmul.f32 -1.442695, %v9858_v38 }
 0x354   :  { %v7568_v17 = vmul.f32 -1.442695, %v9859_v47  ;;  %v8971_v5 = vpop.f32.mrb[12].mxu0 }
 0x355   :  { %10490 = vpow2.f32 %v7569_v41  ;;  %v9860_v56 = vadd.f32 %v8971_v5, %v14695_v57  ;;  %v2696_v44 = vpop.f32.mrb[13].mxu0 }
 0x356   :  { %10492 = vpow2.f32 %v7568_v17  ;;  %v9861_v59 = vadd.f32 %v2696_v44, %v14696_v55 }
 0x357   :  { %v10485_v30 = vpop.eup %10484  ;;  %v7571_v63 = vmul.f32 -1.442695, %v9860_v56  ;;  %10494 = vpow2.f32 %v7566_v49 }
 0x358   :  { %v10487_v7 = vpop.eup %10486  ;;  %v3204_v16 = vadd.f32 1.0, %v10485_v30  ;;  %v7570_v22 = vmul.f32 -1.442695, %v9861_v59  ;;  %v8974_v31 = vpop.f32.mrb[14].mxu0 }
 0x359   :  { %10496 = vpow2.f32 %v7571_v63  ;;  %v9862_v38 = vadd.f32 %v8974_v31, %v12152_v29  ;;  %v2706_v28 = vpop.f32.mrb[15].mxu0  ;;  %v3203_v43 = vadd.f32 1.0, %v10487_v7 }
 0x35a   :  { %v9863_v47 = vadd.f32 %v2706_v28, %v12150_v25  ;;  %10498 = vrcp.f32 %v3204_v16 }
 0x35b   :  { %v10489_v41 = vpop.eup %10488  ;;  %v7573_v5 = vmul.f32 -1.442695, %v9862_v38  ;;  %10500 = vpow2.f32 %v7570_v22 }
 0x35c   :  { %v3206_v17 = vadd.f32 1.0, %v10489_v41  ;;  %v7572_v44 = vmul.f32 -1.442695, %v9863_v47  ;;  %v8977_v51 = vpop.f32.mrb[16].mxu0 }
 0x35d   :  { %10502 = vpow2.f32 %v7573_v5  ;;  %v9864_v56 = vadd.f32 %v8977_v51, %v12167_v33  ;;  %v2716_v49 = vpop.f32.mrb[17].mxu0 }
 0x35e   :  { %10504 = vrcp.f32 %v3203_v43  ;;  %v9865_v59 = vadd.f32 %v2716_v49, %v12170_v40 }
 0x35f   :  { %v10491_v30 = vpop.eup %10490  ;;  %10506 = vrcp.f32 %v3206_v17  ;;  %v7575_v63 = vmul.f32 -1.442695, %v9864_v56 }
 0x360   :  { %v10493_v7 = vpop.eup %10492  ;;  %v3208_v31 = vadd.f32 1.0, %v10491_v30  ;;  %10508 = vpow2.f32 %v7572_v44  ;;  %v7574_v28 = vmul.f32 -1.442695, %v9865_v59  ;;  %v8980_v16 = vpop.f32.mrb[18].mxu0 }
 0x361   :  { %v3207_v38 = vadd.f32 1.0, %v10493_v7  ;;  %10510 = vpow2.f32 %v7575_v63  ;;  %v9866_v22 = vadd.f32 %v8980_v16, %v12159_v9  ;;  %v2726_v47 = vpop.f32.mrb[19].mxu0  ;;  %v10495_v41 = vpop.eup %10494  ;;  %v14699_v9 = vld [vmem:[#allocation44_spill] sm:$0xff] }
 0x362   :  { %10512 = vrcp.f32 %v3208_v31  ;;  %v9867_v43 = vadd.f32 %v2726_v47, %v12162_v11  ;;  %v3205_v30 = vadd.f32 1.0, %v10495_v41 }
 0x363   :  { %v10497_v51 = vpop.eup %10496  ;;  %10514 = vrcp.f32 %v3207_v38 }
 0x364   :  { %v3210_v5 = vadd.f32 1.0, %v10497_v51  ;;  %10516 = vpow2.f32 %v7574_v28  ;;  %v8983_v17 = vpop.f32.mrb[20].mxu0  ;;  %v10499_v56 = vpop.eup %10498  ;;  %v14697_v28 = vld [vmem:[#allocation41_spill] sm:$0xff] }
 0x365   :  { %10518 = vtanh.f32 %v9866_v22  ;;  %v9868_v44 = vadd.f32 %v8983_v17, %v12175_v60  ;;  %v2736_v49 = vpop.f32.mrb[21].mxu0  ;;  %v10501_v59 = vpop.eup %10500  ;;  %v14698_v17 = vld [vmem:[#allocation40_spill] sm:$0xff] }
 0x366   :  { %10520 = vrcp.f32 %v3210_v5  ;;  %v3209_v7 = vadd.f32 1.0, %v10501_v59  ;;  %v9869_v31 = vadd.f32 %v2736_v49, %v12178_v0 }
 0x367   :  { %v10503_v63 = vpop.eup %10502  ;;  %10522 = vtanh.f32 %v9867_v43 }
 0x368   :  { %v10505_v16 = vpop.eup %10504  ;;  %v3212_v38 = vadd.f32 1.0, %v10503_v63  ;;  %10524 = vtanh.f32 %v9868_v44  ;;  %v8994_v47 = vpop.f32.mrb[70].mxu0 }
 0x369   :  { %v10507_v51 = vpop.eup %10506  ;;  %10526 = vrcp.f32 %v3209_v7  ;;  %v9950_v12 = vadd.f32 %v8994_v47, %v14697_v28  ;;  %v2811_v22 = vpop.f32.mrb[71].mxu0 }
 0x36a   :  { %v10509_v11 = vpop.eup %10508  ;;  %10528 = vrcp.f32 %v3205_v30  ;;  %v9951_v60 = vadd.f32 %v2811_v22, %v14698_v17  ;;  %v14700_v30 = vld [vmem:[#allocation45_spill] sm:$0xff] }
 0x36b   :  { %v10511_v41 = vpop.eup %10510  ;;  %v3211_v5 = vadd.f32 1.0, %v10509_v11  ;;  %10530 = vtanh.f32 %v9869_v31  ;;  %v7537_v59 = vmul.f32 -1.442695, %v9950_v12 }
 0x36c   :  { %v10513_v43 = vpop.eup %10512  ;;  %10532 = vrcp.f32 %v3212_v38  ;;  %v3214_v49 = vadd.f32 1.0, %v10511_v41  ;;  %v7536_v0 = vmul.f32 -1.442695, %v9951_v60  ;;  %v8997_v63 = vpop.f32.mrb[72].mxu0 }
 0x36d   :  { %v10515_v44 = vpop.eup %10514  ;;  %10534 = vrcp.f32 %v3211_v5  ;;  %v9952_v7 = vadd.f32 %v8997_v63, %v14699_v9  ;;  %v2821_v40 = vpop.f32.mrb[73].mxu0  ;;  %v3244_v28 = vmul.f32 %v10513_v43, %v12531_v32  ;;  %v14701_v9 = vld [vmem:[#allocation43_spill] sm:$0xff] }
 0x36e   :  { %v10517_v47 = vpop.eup %10516  ;;  %10536 = vrcp.f32 %v3214_v49  ;;  %v9953_v22 = vadd.f32 %v2821_v40, %v14700_v30  ;;  %v3243_v38 = vmul.f32 %v10515_v44, %v12551_v14 }
 0x36f   :  { %v10519_v17 = vpop.eup %10518  ;;  %v3213_v11 = vadd.f32 1.0, %v10517_v47  ;;  %10538 = vpow2.f32 %v7537_v59  ;;  %v7539_v12 = vmul.f32 -1.442695, %v9952_v7  ;;  %v14702_v59 = vld [vmem:[#allocation42_spill] sm:$0xff] }
 0x370   :  { %v10521_v31 = vpop.eup %10520  ;;  %v3248_v60 = vmul.f32 %v10519_v17, %v10499_v56  ;;  %10540 = vpow2.f32 %v7536_v0  ;;  %v7538_v41 = vmul.f32 -1.442695, %v9953_v22  ;;  %v9000_v5 = vpop.f32.mrb[74].mxu0 }
 0x371   :  { %v10523_v33 = vpop.eup %10522  ;;  %v3246_v63 = vmul.f32 %v10521_v31, %v12560_v62  ;;  %10542 = vrcp.f32 %v3213_v11  ;;  %v9954_v32 = vadd.f32 %v9000_v5, %v14701_v9  ;;  %v2831_v43 = vpop.f32.mrb[75].mxu0 }
 0x372   :  { %v10525_v49 = vpop.eup %10524  ;;  %v12787_v40 = vadd.f32 %v3248_v60, %v3244_v28  ;;  %v3247_v47 = vmul.f32 %v10523_v33, %v10505_v16  ;;  %10544 = vpow2.f32 %v7539_v12  ;;  %v9955_v7 = vadd.f32 %v2831_v43, %v14702_v59  ;;  %v14704_v33 = vld [vmem:[#allocation46_spill] sm:$0xff]  ;;  %v14705_v60 = vld [vmem:[#allocation47_spill] sm:$0xff] }
 0x373   :  { %v10527_v30 = vpop.eup %10526  ;;  %v3250_v14 = vmul.f32 %v10525_v49, %v10507_v51  ;;  %10546 = vpow2.f32 %v7538_v41  ;;  %v7541_v0 = vmul.f32 -1.442695, %v9954_v32  ;;  %v14707_v49 = vld [vmem:[#allocation48_spill] sm:$0xff] }
 0x374   :  { %v10529_v56 = vpop.eup %10528  ;;  %v3245_v17 = vmul.f32 %v10527_v30, %v12567_v18  ;;  %10548 = vtanh.f32 %v12787_v40  ;;  %v12792_v62 = vadd.f32 %v3247_v47, %v3243_v38  ;;  %v7540_v44 = vmul.f32 -1.442695, %v9955_v7  ;;  %v9003_v22 = vpop.f32.mrb[76].mxu0 }
 0x375   :  { %v10531_v11 = vpop.eup %10530  ;;  %v12794_v28 = vadd.f32 %v3250_v14, %v3246_v63  ;;  %10550 = vpow2.f32 %v7541_v0  ;;  %v9956_v16 = vadd.f32 %v9003_v22, %v14704_v33  ;;  %v2841_v12 = vpop.f32.mrb[77].mxu0 }
 0x376   :  { %v10533_v31 = vpop.eup %10532  ;;  %10552 = vtanh.f32 %v12792_v62  ;;  %v3249_v51 = vmul.f32 %v10531_v11, %v10529_v56  ;;  %v9957_v41 = vadd.f32 %v2841_v12, %v14705_v60  ;;  %v14708_v56 = vld [vmem:[#allocation49_spill] sm:$0xff] }
 0x377   :  { %14703 = vst [vmem:[#allocation37_spill] sm:$0xff] %v12794_v28  ;;  %v10535_v18 = vpop.eup %10534  ;;  %10554 = vtanh.f32 %v12794_v28  ;;  %v7543_v30 = vmul.f32 -1.442695, %v9956_v16 }
 0x378   :  { %v10537_v38 = vpop.eup %10536  ;;  %v12800_v5 = vadd.f32 %v3249_v51, %v3245_v17  ;;  %10556 = vpow2.f32 %v7540_v44  ;;  %v7542_v63 = vmul.f32 -1.442695, %v9957_v41  ;;  %v9006_v32 = vpop.f32.mrb[78].mxu0 }
 0x379   :  { %v10539_v43 = vpop.eup %10538  ;;  %10558 = vpow2.f32 %v7543_v30  ;;  %v9958_v47 = vadd.f32 %v9006_v32, %v14707_v49  ;;  %v2851_v7 = vpop.f32.mrb[79].mxu0  ;;  %v14709_v30 = vld [vmem:[#allocation52_spill] sm:$0xff] }
 0x37a   :  { %14706 = vst [vmem:[#allocation23_spill] sm:$0xff] %v12800_v5  ;;  %v10541_v14 = vpop.eup %10540  ;;  %10560 = vtanh.f32 %v12800_v5  ;;  %v2927_v0 = vadd.f32 1.0, %v10539_v43  ;;  %v9959_v22 = vadd.f32 %v2851_v7, %v14708_v56 }
 0x37b   :  { %v10543_v11 = vpop.eup %10542  ;;  %v2926_v12 = vadd.f32 1.0, %v10541_v14  ;;  %10562 = vpow2.f32 %v7542_v63  ;;  %v7545_v16 = vmul.f32 -1.442695, %v9958_v47 }
 0x37c   :  { %v10545_v17 = vpop.eup %10544  ;;  %v9009_v51 = vpop.f32.mrb[80].mxu0  ;;  %10564 = vrcp.f32 %v2927_v0  ;;  %v7544_v60 = vmul.f32 -1.442695, %v9959_v22 }
 0x37d   :  { %v10547_v44 = vpop.eup %10546  ;;  %v2929_v41 = vadd.f32 1.0, %v10545_v17  ;;  %v9960_v33 = vadd.f32 %v9009_v51, %v14709_v30  ;;  %v2861_v32 = vpop.f32.mrb[81].mxu0  ;;  %10566 = vrcp.f32 %v2926_v12  ;;  %v14710_v51 = vld [vmem:[#allocation50_spill] sm:$0xff] }
 0x37e   :  { %v10549_v49 = vpop.eup %10548  ;;  %v9961_v5 = vadd.f32 %v2861_v32, %v12514_v23  ;;  %10568 = vpow2.f32 %v7545_v16 }
 0x37f   :  { %v10551_v43 = vpop.eup %10550  ;;  %v7547_v7 = vmul.f32 -1.442695, %v9960_v33  ;;  %v3260_v56 = vmul.f32 %v10549_v49, %v10533_v31  ;;  %10570 = vrcp.f32 %v2929_v41 }
 0x380   :  { %v10553_v14 = vpop.eup %10552  ;;  %v2931_v63 = vadd.f32 1.0, %v10551_v43  ;;  %v7546_v47 = vmul.f32 -1.442695, %v9961_v5  ;;  %v9012_v59 = vpop.f32.mrb[82].mxu0  ;;  %10572 = vpow2.f32 %v7544_v60 }
 0x381   :  { %v10555_v9 = vpop.eup %10554  ;;  %v2871_v0 = vpop.f32.mrb[83].mxu0  ;;  %v3259_v22 = vmul.f32 %v10553_v14, %v10535_v18  ;;  %v9962_v30 = vadd.f32 %v9012_v59, %v14710_v51 }
 0x382   :  { %v10557_v17 = vpop.eup %10556  ;;  %10574 = vrcp.f32 %v2931_v63  ;;  %v3262_v33 = vmul.f32 %v10555_v9, %v10537_v38  ;;  %v9963_v60 = vadd.f32 %v2871_v0, %v12486_v6  ;;  %v2928_v63 = vadd.f32 1.0, %v10547_v44 }
 0x383   :  { %v10559_v12 = vpop.eup %10558  ;;  %v2930_v28 = vadd.f32 1.0, %v10557_v17  ;;  %10576 = vpow2.f32 %v7547_v7  ;;  %v12808_v32 = vpack.c.bf16 %v3260_v56, %v3259_v22 }
 0x384   :  { %v10561_v31 = vpop.eup %10560  ;;  %v2933_v49 = vadd.f32 1.0, %v10559_v12  ;;  %10578 = vpow2.f32 %v7546_v47  ;;  %v9015_v16 = vpop.f32.mrb[84].mxu0 }
 0x385   :  { %v10563_v5 = vpop.eup %10562  ;;  %10580 = vrcp.f32 %v2930_v28  ;;  %v2881_v41 = vpop.f32.mrb[85].mxu0  ;;  %v3261_v18 = vmul.f32 %v10561_v31, %v10543_v11  ;;  %v9964_v59 = vadd.f32 %v9015_v16, %v12529_v42 }
 0x386   :  { %10582 = vrcp.f32 %v2933_v49  ;;  %v2932_v43 = vadd.f32 1.0, %v10563_v5  ;;  %v10565_v14 = vpop.eup %10564  ;;  %v9965_v38 = vadd.f32 %v2881_v41, %v12539_v8 }
 0x387   :  { %10584 = vtanh.f32 %v9962_v30  ;;  %v12812_v56 = vpack.c.bf16 %v3262_v33, %v3261_v18  ;;  %v10567_v9 = vpop.eup %10566 }
 0x388   :  { %10586 = vrcp.f32 %v2932_v43  ;;  %v10569_v7 = vpop.eup %10568 }
 0x389   :  { %10588 = vtanh.f32 %v9963_v60  ;;  %v10571_v28 = vpop.eup %10570  ;;  %v2935_v30 = vadd.f32 1.0, %v10569_v7 }
 0x38a   :  { %10590 = vtanh.f32 %v9964_v59  ;;  %v10573_v47 = vpop.eup %10572 }
 0x38b   :  { %10592 = vrcp.f32 %v2928_v63  ;;  %v2934_v31 = vadd.f32 1.0, %v10573_v47 }
 0x38c   :  { %v10575_v11 = vpop.eup %10574  ;;  %10594 = vtanh.f32 %v9965_v38 }
 0x38d   :  { %v10577_v0 = vpop.eup %10576  ;;  %v2967_v44 = vmul.f32 %v10575_v11, %v12535_v58  ;;  %10596 = vrcp.f32 %v2935_v30 }
 0x38e   :  { %v10579_v22 = vpop.eup %10578  ;;  %v2937_v18 = vadd.f32 1.0, %v10577_v0  ;;  %10598 = vrcp.f32 %v2934_v31 }
 0x38f   :  { %v10581_v17 = vpop.eup %10580  ;;  %v2936_v47 = vadd.f32 1.0, %v10579_v22 }
 0x390   :  { %v10583_v12 = vpop.eup %10582  ;;  %v2966_v16 = vmul.f32 %v10581_v17, %v12553_v50 }
 0x391   :  { %v10585_v33 = vpop.eup %10584  ;;  %v2969_v41 = vmul.f32 %v10583_v12, %v12563_v61 }
 0x392   :  { %v10587_v49 = vpop.eup %10586  ;;  %v2971_v5 = vmul.f32 %v10585_v33, %v10565_v14 }
 0x393   :  { %v10589_v60 = vpop.eup %10588  ;;  %v2968_v8 = vmul.f32 %v10587_v49, %v12570_v19 }
 0x394   :  { %v10591_v43 = vpop.eup %10590  ;;  %v12818_v59 = vadd.f32 %v2971_v5, %v2967_v44  ;;  %v2970_v63 = vmul.f32 %v10589_v60, %v10567_v9  ;;  %v13017_v5 = vld [vmem:[%s14493_s4 + $0x28] sm:$0xff]  ;;  %v13024_v60 = vld [vmem:[%s14493_s4 + $0x30] sm:$0xff] }
 0x395   :  { %v10593_v38 = vpop.eup %10592  ;;  %v2973_v58 = vmul.f32 %v10591_v43, %v10571_v28  ;;  %v13045_v43 = vld [vmem:[%s14493_s4 + $0x48] sm:$0xff] }
 0x396   :  { %v10595_v7 = vpop.eup %10594  ;;  %10600 = vtanh.f32 %v12818_v59  ;;  %v12822_v50 = vadd.f32 %v2970_v63, %v2966_v16  ;;  %v13052_v63 = vld [vmem:[%s14493_s4 + $0x50] sm:$0xff] }
 0x397   :  { %10602 = vrcp.f32 %v2937_v18  ;;  %v12824_v14 = vadd.f32 %v2973_v58, %v2969_v41  ;;  %v2972_v61 = vmul.f32 %v10595_v7, %v10593_v38  ;;  %v10597_v19 = vpop.eup %10596  ;;  %v13031_v41 = vld [vmem:[%s14493_s4 + $0x38] sm:$0xff]  ;;  %v13038_v18 = vld [vmem:[%s14493_s4 + $0x40] sm:$0xff]  ;;  %v13073_v7 = vld [vmem:[%s14493_s4 + $0x68] sm:$0xff] }
 0x398   :  { %10604 = vtanh.f32 %v12822_v50  ;;  %v10599_v28 = vpop.eup %10598  ;;  %v13059_v38 = vld [vmem:[%s14493_s4 + $0x58] sm:$0xff]  ;;  %v13066_v58 = vld [vmem:[%s14493_s4 + $0x60] sm:$0xff] }
 0x399   :  { %10606 = vtanh.f32 %v12824_v14  ;;  %v12828_v9 = vadd.f32 %v2972_v61, %v2968_v8  ;;  %v13087_v61 = vld [vmem:[%s14493_s4 + $0x78] sm:$0xff] }
 0x39a   :  { %10608 = vrcp.f32 %v2936_v47  ;;  %v13080_v47 = vld [vmem:[%s14493_s4 + $0x70] sm:$0xff]  ;;  %14714 = vst [vmem:[#allocation27_spill] sm:$0xff] %v13087_v61 }
 0x39b   :  { %10610 = vtanh.f32 %v12828_v9  ;;  %14713 = vst [vmem:[#allocation26_spill] sm:$0xff] %v13080_v47 }
 0x3a0   :  { %v10601_v11 = vpop.eup %10600 }
 0x3a1   :  { %v10603_v0 = vpop.eup %10602  ;;  %v2983_v22 = vmul.f32 %v10601_v11, %v10597_v19  ;;  %v13094_v19 = vld [vmem:[%s14494_s5] sm:$0xff] }
 0x3a2   :  { %v10605_v17 = vpop.eup %10604  ;;  %14715 = vst [vmem:[#allocation28_spill] sm:$0xff] %v13094_v19 }
 0x3a3   :  { %v10607_v12 = vpop.eup %10606  ;;  %v2982_v44 = vmul.f32 %v10605_v17, %v10599_v28 }
 0x3a4   :  { %v10609_v30 = vpop.eup %10608  ;;  %v2985_v33 = vmul.f32 %v10607_v12, %v10603_v0 }
 0x3a5   :  { %v10611_v31 = vpop.eup %10610  ;;  %v12831_v49 = vpack.c.bf16 %v2983_v22, %v2982_v44 }
 0x3a6   :  { %v2984_v16 = vmul.f32 %v10611_v31, %v10609_v30 }
 0x3a7   :  { %14711 = vst [vmem:[#allocation24_spill] sm:$0xff] %v12831_v49  ;;  %9665 = vmatprep.subr.bf16.mxu1 %v12831_v49 }
 0x3a8   :  { %9667 = vmatpush3.bf16.msra.mxu1 %v12831_v49  ;;  %v12835_v8 = vpack.c.bf16 %v2985_v33, %v2984_v16 }
 0x3aa   :  { %14712 = vst [vmem:[#allocation25_spill] sm:$0xff] %v12835_v8  ;;  %9669 = vmatprep.subr.bf16.mxu1 %v12835_v8 }
 0x3ac   :  { %9671 = vmatpush3.bf16.msra.mxu1 %v12835_v8 }
 0x3ad   :  { %9673 = vmatprep.subr.bf16.mxu1 %v12808_v32 }
 0x3af   :  { %9025 = vmatmul.mubr.msk.f32.vlgmr.msra.gmra.mrb[74].mxu1 %vm1792_vm1, %v12585_v3  ;;  %v12879_v3 = vld [vmem:[%s14491_s2 + $0x8] sm:$0xff] }
 0x3b0   :  { %9675 = vmatpush3.bf16.msra.mxu1 %v12808_v32  ;;  %9027 = vmatprep.mubr.msk.f32.mxu1 %vm1792_vm1, %v12590_v54  ;;  %v12887_v54 = vld [vmem:[%s14491_s2 + $0x10] sm:$0xff] }
 0x3b1   :  { %9677 = vmatprep.subr.bf16.mxu1 %v12812_v56 }
 0x3b3   :  { %9028 = vmatmul.mubr.msk.f32.gmra.mrb[76].mxu1 %vm1792_vm1, %v12599_v48  ;;  %v12895_v48 = vld [vmem:[%s14491_s2 + $0x18] sm:$0xff] }
 0x3b4   :  { %9679 = vmatpush3.bf16.msra.mxu1 %v12812_v56  ;;  %9030 = vmatprep.mubr.msk.f32.mxu1 %vm1792_vm1, %v12604_v52  ;;  %v12903_v52 = vld [vmem:[%s14491_s2 + $0x20] sm:$0xff] }
 0x3b5   :  { %9681 = vmatprep.subr.bf16.mxu1 %v12808_v32 }
 0x3b7   :  { %9031 = vmatmul.mubr.msk.f32.gmra.mrb[78].mxu1 %vm1792_vm1, %v12613_v24  ;;  %v12910_v24 = vld [vmem:[%s14491_s2 + $0x28] sm:$0xff] }
 0x3b8   :  { %9033 = vmatprep.mubr.msk.f32.mxu1 %vm1792_vm1, %v12618_v21  ;;  %v12917_v21 = vld [vmem:[%s14491_s2 + $0x30] sm:$0xff] }
 0x3bb   :  { %9034 = vmatmul.mubr.msk.f32.gmra.mrb[80].mxu1 %vm1792_vm1, %v12627_v13  ;;  %v12924_v13 = vld [vmem:[%s14491_s2 + $0x38] sm:$0xff] }
 0x3bc   :  { %9036 = vmatprep.mubr.msk.f32.mxu1 %vm1792_vm1, %v12632_v46  ;;  %v12931_v46 = vld [vmem:[%s14491_s2 + $0x40] sm:$0xff] }
 0x3bf   :  { %9037 = vmatmul.mubr.msk.f32.gmra.mrb[82].mxu1 %vm1792_vm1, %v12641_v20  ;;  %v12938_v20 = vld [vmem:[%s14491_s2 + $0x48] sm:$0xff] }
 0x3c0   :  { %9039 = vmatprep.mubr.msk.f32.mxu1 %vm1792_vm1, %v12646_v15  ;;  %v12945_v15 = vld [vmem:[%s14491_s2 + $0x50] sm:$0xff] }
 0x3c3   :  { %9040 = vmatmul.mubr.msk.f32.gmra.mrb[84].mxu1 %vm1792_vm1, %v12655_v27  ;;  %v12952_v27 = vld [vmem:[%s14491_s2 + $0x58] sm:$0xff] }
 0x3c4   :  { %9042 = vmatprep.mubr.msk.f32.mxu1 %vm1792_vm1, %v12660_v36  ;;  %v12959_v36 = vld [vmem:[%s14491_s2 + $0x60] sm:$0xff] }
 0x3c7   :  { %9043 = vmatmul.mubr.msk.f32.gmra.mrb[86].mxu1 %vm1792_vm1, %v12669_v1  ;;  %v12966_v1 = vld [vmem:[%s14491_s2 + $0x68] sm:$0xff] }
 0x3c8   :  { %9045 = vmatprep.mubr.msk.f32.mxu1 %vm1792_vm1, %v12674_v10  ;;  %v12973_v10 = vld [vmem:[%s14491_s2 + $0x70] sm:$0xff] }
 0x3cb   :  { %9046 = vmatmul.mubr.msk.f32.gmra.mrb[88].mxu1 %vm1792_vm1, %v12683_v39  ;;  %v12980_v39 = vld [vmem:[%s14491_s2 + $0x78] sm:$0xff] }
 0x3cc   :  { %9056 = vmatprep.mubr.msk.f32.mxu1 %vm1792_vm1, %v12690_v35  ;;  %v12989_v35 = vld [vmem:[%s14493_s4 + $0x8] sm:$0xff] }
 0x3cf   :  { %9057 = vmatmul.mubr.msk.f32.vlgmr.msra.gmra.mrb[26].mxu1 %vm1792_vm1, %v12879_v3 }
 0x3d0   :  { %9683 = vmatpush3.bf16.msra.mxu1 %v12808_v32  ;;  %9059 = vmatprep.mubr.msk.f32.mxu1 %vm1792_vm1, %v12887_v54  ;;  %v12996_v32 = vld [vmem:[%s14493_s4 + $0x10] sm:$0xff] }
 0x3d1   :  { %9685 = vmatprep.subr.bf16.mxu1 %v12812_v56 }
 0x3d3   :  { %9060 = vmatmul.mubr.msk.f32.gmra.mrb[28].mxu1 %vm1792_vm1, %v12895_v48 }
 0x3d4   :  { %9687 = vmatpush3.bf16.msra.mxu1 %v12812_v56  ;;  %9062 = vmatprep.mubr.msk.f32.mxu1 %vm1792_vm1, %v12903_v52  ;;  %v13010_v56 = vld [vmem:[%s14493_s4 + $0x20] sm:$0xff] }
 0x3d7   :  { %9063 = vmatmul.mubr.msk.f32.gmra.mrb[30].mxu1 %vm1792_vm1, %v12910_v24 }
 0x3d8   :  { %9065 = vmatprep.mubr.msk.f32.mxu1 %vm1792_vm1, %v12917_v21 }
 0x3db   :  { %9066 = vmatmul.mubr.msk.f32.gmra.mrb[32].mxu1 %vm1792_vm1, %v12924_v13 }
 0x3dc   :  { %9068 = vmatprep.mubr.msk.f32.mxu1 %vm1792_vm1, %v12931_v46 }
 0x3df   :  { %9069 = vmatmul.mubr.msk.f32.gmra.mrb[34].mxu1 %vm1792_vm1, %v12938_v20 }
 0x3e0   :  { %9071 = vmatprep.mubr.msk.f32.mxu1 %vm1792_vm1, %v12945_v15 }
 0x3e3   :  { %9072 = vmatmul.mubr.msk.f32.gmra.mrb[36].mxu1 %vm1792_vm1, %v12952_v27 }
 0x3e4   :  { %9074 = vmatprep.mubr.msk.f32.mxu1 %vm1792_vm1, %v12959_v36 }
 0x3e7   :  { %9075 = vmatmul.mubr.msk.f32.gmra.mrb[38].mxu1 %vm1792_vm1, %v12966_v1 }
 0x3e8   :  { %9077 = vmatprep.mubr.msk.f32.mxu1 %vm1792_vm1, %v12973_v10 }
 0x3eb   :  { %9078 = vmatmul.mubr.msk.f32.gmra.mrb[40].mxu1 %vm1792_vm1, %v12980_v39 }
 0x3ec   :  { %9088 = vmatprep.mubr.msk.f32.mxu1 %vm1792_vm1, %v12727_v2  ;;  %v13003_v2 = vld [vmem:[%s14493_s4 + $0x18] sm:$0xff] }
 0x3ef   :  { %9089 = vmatmul.mubr.msk.f32.vlgmr.msra.gmra.mrb[74].mxu1 %vm1792_vm1, %v12989_v35 }
 0x3f0   :  { %9091 = vmatprep.mubr.msk.f32.mxu1 %vm1792_vm1, %v12996_v32 }
 0x3f3   :  { %9092 = vmatmul.mubr.msk.f32.gmra.mrb[76].mxu1 %vm1792_vm1, %v13003_v2 }
 0x3f4   :  { %9094 = vmatprep.mubr.msk.f32.mxu1 %vm1792_vm1, %v13010_v56 }
 0x3f7   :  { %9095 = vmatmul.mubr.msk.f32.gmra.mrb[78].mxu1 %vm1792_vm1, %v13017_v5 }
 0x3f8   :  { %9097 = vmatprep.mubr.msk.f32.mxu1 %vm1792_vm1, %v13024_v60 }
 0x3fb   :  { %9098 = vmatmul.mubr.msk.f32.gmra.mrb[80].mxu1 %vm1792_vm1, %v13031_v41 }
 0x3fc   :  { %9100 = vmatprep.mubr.msk.f32.mxu1 %vm1792_vm1, %v13038_v18 }
 0x3ff   :  { %9101 = vmatmul.mubr.msk.f32.gmra.mrb[82].mxu1 %vm1792_vm1, %v13045_v43 }
 0x400   :  { %9103 = vmatprep.mubr.msk.f32.mxu1 %vm1792_vm1, %v13052_v63 }
 0x403   :  { %9104 = vmatmul.mubr.msk.f32.gmra.mrb[84].mxu1 %vm1792_vm1, %v13059_v38 }
 0x404   :  { %9106 = vmatprep.mubr.msk.f32.mxu1 %vm1792_vm1, %v13066_v58 }
 0x407   :  { %9107 = vmatmul.mubr.msk.f32.gmra.mrb[86].mxu1 %vm1792_vm1, %v13073_v7 }
 0x408   :  { %9109 = vmatprep.mubr.msk.f32.mxu1 %vm1792_vm1, %v13080_v47  ;;  %v14727_v47 = vld [vmem:[#allocation43_spill] sm:$0xff] }
 0x40b   :  { %9110 = vmatmul.mubr.msk.f32.gmra.mrb[88].mxu1 %vm1792_vm1, %v13087_v61 }
 0x40c   :  { %9216 = vmatprep.mubr.msk.f32.mxu1 %vm1792_vm1, %v13094_v19 }
 0x4a2   :  { %v9058_v28 = vpop.f32.mrb[26].mxu1 }
 0x4a3   :  { %v9870_v11 = vadd.f32 %v9058_v28, %v14689_v53  ;;  %v3329_v0 = vpop.f32.mrb[27].mxu1 }
 0x4a4   :  { %v9871_v22 = vadd.f32 %v3329_v0, %v14690_v37 }
 0x4a5   :  { %v7637_v17 = vmul.f32 -1.442695, %v9870_v11 }
 0x4a6   :  { %v7636_v12 = vmul.f32 -1.442695, %v9871_v22  ;;  %v9061_v44 = vpop.f32.mrb[28].mxu1 }
 0x4a7   :  { %10612 = vpow2.f32 %v7637_v17  ;;  %v9872_v30 = vadd.f32 %v9061_v44, %v14691_v4  ;;  %v3339_v33 = vpop.f32.mrb[29].mxu1  ;;  %v14724_v4 = vld [vmem:[#allocation44_spill] sm:$0xff] }
 0x4a8   :  { %10614 = vpow2.f32 %v7636_v12  ;;  %v9873_v16 = vadd.f32 %v3339_v33, %v14692_v26 }
 0x4a9   :  { %v7639_v31 = vmul.f32 -1.442695, %v9872_v30 }
 0x4aa   :  { %v9064_v8 = vpop.f32.mrb[30].mxu1  ;;  %v7638_v0 = vmul.f32 -1.442695, %v9873_v16 }
 0x4ab   :  { %10616 = vpow2.f32 %v7639_v31  ;;  %v9874_v49 = vadd.f32 %v9064_v8, %v14693_v34  ;;  %v3349_v19 = vpop.f32.mrb[31].mxu1 }
 0x4ac   :  { %v9875_v28 = vadd.f32 %v3349_v19, %v14694_v45 }
 0x4ad   :  { %v7641_v53 = vmul.f32 -1.442695, %v9874_v49 }
 0x4ae   :  { %v7640_v11 = vmul.f32 -1.442695, %v9875_v28  ;;  %v9067_v22 = vpop.f32.mrb[32].mxu1 }
 0x4af   :  { %10618 = vpow2.f32 %v7641_v53  ;;  %v9876_v17 = vadd.f32 %v9067_v22, %v14695_v57  ;;  %v3359_v44 = vpop.f32.mrb[33].mxu1 }
 0x4b0   :  { %10620 = vpow2.f32 %v7640_v11  ;;  %v9877_v12 = vadd.f32 %v3359_v44, %v14696_v55 }
 0x4b1   :  { %v10613_v30 = vpop.eup %10612  ;;  %v7643_v33 = vmul.f32 -1.442695, %v9876_v17  ;;  %10622 = vpow2.f32 %v7638_v0  ;;  %v14716_v17 = vld [vmem:[#allocation19_spill] sm:$0xff] }
 0x4b2   :  { %v10615_v26 = vpop.eup %10614  ;;  %v3867_v31 = vadd.f32 1.0, %v10613_v30  ;;  %v7642_v8 = vmul.f32 -1.442695, %v9877_v12  ;;  %v9070_v34 = vpop.f32.mrb[34].mxu1  ;;  %v14717_v12 = vld [vmem:[#allocation20_spill] sm:$0xff] }
 0x4b3   :  { %10624 = vpow2.f32 %v7643_v33  ;;  %v9878_v49 = vadd.f32 %v9070_v34, %v12152_v29  ;;  %v3369_v19 = vpop.f32.mrb[35].mxu1  ;;  %v3866_v16 = vadd.f32 1.0, %v10615_v26 }
 0x4b4   :  { %v9879_v53 = vadd.f32 %v3369_v19, %v12150_v25  ;;  %10626 = vrcp.f32 %v3867_v31 }
 0x4b5   :  { %v10617_v28 = vpop.eup %10616  ;;  %v7645_v22 = vmul.f32 -1.442695, %v9878_v49  ;;  %10628 = vpow2.f32 %v7642_v8  ;;  %v14718_v8 = vld [vmem:[#allocation17_spill] sm:$0xff] }
 0x4b6   :  { %v3869_v11 = vadd.f32 1.0, %v10617_v28  ;;  %v7644_v44 = vmul.f32 -1.442695, %v9879_v53  ;;  %v9073_v55 = vpop.f32.mrb[36].mxu1 }
 0x4b7   :  { %10630 = vpow2.f32 %v7645_v22  ;;  %v9880_v30 = vadd.f32 %v9073_v55, %v14716_v17  ;;  %v3379_v0 = vpop.f32.mrb[37].mxu1 }
 0x4b8   :  { %10632 = vrcp.f32 %v3866_v16  ;;  %v9881_v33 = vadd.f32 %v3379_v0, %v14717_v12  ;;  %v14719_v16 = vld [vmem:[#allocation18_spill] sm:$0xff] }
 0x4b9   :  { %v10619_v57 = vpop.eup %10618  ;;  %10634 = vrcp.f32 %v3869_v11  ;;  %v7647_v34 = vmul.f32 -1.442695, %v9880_v30 }
 0x4ba   :  { %v10621_v26 = vpop.eup %10620  ;;  %v3871_v29 = vadd.f32 1.0, %v10619_v57  ;;  %10636 = vpow2.f32 %v7644_v44  ;;  %v7646_v19 = vmul.f32 -1.442695, %v9881_v33  ;;  %v9076_v31 = vpop.f32.mrb[38].mxu1  ;;  %v14720_v57 = vld [vmem:[#allocation21_spill] sm:$0xff] }
 0x4bb   :  { %v3870_v49 = vadd.f32 1.0, %v10621_v26  ;;  %10638 = vpow2.f32 %v7647_v34  ;;  %v9882_v53 = vadd.f32 %v9076_v31, %v14718_v8  ;;  %v3389_v28 = vpop.f32.mrb[39].mxu1  ;;  %v10623_v22 = vpop.eup %10622  ;;  %v14721_v8 = vld [vmem:[#allocation22_spill] sm:$0xff] }
 0x4bc   :  { %10640 = vrcp.f32 %v3871_v29  ;;  %v9883_v17 = vadd.f32 %v3389_v28, %v14719_v16  ;;  %v3868_v26 = vadd.f32 1.0, %v10623_v22 }
 0x4bd   :  { %v10625_v55 = vpop.eup %10624  ;;  %10642 = vrcp.f32 %v3870_v49 }
 0x4be   :  { %v3873_v0 = vadd.f32 1.0, %v10625_v55  ;;  %10644 = vpow2.f32 %v7646_v19  ;;  %v9079_v11 = vpop.f32.mrb[40].mxu1  ;;  %v10627_v30 = vpop.eup %10626  ;;  %v14722_v19 = vld [vmem:[#allocation41_spill] sm:$0xff] }
 0x4bf   :  { %10646 = vtanh.f32 %v9882_v53  ;;  %v9884_v44 = vadd.f32 %v9079_v11, %v14720_v57  ;;  %v3399_v33 = vpop.f32.mrb[41].mxu1  ;;  %v10629_v12 = vpop.eup %10628  ;;  %v14723_v11 = vld [vmem:[#allocation40_spill] sm:$0xff] }
 0x4c0   :  { %10648 = vrcp.f32 %v3873_v0  ;;  %v3872_v31 = vadd.f32 1.0, %v10629_v12  ;;  %v9885_v29 = vadd.f32 %v3399_v33, %v14721_v8 }
 0x4c1   :  { %v10631_v34 = vpop.eup %10630  ;;  %10650 = vtanh.f32 %v9883_v17 }
 0x4c2   :  { %v10633_v25 = vpop.eup %10632  ;;  %v3875_v49 = vadd.f32 1.0, %v10631_v34  ;;  %10652 = vtanh.f32 %v9884_v44  ;;  %v9090_v28 = vpop.f32.mrb[74].mxu1 }
 0x4c3   :  { %v10635_v55 = vpop.eup %10634  ;;  %10654 = vrcp.f32 %v3872_v31  ;;  %v9966_v16 = vadd.f32 %v9090_v28, %v14722_v19  ;;  %v3474_v53 = vpop.f32.mrb[75].mxu1 }
 0x4c4   :  { %v10637_v45 = vpop.eup %10636  ;;  %10656 = vrcp.f32 %v3868_v26  ;;  %v9967_v57 = vadd.f32 %v3474_v53, %v14723_v11  ;;  %v14725_v26 = vld [vmem:[#allocation45_spill] sm:$0xff] }
 0x4c5   :  { %v10639_v22 = vpop.eup %10638  ;;  %v3874_v0 = vadd.f32 1.0, %v10637_v45  ;;  %10658 = vtanh.f32 %v9885_v29  ;;  %v7609_v12 = vmul.f32 -1.442695, %v9966_v16 }
 0x4c6   :  { %v10641_v17 = vpop.eup %10640  ;;  %10660 = vrcp.f32 %v3875_v49  ;;  %v3877_v33 = vadd.f32 1.0, %v10639_v22  ;;  %v7608_v8 = vmul.f32 -1.442695, %v9967_v57  ;;  %v9093_v34 = vpop.f32.mrb[76].mxu1 }
 0x4c7   :  { %v10643_v44 = vpop.eup %10642  ;;  %10662 = vrcp.f32 %v3874_v0  ;;  %v9968_v31 = vadd.f32 %v9093_v34, %v14724_v4  ;;  %v3484_v37 = vpop.f32.mrb[77].mxu1  ;;  %v3907_v19 = vmul.f32 %v10641_v17, %v12787_v40  ;;  %v14726_v34 = vld [vmem:[#allocation37_spill] sm:$0xff] }
 0x4c8   :  { %v10645_v28 = vpop.eup %10644  ;;  %10664 = vrcp.f32 %v3877_v33  ;;  %v9969_v53 = vadd.f32 %v3484_v37, %v14725_v26  ;;  %v3906_v49 = vmul.f32 %v10643_v44, %v12792_v62 }
 0x4c9   :  { %v10647_v11 = vpop.eup %10646  ;;  %v3876_v45 = vadd.f32 1.0, %v10645_v28  ;;  %10666 = vpow2.f32 %v7609_v12  ;;  %v7611_v16 = vmul.f32 -1.442695, %v9968_v31  ;;  %v14728_v12 = vld [vmem:[#allocation42_spill] sm:$0xff] }
 0x4ca   :  { %v10649_v29 = vpop.eup %10648  ;;  %v3911_v57 = vmul.f32 %v10647_v11, %v10627_v30  ;;  %10668 = vpow2.f32 %v7608_v8  ;;  %v7610_v22 = vmul.f32 -1.442695, %v9969_v53  ;;  %v9096_v0 = vpop.f32.mrb[78].mxu1  ;;  %v14729_v11 = vld [vmem:[#allocation23_spill] sm:$0xff] }
 0x4cb   :  { %v10651_v61 = vpop.eup %10650  ;;  %v3909_v4 = vmul.f32 %v10649_v29, %v14726_v34  ;;  %10670 = vrcp.f32 %v3876_v45  ;;  %v9970_v40 = vadd.f32 %v9096_v0, %v14727_v47  ;;  %v3494_v17 = vpop.f32.mrb[79].mxu1 }
 0x4cc   :  { %v10653_v33 = vpop.eup %10652  ;;  %v13122_v37 = vadd.f32 %v3911_v57, %v3907_v19  ;;  %v3910_v28 = vmul.f32 %v10651_v61, %v10633_v25  ;;  %10672 = vpow2.f32 %v7611_v16  ;;  %v9971_v31 = vadd.f32 %v3494_v17, %v14728_v12  ;;  %v14731_v25 = vld [vmem:[#allocation46_spill] sm:$0xff] }
 0x4cd   :  { %v10655_v26 = vpop.eup %10654  ;;  %v3913_v62 = vmul.f32 %v10653_v33, %v10635_v55  ;;  %10674 = vpow2.f32 %v7610_v22  ;;  %v7613_v8 = vmul.f32 -1.442695, %v9970_v40  ;;  %v14732_v22 = vld [vmem:[#allocation47_spill] sm:$0xff] }
 0x4ce   :  { %v10657_v30 = vpop.eup %10656  ;;  %v3908_v44 = vmul.f32 %v10655_v26, %v14729_v11  ;;  %10676 = vtanh.f32 %v13122_v37  ;;  %v13127_v53 = vadd.f32 %v3910_v28, %v3906_v49  ;;  %v7612_v45 = vmul.f32 -1.442695, %v9971_v31  ;;  %v9099_v29 = vpop.f32.mrb[80].mxu1  ;;  %v14734_v31 = vld [vmem:[#allocation48_spill] sm:$0xff] }
 0x4cf   :  { %v10659_v0 = vpop.eup %10658  ;;  %v13129_v19 = vadd.f32 %v3913_v62, %v3909_v4  ;;  %10678 = vpow2.f32 %v7613_v8  ;;  %v9972_v61 = vadd.f32 %v9099_v29, %v14731_v25  ;;  %v3504_v16 = vpop.f32.mrb[81].mxu1  ;;  %v14735_v29 = vld [vmem:[#allocation49_spill] sm:$0xff] }
 0x4d0   :  { %v10661_v57 = vpop.eup %10660  ;;  %10680 = vtanh.f32 %v13127_v53  ;;  %v3912_v55 = vmul.f32 %v10659_v0, %v10657_v30  ;;  %v9973_v34 = vadd.f32 %v3504_v16, %v14732_v22 }
 0x4d1   :  { %14730 = vst [vmem:[#allocation29_spill] sm:$0xff] %v13129_v19  ;;  %v10663_v26 = vpop.eup %10662  ;;  %10682 = vtanh.f32 %v13129_v19  ;;  %v7615_v49 = vmul.f32 -1.442695, %v9972_v61 }
 0x4d2   :  { %v10665_v40 = vpop.eup %10664  ;;  %v13135_v17 = vadd.f32 %v3912_v55, %v3908_v44  ;;  %10684 = vpow2.f32 %v7612_v45  ;;  %v7614_v4 = vmul.f32 -1.442695, %v9973_v34  ;;  %v9102_v33 = vpop.f32.mrb[82].mxu1 }
 0x4d3   :  { %v10667_v28 = vpop.eup %10666  ;;  %10686 = vpow2.f32 %v7615_v49  ;;  %v9974_v62 = vadd.f32 %v9102_v33, %v14734_v31  ;;  %v3514_v8 = vpop.f32.mrb[83].mxu1  ;;  %v14736_v49 = vld [vmem:[#allocation52_spill] sm:$0xff] }
 0x4d4   :  { %14733 = vst [vmem:[#allocation30_spill] sm:$0xff] %v13135_v17  ;;  %v10669_v11 = vpop.eup %10668  ;;  %10688 = vtanh.f32 %v13135_v17  ;;  %v3590_v30 = vadd.f32 1.0, %v10667_v28  ;;  %v9975_v0 = vadd.f32 %v3514_v8, %v14735_v29 }
 0x4d5   :  { %v10671_v16 = vpop.eup %10670  ;;  %v3589_v22 = vadd.f32 1.0, %v10669_v11  ;;  %10690 = vpow2.f32 %v7614_v4  ;;  %v7617_v61 = vmul.f32 -1.442695, %v9974_v62 }
 0x4d6   :  { %v10673_v44 = vpop.eup %10672  ;;  %v9105_v55 = vpop.f32.mrb[84].mxu1  ;;  %10692 = vrcp.f32 %v3590_v30  ;;  %v7616_v25 = vmul.f32 -1.442695, %v9975_v0 }
 0x4d7   :  { %v10675_v45 = vpop.eup %10674  ;;  %v3592_v34 = vadd.f32 1.0, %v10673_v44  ;;  %v9976_v12 = vadd.f32 %v9105_v55, %v14736_v49  ;;  %v3524_v33 = vpop.f32.mrb[85].mxu1  ;;  %10694 = vrcp.f32 %v3589_v22 }
 0x4d8   :  { %v10677_v31 = vpop.eup %10676  ;;  %v9977_v17 = vadd.f32 %v3524_v33, %v12514_v23  ;;  %10696 = vpow2.f32 %v7617_v61 }
 0x4d9   :  { %v10679_v28 = vpop.eup %10678  ;;  %v7619_v8 = vmul.f32 -1.442695, %v9976_v12  ;;  %v3923_v29 = vmul.f32 %v10677_v31, %v10661_v57  ;;  %10698 = vrcp.f32 %v3592_v34 }
 0x4da   :  { %v10681_v11 = vpop.eup %10680  ;;  %v3594_v4 = vadd.f32 1.0, %v10679_v28  ;;  %v7618_v62 = vmul.f32 -1.442695, %v9977_v17  ;;  %v9108_v47 = vpop.f32.mrb[86].mxu1  ;;  %10700 = vpow2.f32 %v7616_v25 }
 0x4db   :  { %v10683_v19 = vpop.eup %10682  ;;  %v3534_v30 = vpop.f32.mrb[87].mxu1  ;;  %v3922_v0 = vmul.f32 %v10681_v11, %v10663_v26  ;;  %v9978_v55 = vadd.f32 %v9108_v47, %v14710_v51 }
 0x4dc   :  { %v10685_v44 = vpop.eup %10684  ;;  %10702 = vrcp.f32 %v3594_v4  ;;  %v3925_v12 = vmul.f32 %v10683_v19, %v10665_v40  ;;  %v9979_v25 = vadd.f32 %v3534_v30, %v12486_v6  ;;  %v3591_v4 = vadd.f32 1.0, %v10675_v45  ;;  %v14737_v40 = vld [vmem:[#allocation54_spill] sm:$0xff] }
 0x4dd   :  { %v10687_v22 = vpop.eup %10686  ;;  %v3593_v49 = vadd.f32 1.0, %v10685_v44  ;;  %10704 = vpow2.f32 %v7619_v8  ;;  %v13143_v33 = vpack.c.bf16 %v3923_v29, %v3922_v0 }
 0x4de   :  { %v10689_v57 = vpop.eup %10688  ;;  %v3596_v31 = vadd.f32 1.0, %v10687_v22  ;;  %10706 = vpow2.f32 %v7618_v62  ;;  %v9111_v61 = vpop.f32.mrb[88].mxu1 }
 0x4df   :  { %v10691_v17 = vpop.eup %10690  ;;  %10708 = vrcp.f32 %v3593_v49  ;;  %v3544_v34 = vpop.f32.mrb[89].mxu1  ;;  %v3924_v26 = vmul.f32 %v10689_v57, %v10671_v16  ;;  %v9980_v47 = vadd.f32 %v9111_v61, %v12529_v42 }
 0x4e0   :  { %10710 = vrcp.f32 %v3596_v31  ;;  %v3595_v28 = vadd.f32 1.0, %v10691_v17  ;;  %v10693_v11 = vpop.eup %10692  ;;  %v9981_v8 = vadd.f32 %v3544_v34, %v14737_v40 }
 0x4e1   :  { %10712 = vtanh.f32 %v9978_v55  ;;  %v13147_v29 = vpack.c.bf16 %v3925_v12, %v3924_v26  ;;  %v10695_v19 = vpop.eup %10694 }
 0x4e2   :  { %10714 = vrcp.f32 %v3595_v28  ;;  %v10697_v62 = vpop.eup %10696 }
 0x4e3   :  { %10716 = vtanh.f32 %v9979_v25  ;;  %v10699_v49 = vpop.eup %10698  ;;  %v3598_v55 = vadd.f32 1.0, %v10697_v62 }
 0x4e4   :  { %10718 = vtanh.f32 %v9980_v47  ;;  %v10701_v30 = vpop.eup %10700 }
 0x4e5   :  { %10720 = vrcp.f32 %v3591_v4  ;;  %v3597_v31 = vadd.f32 1.0, %v10701_v30 }
 0x4e6   :  { %v10703_v16 = vpop.eup %10702  ;;  %10722 = vtanh.f32 %v9981_v8 }
 0x4e7   :  { %v10705_v0 = vpop.eup %10704  ;;  %v3630_v45 = vmul.f32 %v10703_v16, %v12818_v59  ;;  %10724 = vrcp.f32 %v3598_v55 }
 0x4e8   :  { %v10707_v44 = vpop.eup %10706  ;;  %v3600_v28 = vadd.f32 1.0, %v10705_v0  ;;  %10726 = vrcp.f32 %v3597_v31 }
 0x4e9   :  { %v10709_v22 = vpop.eup %10708  ;;  %v3599_v30 = vadd.f32 1.0, %v10707_v44 }
 0x4ea   :  { %v10711_v57 = vpop.eup %10710  ;;  %v3629_v17 = vmul.f32 %v10709_v22, %v12822_v50 }
 0x4eb   :  { %v10713_v12 = vpop.eup %10712  ;;  %v3632_v26 = vmul.f32 %v10711_v57, %v12824_v14 }
 0x4ec   :  { %v10715_v61 = vpop.eup %10714  ;;  %v3634_v34 = vmul.f32 %v10713_v12, %v10693_v11 }
 0x4ed   :  { %v10717_v25 = vpop.eup %10716  ;;  %v3631_v42 = vmul.f32 %v10715_v61, %v12828_v9 }
 0x4ee   :  { %v10719_v47 = vpop.eup %10718  ;;  %v13153_v4 = vadd.f32 %v3634_v34, %v3630_v45  ;;  %v3633_v8 = vmul.f32 %v10717_v25, %v10695_v19  ;;  %v13186_v34 = vld [vmem:[%s14494_s5 + $0x10] sm:$0xff]  ;;  %v13194_v25 = vld [vmem:[%s14494_s5 + $0x18] sm:$0xff] }
 0x4ef   :  { %v10721_v40 = vpop.eup %10720  ;;  %v3636_v59 = vmul.f32 %v10719_v47, %v10699_v49  ;;  %v13217_v47 = vld [vmem:[%s14494_s5 + $0x30] sm:$0xff] }
 0x4f0   :  { %v10723_v62 = vpop.eup %10722  ;;  %10728 = vtanh.f32 %v13153_v4  ;;  %v13157_v50 = vadd.f32 %v3633_v8, %v3629_v17  ;;  %v13178_v17 = vld [vmem:[%s14494_s5 + $0x8] sm:$0xff]  ;;  %v13224_v8 = vld [vmem:[%s14494_s5 + $0x38] sm:$0xff] }
 0x4f1   :  { %10730 = vrcp.f32 %v3600_v28  ;;  %v13159_v11 = vadd.f32 %v3636_v59, %v3632_v26  ;;  %v3635_v14 = vmul.f32 %v10723_v62, %v10721_v40  ;;  %v10725_v9 = vpop.eup %10724  ;;  %v13202_v26 = vld [vmem:[%s14494_s5 + $0x20] sm:$0xff]  ;;  %v13210_v28 = vld [vmem:[%s14494_s5 + $0x28] sm:$0xff] }
 0x4f2   :  { %10732 = vtanh.f32 %v13157_v50  ;;  %v10727_v49 = vpop.eup %10726  ;;  %v13231_v59 = vld [vmem:[%s14494_s5 + $0x40] sm:$0xff]  ;;  %v13238_v62 = vld [vmem:[%s14494_s5 + $0x48] sm:$0xff] }
 0x4f3   :  { %10734 = vtanh.f32 %v13159_v11  ;;  %v13163_v19 = vadd.f32 %v3635_v14, %v3631_v42  ;;  %v13252_v14 = vld [vmem:[%s14494_s5 + $0x58] sm:$0xff] }
 0x4f4   :  { %10736 = vrcp.f32 %v3599_v30  ;;  %v13245_v30 = vld [vmem:[%s14494_s5 + $0x50] sm:$0xff] }
 0x4f5   :  { %10738 = vtanh.f32 %v13163_v19 }
 0x4fa   :  { %v10729_v16 = vpop.eup %10728 }
 0x4fb   :  { %v10731_v0 = vpop.eup %10730  ;;  %v3646_v44 = vmul.f32 %v10729_v16, %v10725_v9  ;;  %v13259_v9 = vld [vmem:[%s14494_s5 + $0x60] sm:$0xff]  ;;  %v13273_v16 = vld [vmem:[%s14494_s5 + $0x70] sm:$0xff] }
 0x4fc   :  { %v10733_v22 = vpop.eup %10732 }
 0x4fd   :  { %v10735_v57 = vpop.eup %10734  ;;  %v3645_v45 = vmul.f32 %v10733_v22, %v10727_v49  ;;  %v13266_v49 = vld [vmem:[%s14494_s5 + $0x68] sm:$0xff] }
 0x4fe   :  { %v10737_v55 = vpop.eup %10736  ;;  %v3648_v12 = vmul.f32 %v10735_v57, %v10731_v0  ;;  %v13280_v0 = vld [vmem:[%s14494_s5 + $0x78] sm:$0xff] }
 0x4ff   :  { %v10739_v40 = vpop.eup %10738  ;;  %v13166_v31 = vpack.c.bf16 %v3646_v44, %v3645_v45  ;;  %v13287_v44 = vld [vmem:[%s14491_s2] sm:$0xff] }
 0x500   :  { %v3647_v61 = vmul.f32 %v10739_v40, %v10737_v55  ;;  %v14750_v45 = vld [vmem:[#allocation13_spill] sm:$0xff] }
 0x501   :  { %14738 = vst [vmem:[#allocation31_spill] sm:$0xff] %v13166_v31  ;;  %9689 = vmatprep.subr.bf16.mxu0 %v13166_v31 }
 0x502   :  { %9691 = vmatpush3.bf16.msra.mxu0 %v13166_v31  ;;  %v13170_v42 = vpack.c.bf16 %v3648_v12, %v3647_v61 }
 0x504   :  { %14739 = vst [vmem:[#allocation32_spill] sm:$0xff] %v13170_v42  ;;  %9693 = vmatprep.subr.bf16.mxu0 %v13170_v42 }
 0x506   :  { %9695 = vmatpush3.bf16.msra.mxu0 %v13170_v42 }
 0x507   :  { %9697 = vmatprep.subr.bf16.mxu0 %v13143_v33 }
 0x509   :  { %9121 = vmatmul.mubr.msk.f32.vlgmr.msra.gmra.mrb[86].mxu0 %vm1792_vm1, %v13178_v17 }
 0x50a   :  { %9699 = vmatpush3.bf16.msra.mxu0 %v13143_v33  ;;  %9123 = vmatprep.mubr.msk.f32.mxu0 %vm1792_vm1, %v13186_v34 }
 0x50b   :  { %9701 = vmatprep.subr.bf16.mxu0 %v13147_v29 }
 0x50d   :  { %9124 = vmatmul.mubr.msk.f32.gmra.mrb[88].mxu0 %vm1792_vm1, %v13194_v25 }
 0x50e   :  { %9703 = vmatpush3.bf16.msra.mxu0 %v13147_v29  ;;  %9126 = vmatprep.mubr.msk.f32.mxu0 %vm1792_vm1, %v13202_v26 }
 0x50f   :  { %9705 = vmatprep.subr.bf16.mxu0 %v13143_v33 }
 0x511   :  { %9127 = vmatmul.mubr.msk.f32.gmra.mrb[90].mxu0 %vm1792_vm1, %v13210_v28 }
 0x512   :  { %9129 = vmatprep.mubr.msk.f32.mxu0 %vm1792_vm1, %v13217_v47 }
 0x515   :  { %9130 = vmatmul.mubr.msk.f32.gmra.mrb[92].mxu0 %vm1792_vm1, %v13224_v8 }
 0x516   :  { %9132 = vmatprep.mubr.msk.f32.mxu0 %vm1792_vm1, %v13231_v59 }
 0x519   :  { %9133 = vmatmul.mubr.msk.f32.gmra.mrb[94].mxu0 %vm1792_vm1, %v13238_v62 }
 0x51a   :  { %9135 = vmatprep.mubr.msk.f32.mxu0 %vm1792_vm1, %v13245_v30 }
 0x51d   :  { %9136 = vmatmul.mubr.msk.f32.gmra.mrb[96].mxu0 %vm1792_vm1, %v13252_v14 }
 0x51e   :  { %9138 = vmatprep.mubr.msk.f32.mxu0 %vm1792_vm1, %v13259_v9 }
 0x521   :  { %9139 = vmatmul.mubr.msk.f32.gmra.mrb[98].mxu0 %vm1792_vm1, %v13266_v49 }
 0x522   :  { %9141 = vmatprep.mubr.msk.f32.mxu0 %vm1792_vm1, %v13273_v16 }
 0x525   :  { %9142 = vmatmul.mubr.msk.f32.gmra.mrb[100].mxu0 %vm1792_vm1, %v13280_v0 }
 0x526   :  { %9152 = vmatprep.mubr.msk.f32.mxu0 %vm1792_vm1, %v13287_v44 }
 0x529   :  { %9153 = vmatmul.mubr.msk.f32.vlgmr.msra.gmra.mrb[22].mxu0 %vm1792_vm1, %v12879_v3  ;;  %v13327_v3 = vld [vmem:[%s14493_s4] sm:$0xff] }
 0x52a   :  { %9707 = vmatpush3.bf16.msra.mxu0 %v13143_v33  ;;  %9155 = vmatprep.mubr.msk.f32.mxu0 %vm1792_vm1, %v12887_v54  ;;  %v14740_v54 = vld [vmem:[#allocation26_spill] sm:$0xff] }
 0x52b   :  { %9709 = vmatprep.subr.bf16.mxu0 %v13147_v29 }
 0x52d   :  { %9156 = vmatmul.mubr.msk.f32.gmra.mrb[24].mxu0 %vm1792_vm1, %v12895_v48  ;;  %v14741_v48 = vld [vmem:[#allocation27_spill] sm:$0xff] }
 0x52e   :  { %9711 = vmatpush3.bf16.msra.mxu0 %v13147_v29  ;;  %9158 = vmatprep.mubr.msk.f32.mxu0 %vm1792_vm1, %v12903_v52  ;;  %v14742_v52 = vld [vmem:[#allocation28_spill] sm:$0xff]  ;;  %v14749_v29 = vld [vmem:[#allocation14_spill] sm:$0xff] }
 0x531   :  { %9159 = vmatmul.mubr.msk.f32.gmra.mrb[26].mxu0 %vm1792_vm1, %v12910_v24 }
 0x532   :  { %9161 = vmatprep.mubr.msk.f32.mxu0 %vm1792_vm1, %v12917_v21  ;;  %v14743_v21 = vld [vmem:[#allocation9_spill] sm:$0xff] }
 0x535   :  { %9162 = vmatmul.mubr.msk.f32.gmra.mrb[28].mxu0 %vm1792_vm1, %v12924_v13 }
 0x536   :  { %9164 = vmatprep.mubr.msk.f32.mxu0 %vm1792_vm1, %v12931_v46 }
 0x539   :  { %9165 = vmatmul.mubr.msk.f32.gmra.mrb[30].mxu0 %vm1792_vm1, %v12938_v20  ;;  %v14744_v20 = vld [vmem:[#allocation7_spill] sm:$0xff] }
 0x53a   :  { %9167 = vmatprep.mubr.msk.f32.mxu0 %vm1792_vm1, %v12945_v15 }
 0x53d   :  { %9168 = vmatmul.mubr.msk.f32.gmra.mrb[32].mxu0 %vm1792_vm1, %v12952_v27 }
 0x53e   :  { %9170 = vmatprep.mubr.msk.f32.mxu0 %vm1792_vm1, %v12959_v36 }
 0x541   :  { %9171 = vmatmul.mubr.msk.f32.gmra.mrb[34].mxu0 %vm1792_vm1, %v12966_v1 }
 0x542   :  { %9173 = vmatprep.mubr.msk.f32.mxu0 %vm1792_vm1, %v12973_v10  ;;  %v14745_v10 = vld [vmem:[#allocation12_spill] sm:$0xff] }
 0x545   :  { %9174 = vmatmul.mubr.msk.f32.gmra.mrb[36].mxu0 %vm1792_vm1, %v12980_v39 }
 0x546   :  { %9184 = vmatprep.mubr.msk.f32.mxu0 %vm1792_vm1, %v13327_v3 }
 0x549   :  { %9185 = vmatmul.mubr.msk.f32.vlgmr.msra.gmra.mrb[86].mxu0 %vm1792_vm1, %v12989_v35 }
 0x54a   :  { %9187 = vmatprep.mubr.msk.f32.mxu0 %vm1792_vm1, %v12996_v32 }
 0x54d   :  { %9188 = vmatmul.mubr.msk.f32.gmra.mrb[88].mxu0 %vm1792_vm1, %v13003_v2  ;;  %v14746_v2 = vld [vmem:[#allocation11_spill] sm:$0xff] }
 0x54e   :  { %9190 = vmatprep.mubr.msk.f32.mxu0 %vm1792_vm1, %v13010_v56 }
 0x551   :  { %9191 = vmatmul.mubr.msk.f32.gmra.mrb[90].mxu0 %vm1792_vm1, %v13017_v5 }
 0x552   :  { %9193 = vmatprep.mubr.msk.f32.mxu0 %vm1792_vm1, %v13024_v60  ;;  %v14747_v60 = vld [vmem:[#allocation10_spill] sm:$0xff] }
 0x555   :  { %9194 = vmatmul.mubr.msk.f32.gmra.mrb[92].mxu0 %vm1792_vm1, %v13031_v41 }
 0x556   :  { %9196 = vmatprep.mubr.msk.f32.mxu0 %vm1792_vm1, %v13038_v18 }
 0x559   :  { %9197 = vmatmul.mubr.msk.f32.gmra.mrb[94].mxu0 %vm1792_vm1, %v13045_v43  ;;  %v14748_v43 = vld [vmem:[#allocation8_spill] sm:$0xff] }
 0x55a   :  { %9199 = vmatprep.mubr.msk.f32.mxu0 %vm1792_vm1, %v13052_v63 }
 0x55d   :  { %9200 = vmatmul.mubr.msk.f32.gmra.mrb[96].mxu0 %vm1792_vm1, %v13059_v38 }
 0x55e   :  { %9202 = vmatprep.mubr.msk.f32.mxu0 %vm1792_vm1, %v13066_v58 }
 0x561   :  { %9203 = vmatmul.mubr.msk.f32.gmra.mrb[98].mxu0 %vm1792_vm1, %v13073_v7 }
 0x562   :  { %9205 = vmatprep.mubr.msk.f32.mxu0 %vm1792_vm1, %v14740_v54 }
 0x565   :  { %9206 = vmatmul.mubr.msk.f32.gmra.mrb[100].mxu0 %vm1792_vm1, %v14741_v48 }
 0x566   :  { %9312 = vmatprep.mubr.msk.f32.mxu0 %vm1792_vm1, %v14742_v52 }
 0x5fc   :  { %v9154_v24 = vpop.f32.mrb[22].mxu0 }
 0x5fd   :  { %v9886_v13 = vadd.f32 %v9154_v24, %v14743_v21  ;;  %v3992_v46 = vpop.f32.mrb[23].mxu0  ;;  %v14751_v24 = vld [vmem:[#allocation16_spill] sm:$0xff] }
 0x5fe   :  { %v9887_v15 = vadd.f32 %v3992_v46, %v14744_v20 }
 0x5ff   :  { %v7709_v27 = vmul.f32 -1.442695, %v9886_v13 }
 0x600   :  { %v7708_v36 = vmul.f32 -1.442695, %v9887_v15  ;;  %v9157_v1 = vpop.f32.mrb[24].mxu0 }
 0x601   :  { %10740 = vpow2.f32 %v7709_v27  ;;  %v9888_v39 = vadd.f32 %v9157_v1, %v14745_v10  ;;  %v4002_v35 = vpop.f32.mrb[25].mxu0  ;;  %v14752_v27 = vld [vmem:[#allocation15_spill] sm:$0xff] }
 0x602   :  { %10742 = vpow2.f32 %v7708_v36  ;;  %v9889_v56 = vadd.f32 %v4002_v35, %v14746_v2 }
 0x603   :  { %v7711_v32 = vmul.f32 -1.442695, %v9888_v39 }
 0x604   :  { %v9160_v5 = vpop.f32.mrb[26].mxu0  ;;  %v7710_v58 = vmul.f32 -1.442695, %v9889_v56 }
 0x605   :  { %10744 = vpow2.f32 %v7711_v32  ;;  %v9890_v41 = vadd.f32 %v9160_v5, %v14747_v60  ;;  %v4012_v18 = vpop.f32.mrb[27].mxu0  ;;  %v14753_v5 = vld [vmem:[#allocation19_spill] sm:$0xff] }
 0x606   :  { %v9891_v63 = vadd.f32 %v4012_v18, %v14748_v43 }
 0x607   :  { %v7713_v38 = vmul.f32 -1.442695, %v9890_v41 }
 0x608   :  { %v7712_v7 = vmul.f32 -1.442695, %v9891_v63  ;;  %v9163_v33 = vpop.f32.mrb[28].mxu0  ;;  %v14754_v63 = vld [vmem:[#allocation20_spill] sm:$0xff] }
 0x609   :  { %10746 = vpow2.f32 %v7713_v38  ;;  %v9892_v22 = vadd.f32 %v9163_v33, %v14749_v29  ;;  %v4022_v57 = vpop.f32.mrb[29].mxu0 }
 0x60a   :  { %10748 = vpow2.f32 %v7712_v7  ;;  %v9893_v55 = vadd.f32 %v4022_v57, %v14750_v45 }
 0x60b   :  { %v10741_v12 = vpop.eup %10740  ;;  %v7715_v40 = vmul.f32 -1.442695, %v9892_v22  ;;  %10750 = vpow2.f32 %v7710_v58 }
 0x60c   :  { %v10743_v61 = vpop.eup %10742  ;;  %v4530_v54 = vadd.f32 1.0, %v10741_v12  ;;  %v7714_v48 = vmul.f32 -1.442695, %v9893_v55  ;;  %v9166_v52 = vpop.f32.mrb[30].mxu0 }
 0x60d   :  { %10752 = vpow2.f32 %v7715_v40  ;;  %v9894_v13 = vadd.f32 %v9166_v52, %v14751_v24  ;;  %v4032_v46 = vpop.f32.mrb[31].mxu0  ;;  %v4529_v15 = vadd.f32 1.0, %v10743_v61  ;;  %v14755_v40 = vld [vmem:[#allocation17_spill] sm:$0xff] }
 0x60e   :  { %v9895_v36 = vadd.f32 %v4032_v46, %v14752_v27  ;;  %10754 = vrcp.f32 %v4530_v54 }
 0x60f   :  { %v10745_v1 = vpop.eup %10744  ;;  %v7717_v39 = vmul.f32 -1.442695, %v9894_v13  ;;  %10756 = vpow2.f32 %v7714_v48  ;;  %v14756_v13 = vld [vmem:[#allocation18_spill] sm:$0xff] }
 0x610   :  { %v4532_v35 = vadd.f32 1.0, %v10745_v1  ;;  %v7716_v32 = vmul.f32 -1.442695, %v9895_v36  ;;  %v9169_v56 = vpop.f32.mrb[32].mxu0 }
 0x611   :  { %10758 = vpow2.f32 %v7717_v39  ;;  %v9896_v41 = vadd.f32 %v9169_v56, %v14753_v5  ;;  %v4042_v18 = vpop.f32.mrb[33].mxu0  ;;  %v14757_v39 = vld [vmem:[#allocation21_spill] sm:$0xff] }
 0x612   :  { %10760 = vrcp.f32 %v4529_v15  ;;  %v9897_v38 = vadd.f32 %v4042_v18, %v14754_v63 }
 0x613   :  { %v10747_v58 = vpop.eup %10746  ;;  %10762 = vrcp.f32 %v4532_v35  ;;  %v7719_v7 = vmul.f32 -1.442695, %v9896_v41 }
 0x614   :  { %v10749_v33 = vpop.eup %10748  ;;  %v4534_v22 = vadd.f32 1.0, %v10747_v58  ;;  %10764 = vpow2.f32 %v7716_v32  ;;  %v7718_v57 = vmul.f32 -1.442695, %v9897_v38  ;;  %v9172_v55 = vpop.f32.mrb[34].mxu0  ;;  %v14758_v58 = vld [vmem:[#allocation22_spill] sm:$0xff] }
 0x615   :  { %v4533_v12 = vadd.f32 1.0, %v10749_v33  ;;  %10766 = vpow2.f32 %v7719_v7  ;;  %v9898_v61 = vadd.f32 %v9172_v55, %v14755_v40  ;;  %v4052_v54 = vpop.f32.mrb[35].mxu0  ;;  %v10751_v48 = vpop.eup %10750  ;;  %v14764_v40 = vld [vmem:[#allocation43_spill] sm:$0xff] }
 0x616   :  { %10768 = vrcp.f32 %v4534_v22  ;;  %v9899_v46 = vadd.f32 %v4052_v54, %v14756_v13  ;;  %v4531_v41 = vadd.f32 1.0, %v10751_v48 }
 0x617   :  { %v10753_v52 = vpop.eup %10752  ;;  %10770 = vrcp.f32 %v4533_v12 }
 0x618   :  { %v4536_v15 = vadd.f32 1.0, %v10753_v52  ;;  %10772 = vpow2.f32 %v7718_v57  ;;  %v9175_v36 = vpop.f32.mrb[36].mxu0  ;;  %v10755_v1 = vpop.eup %10754  ;;  %v14759_v57 = vld [vmem:[#allocation41_spill] sm:$0xff] }
 0x619   :  { %10774 = vtanh.f32 %v9898_v61  ;;  %v9900_v35 = vadd.f32 %v9175_v36, %v14757_v39  ;;  %v4062_v32 = vpop.f32.mrb[37].mxu0  ;;  %v10757_v56 = vpop.eup %10756  ;;  %v14760_v36 = vld [vmem:[#allocation40_spill] sm:$0xff] }
 0x61a   :  { %10776 = vrcp.f32 %v4536_v15  ;;  %v4535_v38 = vadd.f32 1.0, %v10757_v56  ;;  %v9901_v7 = vadd.f32 %v4062_v32, %v14758_v58  ;;  %v14761_v58 = vld [vmem:[#allocation44_spill] sm:$0xff] }
 0x61b   :  { %v10759_v18 = vpop.eup %10758  ;;  %10778 = vtanh.f32 %v9899_v46 }
 0x61c   :  { %v10761_v33 = vpop.eup %10760  ;;  %v4538_v22 = vadd.f32 1.0, %v10759_v18  ;;  %10780 = vtanh.f32 %v9900_v35  ;;  %v9186_v55 = vpop.f32.mrb[86].mxu0 }
 0x61d   :  { %v10763_v12 = vpop.eup %10762  ;;  %10782 = vrcp.f32 %v4535_v38  ;;  %v9982_v54 = vadd.f32 %v9186_v55, %v14759_v57  ;;  %v4137_v61 = vpop.f32.mrb[87].mxu0 }
 0x61e   :  { %v10765_v52 = vpop.eup %10764  ;;  %10784 = vrcp.f32 %v4531_v41  ;;  %v9983_v42 = vadd.f32 %v4137_v61, %v14760_v36  ;;  %v14762_v41 = vld [vmem:[#allocation45_spill] sm:$0xff] }
 0x61f   :  { %v10767_v48 = vpop.eup %10766  ;;  %v4537_v15 = vadd.f32 1.0, %v10765_v52  ;;  %10786 = vtanh.f32 %v9901_v7  ;;  %v7681_v56 = vmul.f32 -1.442695, %v9982_v54 }
 0x620   :  { %v10769_v46 = vpop.eup %10768  ;;  %10788 = vrcp.f32 %v4538_v22  ;;  %v4540_v32 = vadd.f32 1.0, %v10767_v48  ;;  %v7680_v31 = vmul.f32 -1.442695, %v9983_v42  ;;  %v9189_v18 = vpop.f32.mrb[88].mxu0 }
 0x621   :  { %v10771_v35 = vpop.eup %10770  ;;  %10790 = vrcp.f32 %v4537_v15  ;;  %v9984_v38 = vadd.f32 %v9189_v18, %v14761_v58  ;;  %v4147_v39 = vpop.f32.mrb[89].mxu0  ;;  %v4570_v57 = vmul.f32 %v10769_v46, %v13122_v37  ;;  %v14763_v18 = vld [vmem:[#allocation29_spill] sm:$0xff] }
 0x622   :  { %v10773_v55 = vpop.eup %10772  ;;  %10792 = vrcp.f32 %v4540_v32  ;;  %v9985_v61 = vadd.f32 %v4147_v39, %v14762_v41  ;;  %v4569_v22 = vmul.f32 %v10771_v35, %v13127_v53 }
 0x623   :  { %v10775_v36 = vpop.eup %10774  ;;  %v4539_v52 = vadd.f32 1.0, %v10773_v55  ;;  %10794 = vpow2.f32 %v7681_v56  ;;  %v7683_v7 = vmul.f32 -1.442695, %v9984_v38  ;;  %v14765_v56 = vld [vmem:[#allocation42_spill] sm:$0xff] }
 0x624   :  { %v10777_v54 = vpop.eup %10776  ;;  %v4574_v42 = vmul.f32 %v10775_v36, %v10755_v1  ;;  %10796 = vpow2.f32 %v7680_v31  ;;  %v7682_v48 = vmul.f32 -1.442695, %v9985_v61  ;;  %v9192_v15 = vpop.f32.mrb[90].mxu0  ;;  %v14766_v36 = vld [vmem:[#allocation30_spill] sm:$0xff] }
 0x625   :  { %v10779_v13 = vpop.eup %10778  ;;  %v4572_v58 = vmul.f32 %v10777_v54, %v14763_v18  ;;  %10798 = vrcp.f32 %v4539_v52  ;;  %v9986_v37 = vadd.f32 %v9192_v15, %v14764_v40  ;;  %v4157_v46 = vpop.f32.mrb[91].mxu0 }
 0x626   :  { %v10781_v32 = vpop.eup %10780  ;;  %v13387_v39 = vadd.f32 %v4574_v42, %v4570_v57  ;;  %v4573_v55 = vmul.f32 %v10779_v13, %v10761_v33  ;;  %10800 = vpow2.f32 %v7683_v7  ;;  %v9987_v38 = vadd.f32 %v4157_v46, %v14765_v56  ;;  %v14768_v13 = vld [vmem:[#allocation46_spill] sm:$0xff] }
 0x627   :  { %v10783_v41 = vpop.eup %10782  ;;  %v4576_v53 = vmul.f32 %v10781_v32, %v10763_v12  ;;  %10802 = vpow2.f32 %v7682_v48  ;;  %v7685_v31 = vmul.f32 -1.442695, %v9986_v37  ;;  %v14769_v48 = vld [vmem:[#allocation47_spill] sm:$0xff] }
 0x628   :  { %v10785_v1 = vpop.eup %10784  ;;  %v4571_v35 = vmul.f32 %v10783_v41, %v14766_v36  ;;  %10804 = vtanh.f32 %v13387_v39  ;;  %v13392_v61 = vadd.f32 %v4573_v55, %v4569_v22  ;;  %v7684_v52 = vmul.f32 -1.442695, %v9987_v38  ;;  %v9195_v54 = vpop.f32.mrb[92].mxu0  ;;  %v14771_v38 = vld [vmem:[#allocation48_spill] sm:$0xff] }
 0x629   :  { %v10787_v15 = vpop.eup %10786  ;;  %v13394_v57 = vadd.f32 %v4576_v53, %v4572_v58  ;;  %10806 = vpow2.f32 %v7685_v31  ;;  %v9988_v33 = vadd.f32 %v9195_v54, %v14768_v13  ;;  %v4167_v7 = vpop.f32.mrb[93].mxu0  ;;  %v14772_v54 = vld [vmem:[#allocation49_spill] sm:$0xff] }
 0x62a   :  { %v10789_v42 = vpop.eup %10788  ;;  %10808 = vtanh.f32 %v13392_v61  ;;  %v4575_v12 = vmul.f32 %v10787_v15, %v10785_v1  ;;  %v9989_v18 = vadd.f32 %v4167_v7, %v14769_v48 }
 0x62b   :  { %14767 = vst [vmem:[#allocation33_spill] sm:$0xff] %v13394_v57  ;;  %v10791_v41 = vpop.eup %10790  ;;  %10810 = vtanh.f32 %v13394_v57  ;;  %v7687_v22 = vmul.f32 -1.442695, %v9988_v33 }
 0x62c   :  { %v10793_v37 = vpop.eup %10792  ;;  %v13400_v46 = vadd.f32 %v4575_v12, %v4571_v35  ;;  %10812 = vpow2.f32 %v7684_v52  ;;  %v7686_v58 = vmul.f32 -1.442695, %v9989_v18  ;;  %v9198_v32 = vpop.f32.mrb[94].mxu0 }
 0x62d   :  { %v10795_v55 = vpop.eup %10794  ;;  %10814 = vpow2.f32 %v7687_v22  ;;  %v9990_v53 = vadd.f32 %v9198_v32, %v14771_v38  ;;  %v4177_v31 = vpop.f32.mrb[95].mxu0  ;;  %v14773_v22 = vld [vmem:[#allocation52_spill] sm:$0xff] }
 0x62e   :  { %14770 = vst [vmem:[#allocation34_spill] sm:$0xff] %v13400_v46  ;;  %v10797_v36 = vpop.eup %10796  ;;  %10816 = vtanh.f32 %v13400_v46  ;;  %v4253_v1 = vadd.f32 1.0, %v10795_v55  ;;  %v9991_v15 = vadd.f32 %v4177_v31, %v14772_v54 }
 0x62f   :  { %v10799_v7 = vpop.eup %10798  ;;  %v4252_v48 = vadd.f32 1.0, %v10797_v36  ;;  %10818 = vpow2.f32 %v7686_v58  ;;  %v7689_v33 = vmul.f32 -1.442695, %v9990_v53 }
 0x630   :  { %v10801_v35 = vpop.eup %10800  ;;  %v9201_v12 = vpop.f32.mrb[96].mxu0  ;;  %10820 = vrcp.f32 %v4253_v1  ;;  %v7688_v13 = vmul.f32 -1.442695, %v9991_v15 }
 0x631   :  { %v10803_v52 = vpop.eup %10802  ;;  %v4255_v18 = vadd.f32 1.0, %v10801_v35  ;;  %v9992_v56 = vadd.f32 %v9201_v12, %v14773_v22  ;;  %v4187_v32 = vpop.f32.mrb[97].mxu0  ;;  %10822 = vrcp.f32 %v4252_v48 }
 0x632   :  { %v10805_v38 = vpop.eup %10804  ;;  %v9993_v46 = vadd.f32 %v4187_v32, %v12514_v23  ;;  %10824 = vpow2.f32 %v7689_v33 }
 0x633   :  { %v10807_v55 = vpop.eup %10806  ;;  %v7691_v31 = vmul.f32 -1.442695, %v9992_v56  ;;  %v4586_v54 = vmul.f32 %v10805_v38, %v10789_v42  ;;  %10826 = vrcp.f32 %v4255_v18 }
 0x634   :  { %v10809_v36 = vpop.eup %10808  ;;  %v4257_v58 = vadd.f32 1.0, %v10807_v55  ;;  %v7690_v53 = vmul.f32 -1.442695, %v9993_v46  ;;  %v9204_v40 = vpop.f32.mrb[98].mxu0  ;;  %10828 = vpow2.f32 %v7688_v13 }
 0x635   :  { %v10811_v57 = vpop.eup %10810  ;;  %v4197_v1 = vpop.f32.mrb[99].mxu0  ;;  %v4585_v15 = vmul.f32 %v10809_v36, %v10791_v41  ;;  %v9994_v12 = vadd.f32 %v9204_v40, %v14710_v51  ;;  %v14774_v36 = vld [vmem:[#allocation53_spill] sm:$0xff] }
 0x636   :  { %v10813_v35 = vpop.eup %10812  ;;  %10830 = vrcp.f32 %v4257_v58  ;;  %v4588_v56 = vmul.f32 %v10811_v57, %v10793_v37  ;;  %v9995_v13 = vadd.f32 %v4197_v1, %v12486_v6  ;;  %v14775_v37 = vld [vmem:[#allocation54_spill] sm:$0xff] }
 0x637   :  { %v10815_v48 = vpop.eup %10814  ;;  %v4256_v22 = vadd.f32 1.0, %v10813_v35  ;;  %10832 = vpow2.f32 %v7691_v31  ;;  %v13408_v32 = vpack.c.bf16 %v4586_v54, %v4585_v15  ;;  %v4254_v35 = vadd.f32 1.0, %v10803_v52 }
 0x638   :  { %v10817_v42 = vpop.eup %10816  ;;  %v4259_v38 = vadd.f32 1.0, %v10815_v48  ;;  %10834 = vpow2.f32 %v7690_v53  ;;  %v9207_v33 = vpop.f32.mrb[100].mxu0 }
 0x639   :  { %v10819_v46 = vpop.eup %10818  ;;  %10836 = vrcp.f32 %v4256_v22  ;;  %v4207_v18 = vpop.f32.mrb[101].mxu0  ;;  %v4587_v41 = vmul.f32 %v10817_v42, %v10799_v7  ;;  %v9996_v40 = vadd.f32 %v9207_v33, %v14774_v36 }
 0x63a   :  { %10838 = vrcp.f32 %v4259_v38  ;;  %v4258_v55 = vadd.f32 1.0, %v10819_v46  ;;  %v10821_v58 = vpop.eup %10820  ;;  %v9997_v31 = vadd.f32 %v4207_v18, %v14775_v37 }
 0x63b   :  { %10840 = vtanh.f32 %v9994_v12  ;;  %v13412_v54 = vpack.c.bf16 %v4588_v56, %v4587_v41  ;;  %v10823_v57 = vpop.eup %10822 }
 0x63c   :  { %10842 = vrcp.f32 %v4258_v55  ;;  %v10825_v53 = vpop.eup %10824 }
 0x63d   :  { %10844 = vtanh.f32 %v9995_v13  ;;  %v10827_v22 = vpop.eup %10826  ;;  %v4261_v12 = vadd.f32 1.0, %v10825_v53 }
 0x63e   :  { %10846 = vtanh.f32 %v9996_v40  ;;  %v10829_v1 = vpop.eup %10828 }
 0x63f   :  { %10848 = vrcp.f32 %v4254_v35  ;;  %v4260_v33 = vadd.f32 1.0, %v10829_v1 }
 0x640   :  { %v10831_v7 = vpop.eup %10830  ;;  %10850 = vtanh.f32 %v9997_v31 }
 0x641   :  { %v10833_v15 = vpop.eup %10832  ;;  %v4293_v52 = vmul.f32 %v10831_v7, %v13153_v4  ;;  %10852 = vrcp.f32 %v4261_v12 }
 0x642   :  { %v10835_v48 = vpop.eup %10834  ;;  %v4263_v40 = vadd.f32 1.0, %v10833_v15  ;;  %10854 = vrcp.f32 %v4260_v33 }
 0x643   :  { %v10837_v42 = vpop.eup %10836  ;;  %v4262_v1 = vadd.f32 1.0, %v10835_v48 }
 0x644   :  { %v10839_v38 = vpop.eup %10838  ;;  %v4292_v18 = vmul.f32 %v10837_v42, %v13157_v50 }
 0x645   :  { %v10841_v56 = vpop.eup %10840  ;;  %v4295_v55 = vmul.f32 %v10839_v38, %v13159_v11 }
 0x646   :  { %v10843_v46 = vpop.eup %10842  ;;  %v4297_v41 = vmul.f32 %v10841_v56, %v10821_v58 }
 0x647   :  { %v10845_v13 = vpop.eup %10844  ;;  %v4294_v6 = vmul.f32 %v10843_v46, %v13163_v19  ;;  %v13617_v46 = vld [vmem:[%s14493_s4 + $0x28] sm:$0xff] }
 0x648   :  { %v10847_v35 = vpop.eup %10846  ;;  %v13418_v31 = vadd.f32 %v4297_v41, %v4293_v52  ;;  %v4296_v37 = vmul.f32 %v10845_v13, %v10823_v57  ;;  %v13631_v41 = vld [vmem:[%s14493_s4 + $0x38] sm:$0xff]  ;;  %v13638_v13 = vld [vmem:[%s14493_s4 + $0x40] sm:$0xff] }
 0x649   :  { %v10849_v36 = vpop.eup %10848  ;;  %v4299_v4 = vmul.f32 %v10847_v35, %v10827_v22  ;;  %v13659_v35 = vld [vmem:[%s14493_s4 + $0x58] sm:$0xff] }
 0x64a   :  { %v10851_v53 = vpop.eup %10850  ;;  %10856 = vtanh.f32 %v13418_v31  ;;  %v13422_v50 = vadd.f32 %v4296_v37, %v4292_v18  ;;  %v13624_v18 = vld [vmem:[%s14493_s4 + $0x30] sm:$0xff] }
 0x64b   :  { %10858 = vrcp.f32 %v4263_v40  ;;  %v13424_v58 = vadd.f32 %v4299_v4, %v4295_v55  ;;  %v4298_v11 = vmul.f32 %v10851_v53, %v10849_v36  ;;  %v10853_v19 = vpop.eup %10852  ;;  %v13645_v55 = vld [vmem:[%s14493_s4 + $0x48] sm:$0xff]  ;;  %v13652_v40 = vld [vmem:[%s14493_s4 + $0x50] sm:$0xff]  ;;  %v13666_v4 = vld [vmem:[%s14493_s4 + $0x60] sm:$0xff] }
 0x64c   :  { %10860 = vtanh.f32 %v13422_v50  ;;  %v10855_v22 = vpop.eup %10854  ;;  %v13673_v53 = vld [vmem:[%s14493_s4 + $0x68] sm:$0xff] }
 0x64d   :  { %10862 = vtanh.f32 %v13424_v58  ;;  %v13428_v57 = vadd.f32 %v4298_v11, %v4294_v6  ;;  %v13687_v11 = vld [vmem:[%s14493_s4 + $0x78] sm:$0xff] }
 0x64e   :  { %10864 = vrcp.f32 %v4262_v1  ;;  %v13680_v1 = vld [vmem:[%s14493_s4 + $0x70] sm:$0xff] }
 0x64f   :  { %10866 = vtanh.f32 %v13428_v57 }
 0x654   :  { %v10857_v7 = vpop.eup %10856 }
 0x655   :  { %v10859_v15 = vpop.eup %10858  ;;  %v4309_v48 = vmul.f32 %v10857_v7, %v10853_v19  ;;  %v13694_v19 = vld [vmem:[%s14494_s5] sm:$0xff] }
 0x656   :  { %v10861_v37 = vpop.eup %10860  ;;  %14778 = vst [vmem:[#allocation38_spill] sm:$0xff] %v13694_v19 }
 0x657   :  { %v10863_v42 = vpop.eup %10862  ;;  %v4308_v38 = vmul.f32 %v10861_v37, %v10855_v22 }
 0x658   :  { %v10865_v52 = vpop.eup %10864  ;;  %v4311_v12 = vmul.f32 %v10863_v42, %v10859_v15 }
 0x659   :  { %v10867_v36 = vpop.eup %10866  ;;  %v13431_v56 = vpack.c.bf16 %v4309_v48, %v4308_v38 }
 0x65a   :  { %v4310_v33 = vmul.f32 %v10867_v36, %v10865_v52 }
 0x65b   :  { %14776 = vst [vmem:[#allocation35_spill] sm:$0xff] %v13431_v56  ;;  %9713 = vmatprep.subr.bf16.mxu1 %v13431_v56 }
 0x65c   :  { %9715 = vmatpush3.bf16.msra.mxu1 %v13431_v56  ;;  %v13435_v6 = vpack.c.bf16 %v4311_v12, %v4310_v33 }
 0x65e   :  { %14777 = vst [vmem:[#allocation36_spill] sm:$0xff] %v13435_v6  ;;  %9717 = vmatprep.subr.bf16.mxu1 %v13435_v6 }
 0x660   :  { %9719 = vmatpush3.bf16.msra.mxu1 %v13435_v6 }
 0x661   :  { %9721 = vmatprep.subr.bf16.mxu1 %v13408_v32 }
 0x663   :  { %9217 = vmatmul.mubr.msk.f32.vlgmr.msra.gmra.mrb[90].mxu1 %vm1792_vm1, %v13178_v17  ;;  %v13479_v17 = vld [vmem:[%s14491_s2 + $0x8] sm:$0xff] }
 0x664   :  { %9723 = vmatpush3.bf16.msra.mxu1 %v13408_v32  ;;  %9219 = vmatprep.mubr.msk.f32.mxu1 %vm1792_vm1, %v13186_v34  ;;  %v13487_v34 = vld [vmem:[%s14491_s2 + $0x10] sm:$0xff] }
 0x665   :  { %9725 = vmatprep.subr.bf16.mxu1 %v13412_v54 }
 0x667   :  { %9220 = vmatmul.mubr.msk.f32.gmra.mrb[92].mxu1 %vm1792_vm1, %v13194_v25  ;;  %v13495_v25 = vld [vmem:[%s14491_s2 + $0x18] sm:$0xff] }
 0x668   :  { %9727 = vmatpush3.bf16.msra.mxu1 %v13412_v54  ;;  %9222 = vmatprep.mubr.msk.f32.mxu1 %vm1792_vm1, %v13202_v26  ;;  %v13503_v26 = vld [vmem:[%s14491_s2 + $0x20] sm:$0xff] }
 0x669   :  { %9729 = vmatprep.subr.bf16.mxu1 %v13408_v32 }
 0x66b   :  { %9223 = vmatmul.mubr.msk.f32.gmra.mrb[94].mxu1 %vm1792_vm1, %v13210_v28  ;;  %v13510_v28 = vld [vmem:[%s14491_s2 + $0x28] sm:$0xff] }
 0x66c   :  { %9225 = vmatprep.mubr.msk.f32.mxu1 %vm1792_vm1, %v13217_v47  ;;  %v13517_v47 = vld [vmem:[%s14491_s2 + $0x30] sm:$0xff] }
 0x66f   :  { %9226 = vmatmul.mubr.msk.f32.gmra.mrb[96].mxu1 %vm1792_vm1, %v13224_v8  ;;  %v13524_v8 = vld [vmem:[%s14491_s2 + $0x38] sm:$0xff] }
 0x670   :  { %9228 = vmatprep.mubr.msk.f32.mxu1 %vm1792_vm1, %v13231_v59  ;;  %v13531_v59 = vld [vmem:[%s14491_s2 + $0x40] sm:$0xff] }
 0x673   :  { %9229 = vmatmul.mubr.msk.f32.gmra.mrb[98].mxu1 %vm1792_vm1, %v13238_v62  ;;  %v13538_v62 = vld [vmem:[%s14491_s2 + $0x48] sm:$0xff] }
 0x674   :  { %9231 = vmatprep.mubr.msk.f32.mxu1 %vm1792_vm1, %v13245_v30  ;;  %v13545_v30 = vld [vmem:[%s14491_s2 + $0x50] sm:$0xff] }
 0x677   :  { %9232 = vmatmul.mubr.msk.f32.gmra.mrb[100].mxu1 %vm1792_vm1, %v13252_v14  ;;  %v13552_v14 = vld [vmem:[%s14491_s2 + $0x58] sm:$0xff] }
 0x678   :  { %9234 = vmatprep.mubr.msk.f32.mxu1 %vm1792_vm1, %v13259_v9  ;;  %v13559_v9 = vld [vmem:[%s14491_s2 + $0x60] sm:$0xff] }
 0x67b   :  { %9235 = vmatmul.mubr.msk.f32.gmra.mrb[102].mxu1 %vm1792_vm1, %v13266_v49  ;;  %v13566_v49 = vld [vmem:[%s14491_s2 + $0x68] sm:$0xff] }
 0x67c   :  { %9237 = vmatprep.mubr.msk.f32.mxu1 %vm1792_vm1, %v13273_v16  ;;  %v13573_v16 = vld [vmem:[%s14491_s2 + $0x70] sm:$0xff] }
 0x67f   :  { %9238 = vmatmul.mubr.msk.f32.gmra.mrb[104].mxu1 %vm1792_vm1, %v13280_v0  ;;  %v13580_v0 = vld [vmem:[%s14491_s2 + $0x78] sm:$0xff] }
 0x680   :  { %9248 = vmatprep.mubr.msk.f32.mxu1 %vm1792_vm1, %v13287_v44  ;;  %v13589_v44 = vld [vmem:[%s14493_s4 + $0x8] sm:$0xff] }
 0x683   :  { %9249 = vmatmul.mubr.msk.f32.vlgmr.msra.gmra.mrb[42].mxu1 %vm1792_vm1, %v13479_v17 }
 0x684   :  { %9731 = vmatpush3.bf16.msra.mxu1 %v13408_v32  ;;  %9251 = vmatprep.mubr.msk.f32.mxu1 %vm1792_vm1, %v13487_v34  ;;  %v13596_v32 = vld [vmem:[%s14493_s4 + $0x10] sm:$0xff] }
 0x685   :  { %9733 = vmatprep.subr.bf16.mxu1 %v13412_v54 }
 0x687   :  { %9252 = vmatmul.mubr.msk.f32.gmra.mrb[44].mxu1 %vm1792_vm1, %v13495_v25 }
 0x688   :  { %9735 = vmatpush3.bf16.msra.mxu1 %v13412_v54  ;;  %9254 = vmatprep.mubr.msk.f32.mxu1 %vm1792_vm1, %v13503_v26  ;;  %v13610_v54 = vld [vmem:[%s14493_s4 + $0x20] sm:$0xff] }
 0x68b   :  { %9255 = vmatmul.mubr.msk.f32.gmra.mrb[46].mxu1 %vm1792_vm1, %v13510_v28 }
 0x68c   :  { %9257 = vmatprep.mubr.msk.f32.mxu1 %vm1792_vm1, %v13517_v47 }
 0x68f   :  { %9258 = vmatmul.mubr.msk.f32.gmra.mrb[48].mxu1 %vm1792_vm1, %v13524_v8 }
 0x690   :  { %9260 = vmatprep.mubr.msk.f32.mxu1 %vm1792_vm1, %v13531_v59 }
 0x693   :  { %9261 = vmatmul.mubr.msk.f32.gmra.mrb[50].mxu1 %vm1792_vm1, %v13538_v62 }
 0x694   :  { %9263 = vmatprep.mubr.msk.f32.mxu1 %vm1792_vm1, %v13545_v30 }
 0x697   :  { %9264 = vmatmul.mubr.msk.f32.gmra.mrb[52].mxu1 %vm1792_vm1, %v13552_v14 }
 0x698   :  { %9266 = vmatprep.mubr.msk.f32.mxu1 %vm1792_vm1, %v13559_v9 }
 0x69b   :  { %9267 = vmatmul.mubr.msk.f32.gmra.mrb[54].mxu1 %vm1792_vm1, %v13566_v49 }
 0x69c   :  { %9269 = vmatprep.mubr.msk.f32.mxu1 %vm1792_vm1, %v13573_v16 }
 0x69f   :  { %9270 = vmatmul.mubr.msk.f32.gmra.mrb[56].mxu1 %vm1792_vm1, %v13580_v0 }
 0x6a0   :  { %9280 = vmatprep.mubr.msk.f32.mxu1 %vm1792_vm1, %v13327_v3  ;;  %v13603_v3 = vld [vmem:[%s14493_s4 + $0x18] sm:$0xff] }
 0x6a3   :  { %9281 = vmatmul.mubr.msk.f32.vlgmr.msra.gmra.mrb[90].mxu1 %vm1792_vm1, %v13589_v44 }
 0x6a4   :  { %9283 = vmatprep.mubr.msk.f32.mxu1 %vm1792_vm1, %v13596_v32 }
 0x6a7   :  { %9284 = vmatmul.mubr.msk.f32.gmra.mrb[92].mxu1 %vm1792_vm1, %v13603_v3 }
 0x6a8   :  { %9286 = vmatprep.mubr.msk.f32.mxu1 %vm1792_vm1, %v13610_v54 }
 0x6ab   :  { %9287 = vmatmul.mubr.msk.f32.gmra.mrb[94].mxu1 %vm1792_vm1, %v13617_v46 }
 0x6ac   :  { %9289 = vmatprep.mubr.msk.f32.mxu1 %vm1792_vm1, %v13624_v18 }
 0x6af   :  { %9290 = vmatmul.mubr.msk.f32.gmra.mrb[96].mxu1 %vm1792_vm1, %v13631_v41 }
 0x6b0   :  { %9292 = vmatprep.mubr.msk.f32.mxu1 %vm1792_vm1, %v13638_v13 }
 0x6b3   :  { %9293 = vmatmul.mubr.msk.f32.gmra.mrb[98].mxu1 %vm1792_vm1, %v13645_v55 }
 0x6b4   :  { %9295 = vmatprep.mubr.msk.f32.mxu1 %vm1792_vm1, %v13652_v40 }
 0x6b7   :  { %9296 = vmatmul.mubr.msk.f32.gmra.mrb[100].mxu1 %vm1792_vm1, %v13659_v35 }
 0x6b8   :  { %9298 = vmatprep.mubr.msk.f32.mxu1 %vm1792_vm1, %v13666_v4 }
 0x6bb   :  { %9299 = vmatmul.mubr.msk.f32.gmra.mrb[102].mxu1 %vm1792_vm1, %v13673_v53 }
 0x6bc   :  { %9301 = vmatprep.mubr.msk.f32.mxu1 %vm1792_vm1, %v13680_v1 }
 0x6bf   :  { %9302 = vmatmul.mubr.msk.f32.gmra.mrb[104].mxu1 %vm1792_vm1, %v13687_v11 }
 0x6c0   :  { %9408 = vmatprep.mubr.msk.f32.mxu1 %vm1792_vm1, %v13694_v19 }
 0x756   :  { %v9250_v22 = vpop.f32.mrb[42].mxu1 }
 0x757   :  { %v9902_v7 = vadd.f32 %v9250_v22, %v14743_v21  ;;  %v4655_v15 = vpop.f32.mrb[43].mxu1 }
 0x758   :  { %v9903_v48 = vadd.f32 %v4655_v15, %v14744_v20  ;;  %v14788_v20 = vld [vmem:[#allocation43_spill] sm:$0xff] }
 0x759   :  { %v7781_v37 = vmul.f32 -1.442695, %v9902_v7 }
 0x75a   :  { %v7780_v42 = vmul.f32 -1.442695, %v9903_v48  ;;  %v9253_v38 = vpop.f32.mrb[44].mxu1 }
 0x75b   :  { %10868 = vpow2.f32 %v7781_v37  ;;  %v9904_v52 = vadd.f32 %v9253_v38, %v14745_v10  ;;  %v4665_v12 = vpop.f32.mrb[45].mxu1 }
 0x75c   :  { %10870 = vpow2.f32 %v7780_v42  ;;  %v9905_v33 = vadd.f32 %v4665_v12, %v14746_v2 }
 0x75d   :  { %v7783_v36 = vmul.f32 -1.442695, %v9904_v52 }
 0x75e   :  { %v9256_v6 = vpop.f32.mrb[46].mxu1  ;;  %v7782_v15 = vmul.f32 -1.442695, %v9905_v33 }
 0x75f   :  { %10872 = vpow2.f32 %v7783_v36  ;;  %v9906_v56 = vadd.f32 %v9256_v6, %v14747_v60  ;;  %v4675_v19 = vpop.f32.mrb[47].mxu1 }
 0x760   :  { %v9907_v22 = vadd.f32 %v4675_v19, %v14748_v43 }
 0x761   :  { %v7785_v21 = vmul.f32 -1.442695, %v9906_v56 }
 0x762   :  { %v7784_v7 = vmul.f32 -1.442695, %v9907_v22  ;;  %v9259_v48 = vpop.f32.mrb[48].mxu1 }
 0x763   :  { %10874 = vpow2.f32 %v7785_v21  ;;  %v9908_v37 = vadd.f32 %v9259_v48, %v14749_v29  ;;  %v4685_v38 = vpop.f32.mrb[49].mxu1  ;;  %v14785_v29 = vld [vmem:[#allocation44_spill] sm:$0xff] }
 0x764   :  { %10876 = vpow2.f32 %v7784_v7  ;;  %v9909_v42 = vadd.f32 %v4685_v38, %v14750_v45 }
 0x765   :  { %v10869_v52 = vpop.eup %10868  ;;  %v7787_v12 = vmul.f32 -1.442695, %v9908_v37  ;;  %10878 = vpow2.f32 %v7782_v15 }
 0x766   :  { %v10871_v2 = vpop.eup %10870  ;;  %v5193_v36 = vadd.f32 1.0, %v10869_v52  ;;  %v7786_v6 = vmul.f32 -1.442695, %v9909_v42  ;;  %v9262_v60 = vpop.f32.mrb[50].mxu1 }
 0x767   :  { %10880 = vpow2.f32 %v7787_v12  ;;  %v9910_v56 = vadd.f32 %v9262_v60, %v14751_v24  ;;  %v4695_v19 = vpop.f32.mrb[51].mxu1  ;;  %v5192_v33 = vadd.f32 1.0, %v10871_v2 }
 0x768   :  { %v9911_v21 = vadd.f32 %v4695_v19, %v14752_v27  ;;  %10882 = vrcp.f32 %v5193_v36 }
 0x769   :  { %v10873_v22 = vpop.eup %10872  ;;  %v7789_v48 = vmul.f32 -1.442695, %v9910_v56  ;;  %10884 = vpow2.f32 %v7786_v6  ;;  %v14779_v6 = vld [vmem:[#allocation17_spill] sm:$0xff] }
 0x76a   :  { %v5195_v7 = vadd.f32 1.0, %v10873_v22  ;;  %v7788_v38 = vmul.f32 -1.442695, %v9911_v21  ;;  %v9265_v45 = vpop.f32.mrb[52].mxu1 }
 0x76b   :  { %10886 = vpow2.f32 %v7789_v48  ;;  %v9912_v37 = vadd.f32 %v9265_v45, %v14753_v5  ;;  %v4705_v15 = vpop.f32.mrb[53].mxu1 }
 0x76c   :  { %10888 = vrcp.f32 %v5192_v33  ;;  %v9913_v42 = vadd.f32 %v4705_v15, %v14754_v63  ;;  %v14780_v33 = vld [vmem:[#allocation18_spill] sm:$0xff] }
 0x76d   :  { %v10875_v52 = vpop.eup %10874  ;;  %10890 = vrcp.f32 %v5195_v7  ;;  %v7791_v60 = vmul.f32 -1.442695, %v9912_v37 }
 0x76e   :  { %v10877_v2 = vpop.eup %10876  ;;  %v5197_v12 = vadd.f32 1.0, %v10875_v52  ;;  %10892 = vpow2.f32 %v7788_v38  ;;  %v7790_v19 = vmul.f32 -1.442695, %v9913_v42  ;;  %v9268_v36 = vpop.f32.mrb[54].mxu1  ;;  %v14781_v52 = vld [vmem:[#allocation21_spill] sm:$0xff] }
 0x76f   :  { %v5196_v56 = vadd.f32 1.0, %v10877_v2  ;;  %10894 = vpow2.f32 %v7791_v60  ;;  %v9914_v21 = vadd.f32 %v9268_v36, %v14779_v6  ;;  %v4715_v22 = vpop.f32.mrb[55].mxu1  ;;  %v10879_v48 = vpop.eup %10878  ;;  %v14782_v6 = vld [vmem:[#allocation22_spill] sm:$0xff] }
 0x770   :  { %10896 = vrcp.f32 %v5197_v12  ;;  %v9915_v5 = vadd.f32 %v4715_v22, %v14780_v33  ;;  %v5194_v2 = vadd.f32 1.0, %v10879_v48 }
 0x771   :  { %v10881_v45 = vpop.eup %10880  ;;  %10898 = vrcp.f32 %v5196_v56 }
 0x772   :  { %v5199_v15 = vadd.f32 1.0, %v10881_v45  ;;  %10900 = vpow2.f32 %v7790_v19  ;;  %v9271_v7 = vpop.f32.mrb[56].mxu1  ;;  %v10883_v37 = vpop.eup %10882  ;;  %v14783_v19 = vld [vmem:[#allocation41_spill] sm:$0xff] }
 0x773   :  { %10902 = vtanh.f32 %v9914_v21  ;;  %v9916_v38 = vadd.f32 %v9271_v7, %v14781_v52  ;;  %v4725_v42 = vpop.f32.mrb[57].mxu1  ;;  %v10885_v63 = vpop.eup %10884  ;;  %v14784_v7 = vld [vmem:[#allocation40_spill] sm:$0xff] }
 0x774   :  { %10904 = vrcp.f32 %v5199_v15  ;;  %v5198_v36 = vadd.f32 1.0, %v10885_v63  ;;  %v9917_v12 = vadd.f32 %v4725_v42, %v14782_v6 }
 0x775   :  { %v10887_v60 = vpop.eup %10886  ;;  %10906 = vtanh.f32 %v9915_v5 }
 0x776   :  { %v10889_v27 = vpop.eup %10888  ;;  %v5201_v56 = vadd.f32 1.0, %v10887_v60  ;;  %10908 = vtanh.f32 %v9916_v38  ;;  %v9282_v22 = vpop.f32.mrb[90].mxu1 }
 0x777   :  { %v10891_v45 = vpop.eup %10890  ;;  %10910 = vrcp.f32 %v5198_v36  ;;  %v9998_v33 = vadd.f32 %v9282_v22, %v14783_v19  ;;  %v4800_v21 = vpop.f32.mrb[91].mxu1 }
 0x778   :  { %v10893_v24 = vpop.eup %10892  ;;  %10912 = vrcp.f32 %v5194_v2  ;;  %v9999_v52 = vadd.f32 %v4800_v21, %v14784_v7  ;;  %v14786_v2 = vld [vmem:[#allocation45_spill] sm:$0xff] }
 0x779   :  { %v10895_v48 = vpop.eup %10894  ;;  %v5200_v15 = vadd.f32 1.0, %v10893_v24  ;;  %10914 = vtanh.f32 %v9917_v12  ;;  %v7753_v63 = vmul.f32 -1.442695, %v9998_v33 }
 0x77a   :  { %v10897_v5 = vpop.eup %10896  ;;  %10916 = vrcp.f32 %v5201_v56  ;;  %v5203_v42 = vadd.f32 1.0, %v10895_v48  ;;  %v7752_v6 = vmul.f32 -1.442695, %v9999_v52  ;;  %v9285_v60 = vpop.f32.mrb[92].mxu1 }
 0x77b   :  { %v10899_v38 = vpop.eup %10898  ;;  %10918 = vrcp.f32 %v5200_v15  ;;  %v10000_v36 = vadd.f32 %v9285_v60, %v14785_v29  ;;  %v4810_v43 = vpop.f32.mrb[93].mxu1  ;;  %v5233_v19 = vmul.f32 %v10897_v5, %v13387_v39  ;;  %v14787_v60 = vld [vmem:[#allocation33_spill] sm:$0xff] }
 0x77c   :  { %v10901_v22 = vpop.eup %10900  ;;  %10920 = vrcp.f32 %v5203_v42  ;;  %v10001_v21 = vadd.f32 %v4810_v43, %v14786_v2  ;;  %v5232_v56 = vmul.f32 %v10899_v38, %v13392_v61 }
 0x77d   :  { %v10903_v7 = vpop.eup %10902  ;;  %v5202_v24 = vadd.f32 1.0, %v10901_v22  ;;  %10922 = vpow2.f32 %v7753_v63  ;;  %v7755_v33 = vmul.f32 -1.442695, %v10000_v36  ;;  %v14789_v63 = vld [vmem:[#allocation42_spill] sm:$0xff] }
 0x77e   :  { %v10905_v12 = vpop.eup %10904  ;;  %v5237_v52 = vmul.f32 %v10903_v7, %v10883_v37  ;;  %10924 = vpow2.f32 %v7752_v6  ;;  %v7754_v48 = vmul.f32 -1.442695, %v10001_v21  ;;  %v9288_v15 = vpop.f32.mrb[94].mxu1  ;;  %v14790_v7 = vld [vmem:[#allocation34_spill] sm:$0xff] }
 0x77f   :  { %v10907_v10 = vpop.eup %10906  ;;  %v5235_v29 = vmul.f32 %v10905_v12, %v14787_v60  ;;  %10926 = vrcp.f32 %v5202_v24  ;;  %v10002_v39 = vadd.f32 %v9288_v15, %v14788_v20  ;;  %v4820_v5 = vpop.f32.mrb[95].mxu1 }
 0x780   :  { %v10909_v42 = vpop.eup %10908  ;;  %v13722_v43 = vadd.f32 %v5237_v52, %v5233_v19  ;;  %v5236_v22 = vmul.f32 %v10907_v10, %v10889_v27  ;;  %10928 = vpow2.f32 %v7755_v33  ;;  %v10003_v36 = vadd.f32 %v4820_v5, %v14789_v63  ;;  %v14792_v10 = vld [vmem:[#allocation46_spill] sm:$0xff] }
 0x781   :  { %v10911_v2 = vpop.eup %10910  ;;  %v5239_v61 = vmul.f32 %v10909_v42, %v10891_v45  ;;  %10930 = vpow2.f32 %v7754_v48  ;;  %v7757_v6 = vmul.f32 -1.442695, %v10002_v39  ;;  %v14793_v48 = vld [vmem:[#allocation47_spill] sm:$0xff] }
 0x782   :  { %v10913_v37 = vpop.eup %10912  ;;  %v5234_v38 = vmul.f32 %v10911_v2, %v14790_v7  ;;  %10932 = vtanh.f32 %v13722_v43  ;;  %v13727_v21 = vadd.f32 %v5236_v22, %v5232_v56  ;;  %v7756_v24 = vmul.f32 -1.442695, %v10003_v36  ;;  %v9291_v12 = vpop.f32.mrb[96].mxu1  ;;  %v14795_v36 = vld [vmem:[#allocation48_spill] sm:$0xff] }
 0x783   :  { %v10915_v15 = vpop.eup %10914  ;;  %v13729_v19 = vadd.f32 %v5239_v61, %v5235_v29  ;;  %10934 = vpow2.f32 %v7757_v6  ;;  %v10004_v27 = vadd.f32 %v9291_v12, %v14792_v10  ;;  %v4830_v33 = vpop.f32.mrb[97].mxu1  ;;  %v14796_v12 = vld [vmem:[#allocation49_spill] sm:$0xff] }
 0x784   :  { %v10917_v52 = vpop.eup %10916  ;;  %10936 = vtanh.f32 %v13727_v21  ;;  %v5238_v45 = vmul.f32 %v10915_v15, %v10913_v37  ;;  %v10005_v60 = vadd.f32 %v4830_v33, %v14793_v48 }
 0x785   :  { %14791 = vst [vmem:[#allocation39_spill] sm:$0xff] %v13729_v19  ;;  %v10919_v2 = vpop.eup %10918  ;;  %10938 = vtanh.f32 %v13729_v19  ;;  %v7759_v56 = vmul.f32 -1.442695, %v10004_v27 }
 0x786   :  { %v10921_v39 = vpop.eup %10920  ;;  %v13735_v5 = vadd.f32 %v5238_v45, %v5234_v38  ;;  %10940 = vpow2.f32 %v7756_v24  ;;  %v7758_v29 = vmul.f32 -1.442695, %v10005_v60  ;;  %v9294_v42 = vpop.f32.mrb[98].mxu1 }
 0x787   :  { %v10923_v22 = vpop.eup %10922  ;;  %10942 = vpow2.f32 %v7759_v56  ;;  %v10006_v61 = vadd.f32 %v9294_v42, %v14795_v36  ;;  %v4840_v6 = vpop.f32.mrb[99].mxu1  ;;  %v14797_v56 = vld [vmem:[#allocation52_spill] sm:$0xff] }
 0x788   :  { %14794 = vst [vmem:[#allocation37_spill] sm:$0xff] %v13735_v5  ;;  %v10925_v7 = vpop.eup %10924  ;;  %10944 = vtanh.f32 %v13735_v5  ;;  %v4916_v37 = vadd.f32 1.0, %v10923_v22  ;;  %v10007_v15 = vadd.f32 %v4840_v6, %v14796_v12 }
 0x789   :  { %v10927_v33 = vpop.eup %10926  ;;  %v4915_v48 = vadd.f32 1.0, %v10925_v7  ;;  %10946 = vpow2.f32 %v7758_v29  ;;  %v7761_v27 = vmul.f32 -1.442695, %v10006_v61 }
 0x78a   :  { %v10929_v38 = vpop.eup %10928  ;;  %v9297_v45 = vpop.f32.mrb[100].mxu1  ;;  %10948 = vrcp.f32 %v4916_v37  ;;  %v7760_v10 = vmul.f32 -1.442695, %v10007_v15 }
 0x78b   :  { %v10931_v24 = vpop.eup %10930  ;;  %v4918_v60 = vadd.f32 1.0, %v10929_v38  ;;  %v10008_v63 = vadd.f32 %v9297_v45, %v14797_v56  ;;  %v4850_v42 = vpop.f32.mrb[101].mxu1  ;;  %10950 = vrcp.f32 %v4915_v48 }
 0x78c   :  { %v10933_v36 = vpop.eup %10932  ;;  %v10009_v5 = vadd.f32 %v4850_v42, %v12514_v23  ;;  %10952 = vpow2.f32 %v7761_v27 }
 0x78d   :  { %v10935_v22 = vpop.eup %10934  ;;  %v7763_v6 = vmul.f32 -1.442695, %v10008_v63  ;;  %v5249_v12 = vmul.f32 %v10933_v36, %v10917_v52  ;;  %10954 = vrcp.f32 %v4918_v60  ;;  %v14798_v60 = vld [vmem:[#allocation51_spill] sm:$0xff] }
 0x78e   :  { %v10937_v7 = vpop.eup %10936  ;;  %v4920_v29 = vadd.f32 1.0, %v10935_v22  ;;  %v7762_v61 = vmul.f32 -1.442695, %v10009_v5  ;;  %v9300_v20 = vpop.f32.mrb[102].mxu1  ;;  %10956 = vpow2.f32 %v7760_v10 }
 0x78f   :  { %v10939_v19 = vpop.eup %10938  ;;  %v4860_v37 = vpop.f32.mrb[103].mxu1  ;;  %v5248_v15 = vmul.f32 %v10937_v7, %v10919_v2  ;;  %v10010_v45 = vadd.f32 %v9300_v20, %v14710_v51 }
 0x790   :  { %v10941_v38 = vpop.eup %10940  ;;  %10958 = vrcp.f32 %v4920_v29  ;;  %v5251_v63 = vmul.f32 %v10939_v19, %v10921_v39  ;;  %v10011_v10 = vadd.f32 %v4860_v37, %v14798_v60  ;;  %v14799_v29 = vld [vmem:[#allocation53_spill] sm:$0xff]  ;;  %v14800_v39 = vld [vmem:[#allocation54_spill] sm:$0xff] }
 0x791   :  { %v10943_v48 = vpop.eup %10942  ;;  %v4919_v56 = vadd.f32 1.0, %v10941_v38  ;;  %10960 = vpow2.f32 %v7763_v6  ;;  %v13743_v42 = vpack.c.bf16 %v5249_v12, %v5248_v15  ;;  %v4917_v38 = vadd.f32 1.0, %v10931_v24 }
 0x792   :  { %v10945_v52 = vpop.eup %10944  ;;  %v4922_v36 = vadd.f32 1.0, %v10943_v48  ;;  %10962 = vpow2.f32 %v7762_v61  ;;  %v9303_v27 = vpop.f32.mrb[104].mxu1 }
 0x793   :  { %v10947_v5 = vpop.eup %10946  ;;  %10964 = vrcp.f32 %v4919_v56  ;;  %v4870_v22 = vpop.f32.mrb[105].mxu1  ;;  %v5250_v2 = vmul.f32 %v10945_v52, %v10927_v33  ;;  %v10012_v20 = vadd.f32 %v9303_v27, %v14799_v29 }
 0x794   :  { %10966 = vrcp.f32 %v4922_v36  ;;  %v4921_v7 = vadd.f32 1.0, %v10947_v5  ;;  %v10949_v51 = vpop.eup %10948  ;;  %v10013_v6 = vadd.f32 %v4870_v22, %v14800_v39 }
 0x795   :  { %10968 = vtanh.f32 %v10010_v45  ;;  %v13747_v12 = vpack.c.bf16 %v5251_v63, %v5250_v2  ;;  %v10951_v19 = vpop.eup %10950 }
 0x796   :  { %10970 = vrcp.f32 %v4921_v7  ;;  %v10953_v61 = vpop.eup %10952 }
 0x797   :  { %10972 = vtanh.f32 %v10011_v10  ;;  %v10955_v56 = vpop.eup %10954  ;;  %v4924_v45 = vadd.f32 1.0, %v10953_v61 }
 0x798   :  { %10974 = vtanh.f32 %v10012_v20  ;;  %v10957_v37 = vpop.eup %10956 }
 0x799   :  { %10976 = vrcp.f32 %v4917_v38  ;;  %v4923_v27 = vadd.f32 1.0, %v10957_v37 }
 0x79a   :  { %v10959_v33 = vpop.eup %10958  ;;  %10978 = vtanh.f32 %v10013_v6 }
 0x79b   :  { %v10961_v15 = vpop.eup %10960  ;;  %v4956_v24 = vmul.f32 %v10959_v33, %v13418_v31  ;;  %10980 = vrcp.f32 %v4924_v45 }
 0x79c   :  { %v10963_v48 = vpop.eup %10962  ;;  %v4926_v20 = vadd.f32 1.0, %v10961_v15  ;;  %10982 = vrcp.f32 %v4923_v27 }
 0x79d   :  { %v10965_v52 = vpop.eup %10964  ;;  %v4925_v37 = vadd.f32 1.0, %v10963_v48 }
 0x79e   :  { %v10967_v36 = vpop.eup %10966  ;;  %v4955_v22 = vmul.f32 %v10965_v52, %v13422_v50 }
 0x79f   :  { %v10969_v63 = vpop.eup %10968  ;;  %v4958_v7 = vmul.f32 %v10967_v36, %v13424_v58 }
 0x7a0   :  { %v10971_v5 = vpop.eup %10970  ;;  %v4960_v2 = vmul.f32 %v10969_v63, %v10949_v51 }
 0x7a1   :  { %v10973_v10 = vpop.eup %10972  ;;  %v4957_v60 = vmul.f32 %v10971_v5, %v13428_v57  ;;  %v13778_v5 = vld [vmem:[%s14494_s5 + $0x8] sm:$0xff] }
 0x7a2   :  { %v10975_v38 = vpop.eup %10974  ;;  %v13753_v6 = vadd.f32 %v4960_v2, %v4956_v24  ;;  %v4959_v39 = vmul.f32 %v10973_v10, %v10951_v19  ;;  %v13794_v2 = vld [vmem:[%s14494_s5 + $0x18] sm:$0xff]  ;;  %v13802_v10 = vld [vmem:[%s14494_s5 + $0x20] sm:$0xff] }
 0x7a3   :  { %v10977_v29 = vpop.eup %10976  ;;  %v4962_v31 = vmul.f32 %v10975_v38, %v10955_v56  ;;  %v13824_v38 = vld [vmem:[%s14494_s5 + $0x38] sm:$0xff] }
 0x7a4   :  { %v10979_v61 = vpop.eup %10978  ;;  %10984 = vtanh.f32 %v13753_v6  ;;  %v13757_v50 = vadd.f32 %v4959_v39, %v4955_v22  ;;  %v13786_v22 = vld [vmem:[%s14494_s5 + $0x10] sm:$0xff] }
 0x7a5   :  { %10986 = vrcp.f32 %v4926_v20  ;;  %v13759_v51 = vadd.f32 %v4962_v31, %v4958_v7  ;;  %v4961_v58 = vmul.f32 %v10979_v61, %v10977_v29  ;;  %v10981_v57 = vpop.eup %10980  ;;  %v13810_v7 = vld [vmem:[%s14494_s5 + $0x28] sm:$0xff]  ;;  %v13817_v20 = vld [vmem:[%s14494_s5 + $0x30] sm:$0xff]  ;;  %v13831_v31 = vld [vmem:[%s14494_s5 + $0x40] sm:$0xff] }
 0x7a6   :  { %10988 = vtanh.f32 %v13757_v50  ;;  %v10983_v56 = vpop.eup %10982  ;;  %v13838_v61 = vld [vmem:[%s14494_s5 + $0x48] sm:$0xff] }
 0x7a7   :  { %10990 = vtanh.f32 %v13759_v51  ;;  %v13763_v19 = vadd.f32 %v4961_v58, %v4957_v60  ;;  %v13852_v58 = vld [vmem:[%s14494_s5 + $0x58] sm:$0xff] }
 0x7a8   :  { %10992 = vrcp.f32 %v4925_v37  ;;  %v13845_v37 = vld [vmem:[%s14494_s5 + $0x50] sm:$0xff] }
 0x7a9   :  { %10994 = vtanh.f32 %v13763_v19 }
 0x7ae   :  { %v10985_v33 = vpop.eup %10984 }
 0x7af   :  { %v10987_v15 = vpop.eup %10986  ;;  %v4972_v48 = vmul.f32 %v10985_v33, %v10981_v57  ;;  %v13859_v57 = vld [vmem:[%s14494_s5 + $0x60] sm:$0xff]  ;;  %v13873_v33 = vld [vmem:[%s14494_s5 + $0x70] sm:$0xff] }
 0x7b0   :  { %v10989_v39 = vpop.eup %10988 }
 0x7b1   :  { %v10991_v52 = vpop.eup %10990  ;;  %v4971_v36 = vmul.f32 %v10989_v39, %v10983_v56  ;;  %v13866_v56 = vld [vmem:[%s14494_s5 + $0x68] sm:$0xff] }
 0x7b2   :  { %v10993_v24 = vpop.eup %10992  ;;  %v4974_v45 = vmul.f32 %v10991_v52, %v10987_v15  ;;  %v13880_v15 = vld [vmem:[%s14494_s5 + $0x78] sm:$0xff] }
 0x7b3   :  { %v10995_v29 = vpop.eup %10994  ;;  %v13766_v63 = vpack.c.bf16 %v4972_v48, %v4971_v36  ;;  %v13887_v48 = vld [vmem:[%s14491_s2] sm:$0xff] }
 0x7b4   :  { %v4973_v27 = vmul.f32 %v10995_v29, %v10993_v24 }
 0x7b5   :  { %9737 = vmatprep.subr.bf16.mxu0 %v13766_v63 }
 0x7b6   :  { %9739 = vmatpush3.bf16.msra.mxu0 %v13766_v63  ;;  %v13770_v60 = vpack.c.bf16 %v4974_v45, %v4973_v27  ;;  %v14810_v27 = vld [vmem:[#allocation16_spill] sm:$0xff] }
 0x7b8   :  { %9741 = vmatprep.subr.bf16.mxu0 %v13770_v60 }
 0x7ba   :  { %9743 = vmatpush3.bf16.msra.mxu0 %v13770_v60 }
 0x7bb   :  { %9745 = vmatprep.subr.bf16.mxu0 %v13743_v42 }
 0x7bd   :  { %9313 = vmatmul.mubr.msk.f32.vlgmr.msra.gmra.mrb[102].mxu0 %vm1792_vm1, %v13778_v5 }
 0x7be   :  { %9747 = vmatpush3.bf16.msra.mxu0 %v13743_v42  ;;  %9315 = vmatprep.mubr.msk.f32.mxu0 %vm1792_vm1, %v13786_v22 }
 0x7bf   :  { %9749 = vmatprep.subr.bf16.mxu0 %v13747_v12 }
 0x7c1   :  { %9316 = vmatmul.mubr.msk.f32.gmra.mrb[104].mxu0 %vm1792_vm1, %v13794_v2 }
 0x7c2   :  { %9751 = vmatpush3.bf16.msra.mxu0 %v13747_v12  ;;  %9318 = vmatprep.mubr.msk.f32.mxu0 %vm1792_vm1, %v13802_v10 }
 0x7c3   :  { %9753 = vmatprep.subr.bf16.mxu0 %v13743_v42 }
 0x7c5   :  { %9319 = vmatmul.mubr.msk.f32.gmra.mrb[106].mxu0 %vm1792_vm1, %v13810_v7 }
 0x7c6   :  { %9321 = vmatprep.mubr.msk.f32.mxu0 %vm1792_vm1, %v13817_v20 }
 0x7c9   :  { %9322 = vmatmul.mubr.msk.f32.gmra.mrb[108].mxu0 %vm1792_vm1, %v13824_v38 }
 0x7ca   :  { %9324 = vmatprep.mubr.msk.f32.mxu0 %vm1792_vm1, %v13831_v31 }
 0x7cd   :  { %9325 = vmatmul.mubr.msk.f32.gmra.mrb[110].mxu0 %vm1792_vm1, %v13838_v61 }
 0x7ce   :  { %9327 = vmatprep.mubr.msk.f32.mxu0 %vm1792_vm1, %v13845_v37 }
 0x7d1   :  { %9328 = vmatmul.mubr.msk.f32.gmra.mrb[112].mxu0 %vm1792_vm1, %v13852_v58 }
 0x7d2   :  { %9330 = vmatprep.mubr.msk.f32.mxu0 %vm1792_vm1, %v13859_v57 }
 0x7d5   :  { %9331 = vmatmul.mubr.msk.f32.gmra.mrb[114].mxu0 %vm1792_vm1, %v13866_v56 }
 0x7d6   :  { %9333 = vmatprep.mubr.msk.f32.mxu0 %vm1792_vm1, %v13873_v33 }
 0x7d9   :  { %9334 = vmatmul.mubr.msk.f32.gmra.mrb[116].mxu0 %vm1792_vm1, %v13880_v15 }
 0x7da   :  { %9344 = vmatprep.mubr.msk.f32.mxu0 %vm1792_vm1, %v13887_v48 }
 0x7dd   :  { %9345 = vmatmul.mubr.msk.f32.vlgmr.msra.gmra.mrb[38].mxu0 %vm1792_vm1, %v13479_v17  ;;  %v13927_v17 = vld [vmem:[%s14493_s4] sm:$0xff] }
 0x7de   :  { %9755 = vmatpush3.bf16.msra.mxu0 %v13743_v42  ;;  %9347 = vmatprep.mubr.msk.f32.mxu0 %vm1792_vm1, %v13487_v34  ;;  %v14801_v34 = vld [vmem:[#allocation38_spill] sm:$0xff]  ;;  %v14809_v42 = vld [vmem:[#allocation13_spill] sm:$0xff] }
 0x7df   :  { %9757 = vmatprep.subr.bf16.mxu0 %v13747_v12 }
 0x7e1   :  { %9348 = vmatmul.mubr.msk.f32.gmra.mrb[40].mxu0 %vm1792_vm1, %v13495_v25 }
 0x7e2   :  { %9759 = vmatpush3.bf16.msra.mxu0 %v13747_v12  ;;  %9350 = vmatprep.mubr.msk.f32.mxu0 %vm1792_vm1, %v13503_v26  ;;  %v14802_v26 = vld [vmem:[#allocation9_spill] sm:$0xff] }
 0x7e5   :  { %9351 = vmatmul.mubr.msk.f32.gmra.mrb[42].mxu0 %vm1792_vm1, %v13510_v28 }
 0x7e6   :  { %9353 = vmatprep.mubr.msk.f32.mxu0 %vm1792_vm1, %v13517_v47 }
 0x7e9   :  { %9354 = vmatmul.mubr.msk.f32.gmra.mrb[44].mxu0 %vm1792_vm1, %v13524_v8  ;;  %v14803_v8 = vld [vmem:[#allocation7_spill] sm:$0xff] }
 0x7ea   :  { %9356 = vmatprep.mubr.msk.f32.mxu0 %vm1792_vm1, %v13531_v59 }
 0x7ed   :  { %9357 = vmatmul.mubr.msk.f32.gmra.mrb[46].mxu0 %vm1792_vm1, %v13538_v62 }
 0x7ee   :  { %9359 = vmatprep.mubr.msk.f32.mxu0 %vm1792_vm1, %v13545_v30 }
 0x7f1   :  { %9360 = vmatmul.mubr.msk.f32.gmra.mrb[48].mxu0 %vm1792_vm1, %v13552_v14 }
 0x7f2   :  { %9362 = vmatprep.mubr.msk.f32.mxu0 %vm1792_vm1, %v13559_v9  ;;  %v14804_v9 = vld [vmem:[#allocation12_spill] sm:$0xff] }
 0x7f5   :  { %9363 = vmatmul.mubr.msk.f32.gmra.mrb[50].mxu0 %vm1792_vm1, %v13566_v49 }
 0x7f6   :  { %9365 = vmatprep.mubr.msk.f32.mxu0 %vm1792_vm1, %v13573_v16 }
 0x7f9   :  { %9366 = vmatmul.mubr.msk.f32.gmra.mrb[52].mxu0 %vm1792_vm1, %v13580_v0 }
 0x7fa   :  { %9376 = vmatprep.mubr.msk.f32.mxu0 %vm1792_vm1, %v13927_v17 }
 0x7fd   :  { %9377 = vmatmul.mubr.msk.f32.vlgmr.msra.gmra.mrb[102].mxu0 %vm1792_vm1, %v13589_v44  ;;  %v14805_v44 = vld [vmem:[#allocation11_spill] sm:$0xff] }
 0x7fe   :  { %9379 = vmatprep.mubr.msk.f32.mxu0 %vm1792_vm1, %v13596_v32 }
 0x801   :  { %9380 = vmatmul.mubr.msk.f32.gmra.mrb[104].mxu0 %vm1792_vm1, %v13603_v3 }
 0x802   :  { %9382 = vmatprep.mubr.msk.f32.mxu0 %vm1792_vm1, %v13610_v54  ;;  %v14806_v54 = vld [vmem:[#allocation10_spill] sm:$0xff] }
 0x805   :  { %9383 = vmatmul.mubr.msk.f32.gmra.mrb[106].mxu0 %vm1792_vm1, %v13617_v46 }
 0x806   :  { %9385 = vmatprep.mubr.msk.f32.mxu0 %vm1792_vm1, %v13624_v18 }
 0x809   :  { %9386 = vmatmul.mubr.msk.f32.gmra.mrb[108].mxu0 %vm1792_vm1, %v13631_v41  ;;  %v14807_v41 = vld [vmem:[#allocation8_spill] sm:$0xff] }
 0x80a   :  { %9388 = vmatprep.mubr.msk.f32.mxu0 %vm1792_vm1, %v13638_v13 }
 0x80d   :  { %9389 = vmatmul.mubr.msk.f32.gmra.mrb[110].mxu0 %vm1792_vm1, %v13645_v55 }
 0x80e   :  { %9391 = vmatprep.mubr.msk.f32.mxu0 %vm1792_vm1, %v13652_v40 }
 0x811   :  { %9392 = vmatmul.mubr.msk.f32.gmra.mrb[112].mxu0 %vm1792_vm1, %v13659_v35 }
 0x812   :  { %9394 = vmatprep.mubr.msk.f32.mxu0 %vm1792_vm1, %v13666_v4 }
 0x815   :  { %9395 = vmatmul.mubr.msk.f32.gmra.mrb[114].mxu0 %vm1792_vm1, %v13673_v53  ;;  %v14808_v53 = vld [vmem:[#allocation14_spill] sm:$0xff] }
 0x816   :  { %9397 = vmatprep.mubr.msk.f32.mxu0 %vm1792_vm1, %v13680_v1 }
 0x819   :  { %9398 = vmatmul.mubr.msk.f32.gmra.mrb[116].mxu0 %vm1792_vm1, %v13687_v11 }
 0x81a   :  { %9504 = vmatprep.mubr.msk.f32.mxu0 %vm1792_vm1, %v14801_v34 }
 0x8b0   :  { %v9346_v25 = vpop.f32.mrb[38].mxu0 }
 0x8b1   :  { %v9918_v28 = vadd.f32 %v9346_v25, %v14802_v26  ;;  %v5318_v47 = vpop.f32.mrb[39].mxu0 }
 0x8b2   :  { %v9919_v59 = vadd.f32 %v5318_v47, %v14803_v8  ;;  %v14811_v47 = vld [vmem:[#allocation15_spill] sm:$0xff] }
 0x8b3   :  { %v7853_v62 = vmul.f32 -1.442695, %v9918_v28 }
 0x8b4   :  { %v7852_v30 = vmul.f32 -1.442695, %v9919_v59  ;;  %v9349_v14 = vpop.f32.mrb[40].mxu0 }
 0x8b5   :  { %10996 = vpow2.f32 %v7853_v62  ;;  %v9920_v49 = vadd.f32 %v9349_v14, %v14804_v9  ;;  %v5328_v16 = vpop.f32.mrb[41].mxu0 }
 0x8b6   :  { %10998 = vpow2.f32 %v7852_v30  ;;  %v9921_v32 = vadd.f32 %v5328_v16, %v14805_v44 }
 0x8b7   :  { %v7855_v0 = vmul.f32 -1.442695, %v9920_v49 }
 0x8b8   :  { %v9352_v3 = vpop.f32.mrb[42].mxu0  ;;  %v7854_v40 = vmul.f32 -1.442695, %v9921_v32 }
 0x8b9   :  { %11000 = vpow2.f32 %v7855_v0  ;;  %v9922_v46 = vadd.f32 %v9352_v3, %v14806_v54  ;;  %v5338_v18 = vpop.f32.mrb[43].mxu0  ;;  %v14812_v0 = vld [vmem:[#allocation19_spill] sm:$0xff] }
 0x8ba   :  { %v9923_v13 = vadd.f32 %v5338_v18, %v14807_v41 }
 0x8bb   :  { %v7857_v55 = vmul.f32 -1.442695, %v9922_v46  ;;  %v14813_v46 = vld [vmem:[#allocation20_spill] sm:$0xff] }
 0x8bc   :  { %v7856_v35 = vmul.f32 -1.442695, %v9923_v13  ;;  %v9355_v4 = vpop.f32.mrb[44].mxu0 }
 0x8bd   :  { %11002 = vpow2.f32 %v7857_v55  ;;  %v9924_v1 = vadd.f32 %v9355_v4, %v14808_v53  ;;  %v5348_v11 = vpop.f32.mrb[45].mxu0 }
 0x8be   :  { %11004 = vpow2.f32 %v7856_v35  ;;  %v9925_v12 = vadd.f32 %v5348_v11, %v14809_v42 }
 0x8bf   :  { %v10997_v39 = vpop.eup %10996  ;;  %v7859_v52 = vmul.f32 -1.442695, %v9924_v1  ;;  %11006 = vpow2.f32 %v7854_v40 }
 0x8c0   :  { %v10999_v36 = vpop.eup %10998  ;;  %v5856_v24 = vadd.f32 1.0, %v10997_v39  ;;  %v7858_v45 = vmul.f32 -1.442695, %v9925_v12  ;;  %v9358_v29 = vpop.f32.mrb[46].mxu0  ;;  %v14814_v12 = vld [vmem:[#allocation17_spill] sm:$0xff] }
 0x8c1   :  { %11008 = vpow2.f32 %v7859_v52  ;;  %v9926_v34 = vadd.f32 %v9358_v29, %v14810_v27  ;;  %v5358_v25 = vpop.f32.mrb[47].mxu0  ;;  %v5855_v28 = vadd.f32 1.0, %v10999_v36 }
 0x8c2   :  { %v9927_v59 = vadd.f32 %v5358_v25, %v14811_v47  ;;  %11010 = vrcp.f32 %v5856_v24 }
 0x8c3   :  { %v11001_v62 = vpop.eup %11000  ;;  %v7861_v30 = vmul.f32 -1.442695, %v9926_v34  ;;  %11012 = vpow2.f32 %v7858_v45  ;;  %v14815_v45 = vld [vmem:[#allocation18_spill] sm:$0xff] }
 0x8c4   :  { %v5858_v14 = vadd.f32 1.0, %v11001_v62  ;;  %v7860_v49 = vmul.f32 -1.442695, %v9927_v59  ;;  %v9361_v16 = vpop.f32.mrb[48].mxu0  ;;  %v14816_v59 = vld [vmem:[#allocation21_spill] sm:$0xff] }
 0x8c5   :  { %11014 = vpow2.f32 %v7861_v30  ;;  %v9928_v32 = vadd.f32 %v9361_v16, %v14812_v0  ;;  %v5368_v3 = vpop.f32.mrb[49].mxu0 }
 0x8c6   :  { %11016 = vrcp.f32 %v5855_v28  ;;  %v9929_v18 = vadd.f32 %v5368_v3, %v14813_v46  ;;  %v14817_v3 = vld [vmem:[#allocation22_spill] sm:$0xff] }
 0x8c7   :  { %v11003_v13 = vpop.eup %11002  ;;  %11018 = vrcp.f32 %v5858_v14  ;;  %v7863_v55 = vmul.f32 -1.442695, %v9928_v32 }
 0x8c8   :  { %v11005_v40 = vpop.eup %11004  ;;  %v5860_v35 = vadd.f32 1.0, %v11003_v13  ;;  %11020 = vpow2.f32 %v7860_v49  ;;  %v7862_v4 = vmul.f32 -1.442695, %v9929_v18  ;;  %v9364_v1 = vpop.f32.mrb[50].mxu0 }
 0x8c9   :  { %v5859_v11 = vadd.f32 1.0, %v11005_v40  ;;  %11022 = vpow2.f32 %v7863_v55  ;;  %v9930_v39 = vadd.f32 %v9364_v1, %v14814_v12  ;;  %v5378_v52 = vpop.f32.mrb[51].mxu0  ;;  %v11007_v36 = vpop.eup %11006  ;;  %v14823_v12 = vld [vmem:[#allocation43_spill] sm:$0xff] }
 0x8ca   :  { %11024 = vrcp.f32 %v5860_v35  ;;  %v9931_v29 = vadd.f32 %v5378_v52, %v14815_v45  ;;  %v5857_v49 = vadd.f32 1.0, %v11007_v36  ;;  %v14819_v52 = vld [vmem:[#allocation40_spill] sm:$0xff] }
 0x8cb   :  { %v11009_v24 = vpop.eup %11008  ;;  %11026 = vrcp.f32 %v5859_v11 }
 0x8cc   :  { %v5862_v34 = vadd.f32 1.0, %v11009_v24  ;;  %11028 = vpow2.f32 %v7862_v4  ;;  %v9367_v25 = vpop.f32.mrb[52].mxu0  ;;  %v11011_v28 = vpop.eup %11010  ;;  %v14818_v4 = vld [vmem:[#allocation41_spill] sm:$0xff] }
 0x8cd   :  { %11030 = vtanh.f32 %v9930_v39  ;;  %v9932_v62 = vadd.f32 %v9367_v25, %v14816_v59  ;;  %v5388_v30 = vpop.f32.mrb[53].mxu0  ;;  %v11013_v14 = vpop.eup %11012 }
 0x8ce   :  { %11032 = vrcp.f32 %v5862_v34  ;;  %v5861_v32 = vadd.f32 1.0, %v11013_v14  ;;  %v9933_v18 = vadd.f32 %v5388_v30, %v14817_v3  ;;  %v14820_v3 = vld [vmem:[#allocation44_spill] sm:$0xff] }
 0x8cf   :  { %v11015_v16 = vpop.eup %11014  ;;  %11034 = vtanh.f32 %v9931_v29 }
 0x8d0   :  { %v11017_v13 = vpop.eup %11016  ;;  %v5864_v55 = vadd.f32 1.0, %v11015_v16  ;;  %11036 = vtanh.f32 %v9932_v62  ;;  %v9378_v40 = vpop.f32.mrb[102].mxu0 }
 0x8d1   :  { %v11019_v35 = vpop.eup %11018  ;;  %11038 = vrcp.f32 %v5861_v32  ;;  %v10014_v1 = vadd.f32 %v9378_v40, %v14818_v4  ;;  %v5463_v11 = vpop.f32.mrb[103].mxu0 }
 0x8d2   :  { %v11021_v39 = vpop.eup %11020  ;;  %11040 = vrcp.f32 %v5857_v49  ;;  %v10015_v24 = vadd.f32 %v5463_v11, %v14819_v52  ;;  %v14821_v49 = vld [vmem:[#allocation45_spill] sm:$0xff] }
 0x8d3   :  { %v11023_v36 = vpop.eup %11022  ;;  %v5863_v34 = vadd.f32 1.0, %v11021_v39  ;;  %11042 = vtanh.f32 %v9933_v18  ;;  %v7825_v25 = vmul.f32 -1.442695, %v10014_v1 }
 0x8d4   :  { %v11025_v29 = vpop.eup %11024  ;;  %11044 = vrcp.f32 %v5864_v55  ;;  %v5866_v30 = vadd.f32 1.0, %v11023_v36  ;;  %v7824_v14 = vmul.f32 -1.442695, %v10015_v24  ;;  %v9381_v16 = vpop.f32.mrb[104].mxu0 }
 0x8d5   :  { %v11027_v62 = vpop.eup %11026  ;;  %11046 = vrcp.f32 %v5863_v34  ;;  %v10016_v32 = vadd.f32 %v9381_v16, %v14820_v3  ;;  %v5473_v59 = vpop.f32.mrb[105].mxu0  ;;  %v5896_v4 = vmul.f32 %v11025_v29, %v13722_v43  ;;  %v14822_v16 = vld [vmem:[#allocation39_spill] sm:$0xff] }
 0x8d6   :  { %v11029_v40 = vpop.eup %11028  ;;  %11048 = vrcp.f32 %v5866_v30  ;;  %v10017_v11 = vadd.f32 %v5473_v59, %v14821_v49  ;;  %v5895_v55 = vmul.f32 %v11027_v62, %v13727_v21 }
 0x8d7   :  { %v11031_v52 = vpop.eup %11030  ;;  %v5865_v39 = vadd.f32 1.0, %v11029_v40  ;;  %11050 = vpow2.f32 %v7825_v25  ;;  %v7827_v18 = vmul.f32 -1.442695, %v10016_v32  ;;  %v14824_v25 = vld [vmem:[#allocation42_spill] sm:$0xff] }
 0x8d8   :  { %v11033_v1 = vpop.eup %11032  ;;  %v5900_v24 = vmul.f32 %v11031_v52, %v11011_v28  ;;  %11052 = vpow2.f32 %v7824_v14  ;;  %v7826_v36 = vmul.f32 -1.442695, %v10017_v11  ;;  %v9384_v34 = vpop.f32.mrb[106].mxu0  ;;  %v14825_v14 = vld [vmem:[#allocation37_spill] sm:$0xff] }
 0x8d9   :  { %v11035_v45 = vpop.eup %11034  ;;  %v5898_v3 = vmul.f32 %v11033_v1, %v14822_v16  ;;  %11054 = vrcp.f32 %v5865_v39  ;;  %v10018_v43 = vadd.f32 %v9384_v34, %v14823_v12  ;;  %v5483_v29 = vpop.f32.mrb[107].mxu0 }
 0x8da   :  { %v11037_v30 = vpop.eup %11036  ;;  %v13987_v59 = vadd.f32 %v5900_v24, %v5896_v4  ;;  %v5899_v40 = vmul.f32 %v11035_v45, %v11017_v13  ;;  %11056 = vpow2.f32 %v7827_v18  ;;  %v10019_v32 = vadd.f32 %v5483_v29, %v14824_v25  ;;  %v14828_v45 = vld [vmem:[#allocation46_spill] sm:$0xff] }
 0x8db   :  { %v11039_v49 = vpop.eup %11038  ;;  %v5902_v21 = vmul.f32 %v11037_v30, %v11019_v35  ;;  %11058 = vpow2.f32 %v7826_v36  ;;  %v7829_v28 = vmul.f32 -1.442695, %v10018_v43  ;;  %v14829_v36 = vld [vmem:[#allocation47_spill] sm:$0xff] }
 0x8dc   :  { %v11041_v52 = vpop.eup %11040  ;;  %v5897_v62 = vmul.f32 %v11039_v49, %v14825_v14  ;;  %11060 = vtanh.f32 %v13987_v59  ;;  %v13992_v11 = vadd.f32 %v5899_v40, %v5895_v55  ;;  %v7828_v39 = vmul.f32 -1.442695, %v10019_v32  ;;  %v9387_v1 = vpop.f32.mrb[108].mxu0  ;;  %v14831_v32 = vld [vmem:[#allocation48_spill] sm:$0xff] }
 0x8dd   :  { %v11043_v34 = vpop.eup %11042  ;;  %v13994_v4 = vadd.f32 %v5902_v21, %v5898_v3  ;;  %11062 = vpow2.f32 %v7829_v28  ;;  %v10020_v13 = vadd.f32 %v9387_v1, %v14828_v45  ;;  %v5493_v18 = vpop.f32.mrb[109].mxu0  ;;  %v14832_v1 = vld [vmem:[#allocation49_spill] sm:$0xff] }
 0x8de   :  { %14826 = vst [vmem:[#allocation23_spill] sm:$0xff] %v13992_v11  ;;  %v11045_v24 = vpop.eup %11044  ;;  %11064 = vtanh.f32 %v13992_v11  ;;  %v5901_v35 = vmul.f32 %v11043_v34, %v11041_v52  ;;  %v10021_v16 = vadd.f32 %v5493_v18, %v14829_v36 }
 0x8df   :  { %14827 = vst [vmem:[#allocation26_spill] sm:$0xff] %v13994_v4  ;;  %v11047_v49 = vpop.eup %11046  ;;  %11066 = vtanh.f32 %v13994_v4  ;;  %v7831_v55 = vmul.f32 -1.442695, %v10020_v13 }
 0x8e0   :  { %v11049_v43 = vpop.eup %11048  ;;  %v14000_v29 = vadd.f32 %v5901_v35, %v5897_v62  ;;  %11068 = vpow2.f32 %v7828_v39  ;;  %v7830_v3 = vmul.f32 -1.442695, %v10021_v16  ;;  %v9390_v30 = vpop.f32.mrb[110].mxu0 }
 0x8e1   :  { %v11051_v40 = vpop.eup %11050  ;;  %11070 = vpow2.f32 %v7831_v55  ;;  %v10022_v21 = vadd.f32 %v9390_v30, %v14831_v32  ;;  %v5503_v28 = vpop.f32.mrb[111].mxu0  ;;  %v14833_v55 = vld [vmem:[#allocation52_spill] sm:$0xff] }
 0x8e2   :  { %14830 = vst [vmem:[#allocation27_spill] sm:$0xff] %v14000_v29  ;;  %v11053_v14 = vpop.eup %11052  ;;  %11072 = vtanh.f32 %v14000_v29  ;;  %v5579_v52 = vadd.f32 1.0, %v11051_v40  ;;  %v10023_v34 = vadd.f32 %v5503_v28, %v14832_v1 }
 0x8e3   :  { %v11055_v18 = vpop.eup %11054  ;;  %v5578_v36 = vadd.f32 1.0, %v11053_v14  ;;  %11074 = vpow2.f32 %v7830_v3  ;;  %v7833_v13 = vmul.f32 -1.442695, %v10022_v21 }
 0x8e4   :  { %v11057_v62 = vpop.eup %11056  ;;  %v9393_v35 = vpop.f32.mrb[112].mxu0  ;;  %11076 = vrcp.f32 %v5579_v52  ;;  %v7832_v45 = vmul.f32 -1.442695, %v10023_v34 }
 0x8e5   :  { %v11059_v39 = vpop.eup %11058  ;;  %v5581_v16 = vadd.f32 1.0, %v11057_v62  ;;  %v10024_v25 = vadd.f32 %v9393_v35, %v14833_v55  ;;  %v5513_v30 = vpop.f32.mrb[113].mxu0  ;;  %11078 = vrcp.f32 %v5578_v36  ;;  %v14834_v35 = vld [vmem:[#allocation50_spill] sm:$0xff] }
 0x8e6   :  { %v11061_v32 = vpop.eup %11060  ;;  %v10025_v29 = vadd.f32 %v5513_v30, %v12514_v23  ;;  %11080 = vpow2.f32 %v7833_v13 }
 0x8e7   :  { %v11063_v40 = vpop.eup %11062  ;;  %v7835_v28 = vmul.f32 -1.442695, %v10024_v25  ;;  %v5912_v1 = vmul.f32 %v11061_v32, %v11045_v24  ;;  %11082 = vrcp.f32 %v5581_v16  ;;  %v14835_v16 = vld [vmem:[#allocation51_spill] sm:$0xff] }
 0x8e8   :  { %v11065_v14 = vpop.eup %11064  ;;  %v5583_v3 = vadd.f32 1.0, %v11063_v40  ;;  %v7834_v21 = vmul.f32 -1.442695, %v10025_v29  ;;  %v9396_v12 = vpop.f32.mrb[114].mxu0  ;;  %11084 = vpow2.f32 %v7832_v45 }
 0x8e9   :  { %v11067_v4 = vpop.eup %11066  ;;  %v5523_v52 = vpop.f32.mrb[115].mxu0  ;;  %v5911_v34 = vmul.f32 %v11065_v14, %v11047_v49  ;;  %v10026_v55 = vadd.f32 %v9396_v12, %v14834_v35 }
 0x8ea   :  { %v11069_v62 = vpop.eup %11068  ;;  %11086 = vrcp.f32 %v5583_v3  ;;  %v5914_v25 = vmul.f32 %v11067_v4, %v11049_v43  ;;  %v10027_v45 = vadd.f32 %v5523_v52, %v14835_v16  ;;  %v14836_v3 = vld [vmem:[#allocation53_spill] sm:$0xff]  ;;  %v14837_v43 = vld [vmem:[#allocation54_spill] sm:$0xff] }
 0x8eb   :  { %v11071_v36 = vpop.eup %11070  ;;  %v5582_v11 = vadd.f32 1.0, %v11069_v62  ;;  %11088 = vpow2.f32 %v7835_v28  ;;  %v14008_v30 = vpack.c.bf16 %v5912_v1, %v5911_v34  ;;  %v5580_v62 = vadd.f32 1.0, %v11059_v39 }
 0x8ec   :  { %v11073_v24 = vpop.eup %11072  ;;  %v5585_v32 = vadd.f32 1.0, %v11071_v36  ;;  %11090 = vpow2.f32 %v7834_v21  ;;  %v9399_v13 = vpop.f32.mrb[116].mxu0 }
 0x8ed   :  { %v11075_v29 = vpop.eup %11074  ;;  %11092 = vrcp.f32 %v5582_v11  ;;  %v5533_v40 = vpop.f32.mrb[117].mxu0  ;;  %v5913_v49 = vmul.f32 %v11073_v24, %v11055_v18  ;;  %v10028_v12 = vadd.f32 %v9399_v13, %v14836_v3 }
 0x8ee   :  { %11094 = vrcp.f32 %v5585_v32  ;;  %v5584_v14 = vadd.f32 1.0, %v11075_v29  ;;  %v11077_v35 = vpop.eup %11076  ;;  %v10029_v28 = vadd.f32 %v5533_v40, %v14837_v43 }
 0x8ef   :  { %11096 = vtanh.f32 %v10026_v55  ;;  %v14012_v1 = vpack.c.bf16 %v5914_v25, %v5913_v49  ;;  %v11079_v4 = vpop.eup %11078 }
 0x8f0   :  { %11098 = vrcp.f32 %v5584_v14  ;;  %v11081_v21 = vpop.eup %11080 }
 0x8f1   :  { %11100 = vtanh.f32 %v10027_v45  ;;  %v11083_v11 = vpop.eup %11082  ;;  %v5587_v55 = vadd.f32 1.0, %v11081_v21 }
 0x8f2   :  { %11102 = vtanh.f32 %v10028_v12  ;;  %v11085_v52 = vpop.eup %11084 }
 0x8f3   :  { %11104 = vrcp.f32 %v5580_v62  ;;  %v5586_v13 = vadd.f32 1.0, %v11085_v52 }
 0x8f4   :  { %v11087_v18 = vpop.eup %11086  ;;  %11106 = vtanh.f32 %v10029_v28 }
 0x8f5   :  { %v11089_v34 = vpop.eup %11088  ;;  %v5619_v39 = vmul.f32 %v11087_v18, %v13753_v6  ;;  %11108 = vrcp.f32 %v5587_v55 }
 0x8f6   :  { %v11091_v36 = vpop.eup %11090  ;;  %v5589_v12 = vadd.f32 1.0, %v11089_v34  ;;  %11110 = vrcp.f32 %v5586_v13 }
 0x8f7   :  { %v11093_v24 = vpop.eup %11092  ;;  %v5588_v52 = vadd.f32 1.0, %v11091_v36 }
 0x8f8   :  { %v11095_v32 = vpop.eup %11094  ;;  %v5618_v40 = vmul.f32 %v11093_v24, %v13757_v50 }
 0x8f9   :  { %v11097_v25 = vpop.eup %11096  ;;  %v5621_v14 = vmul.f32 %v11095_v32, %v13759_v51 }
 0x8fa   :  { %v11099_v29 = vpop.eup %11098  ;;  %v5623_v49 = vmul.f32 %v11097_v25, %v11077_v35 }
 0x8fb   :  { %v11101_v45 = vpop.eup %11100  ;;  %v5620_v16 = vmul.f32 %v11099_v29, %v13763_v19  ;;  %v14153_v29 = vld [vmem:[%s14493_s4 + $0x10] sm:$0xff] }
 0x8fc   :  { %v11103_v62 = vpop.eup %11102  ;;  %v14018_v28 = vadd.f32 %v5623_v49, %v5619_v39  ;;  %v5622_v43 = vmul.f32 %v11101_v45, %v11079_v4  ;;  %v14841_v49 = vld [vmem:[#allocation56_spill] sm:$0xff]  ;;  %v14169_v45 = vld [vmem:[%s14493_s4 + $0x20] sm:$0xff] }
 0x8fd   :  { %v11105_v3 = vpop.eup %11104  ;;  %v5625_v6 = vmul.f32 %v11103_v62, %v11083_v11  ;;  %v14184_v62 = vld [vmem:[%s14493_s4 + $0x30] sm:$0xff] }
 0x8fe   :  { %v11107_v21 = vpop.eup %11106  ;;  %11112 = vtanh.f32 %v14018_v28  ;;  %v14022_v50 = vadd.f32 %v5622_v43, %v5618_v40  ;;  %v14840_v40 = vld [vmem:[#allocation25_spill] sm:$0xff] }
 0x8ff   :  { %11114 = vrcp.f32 %v5589_v12  ;;  %v14024_v35 = vadd.f32 %v5625_v6, %v5621_v14  ;;  %v5624_v51 = vmul.f32 %v11107_v21, %v11105_v3  ;;  %v11109_v19 = vpop.eup %11108  ;;  %v14842_v14 = vld [vmem:[#allocation35_spill] sm:$0xff]  ;;  %v14177_v12 = vld [vmem:[%s14493_s4 + $0x28] sm:$0xff]  ;;  %v14191_v6 = vld [vmem:[%s14493_s4 + $0x38] sm:$0xff] }
 0x900   :  { %11116 = vtanh.f32 %v14022_v50  ;;  %v11111_v11 = vpop.eup %11110  ;;  %v14198_v21 = vld [vmem:[%s14493_s4 + $0x40] sm:$0xff] }
 0x901   :  { %11118 = vtanh.f32 %v14024_v35  ;;  %v14028_v4 = vadd.f32 %v5624_v51, %v5620_v16  ;;  %v14212_v51 = vld [vmem:[%s14493_s4 + $0x50] sm:$0xff] }
 0x902   :  { %11120 = vrcp.f32 %v5588_v52  ;;  %v14205_v52 = vld [vmem:[%s14493_s4 + $0x48] sm:$0xff] }
 0x903   :  { %11122 = vtanh.f32 %v14028_v4 }
 0x908   :  { %v11113_v18 = vpop.eup %11112 }
 0x909   :  { %v11115_v34 = vpop.eup %11114  ;;  %v5635_v36 = vmul.f32 %v11113_v18, %v11109_v19  ;;  %v14219_v19 = vld [vmem:[%s14493_s4 + $0x58] sm:$0xff]  ;;  %v14233_v18 = vld [vmem:[%s14493_s4 + $0x68] sm:$0xff] }
 0x90a   :  { %v11117_v43 = vpop.eup %11116 }
 0x90b   :  { %v11119_v24 = vpop.eup %11118  ;;  %v5634_v32 = vmul.f32 %v11117_v43, %v11111_v11  ;;  %v14226_v11 = vld [vmem:[%s14493_s4 + $0x60] sm:$0xff]  ;;  %v11518_v43 = vmov 0.0  }
 0x90c   :  { %v11121_v39 = vpop.eup %11120  ;;  %v5637_v55 = vmul.f32 %v11119_v24, %v11115_v34  ;;  %v14240_v34 = vld [vmem:[%s14493_s4 + $0x70] sm:$0xff]  ;;  %v6823_v24 = vld [vmem:[%s14496_s7] sm:$0x3] }
 0x90d   :  { %v11123_v3 = vpop.eup %11122  ;;  %v14031_v25 = vpack.c.bf16 %v5635_v36, %v5634_v32  ;;  %v14247_v36 = vld [vmem:[%s14493_s4 + $0x78] sm:$0xff]  ;;  %v14843_v32 = vld [vmem:[#allocation31_spill] sm:$0xff] }
 0x90e   :  { %v5636_v13 = vmul.f32 %v11123_v3, %v11121_v39  ;;  %v14844_v39 = vld [vmem:[#allocation36_spill] sm:$0xff] }
 0x90f   :  { %9761 = vmatprep.subr.bf16.mxu1 %v14031_v25 }
 0x910   :  { %9763 = vmatpush3.bf16.msra.mxu1 %v14031_v25  ;;  %v14035_v16 = vpack.c.bf16 %v5637_v55, %v5636_v13  ;;  %v14845_v55 = vld [vmem:[#allocation32_spill] sm:$0xff] }
 0x912   :  { %9765 = vmatprep.subr.bf16.mxu1 %v14035_v16 }
 0x914   :  { %9767 = vmatpush3.bf16.msra.mxu1 %v14035_v16 }
 0x915   :  { %9769 = vmatprep.subr.bf16.mxu1 %v14008_v30 }
 0x917   :  { %9409 = vmatmul.mubr.msk.f32.vlgmr.msra.gmra.mrb[106].mxu1 %vm1792_vm1, %v13778_v5  ;;  %v11446_v5 = vld [vmem:[%s14491_s2 + $0x8] sm:$0xff] }
 0x918   :  { %9771 = vmatpush3.bf16.msra.mxu1 %v14008_v30  ;;  %9411 = vmatprep.mubr.msk.f32.mxu1 %vm1792_vm1, %v13786_v22  ;;  %v11447_v22 = vld [vmem:[%s14491_s2 + $0x10] sm:$0xff] }
 0x919   :  { %9773 = vmatprep.subr.bf16.mxu1 %v14012_v1 }
 0x91b   :  { %9412 = vmatmul.mubr.msk.f32.gmra.mrb[108].mxu1 %vm1792_vm1, %v13794_v2  ;;  %v11448_v2 = vld [vmem:[%s14491_s2 + $0x18] sm:$0xff] }
 0x91c   :  { %9775 = vmatpush3.bf16.msra.mxu1 %v14012_v1  ;;  %9414 = vmatprep.mubr.msk.f32.mxu1 %vm1792_vm1, %v13802_v10  ;;  %v11449_v10 = vld [vmem:[%s14491_s2 + $0x20] sm:$0xff] }
 0x91d   :  { %9777 = vmatprep.subr.bf16.mxu1 %v14008_v30 }
 0x91f   :  { %9415 = vmatmul.mubr.msk.f32.gmra.mrb[110].mxu1 %vm1792_vm1, %v13810_v7  ;;  %v14838_v7 = vld [vmem:[#allocation24_spill] sm:$0xff] }
 0x920   :  { %9417 = vmatprep.mubr.msk.f32.mxu1 %vm1792_vm1, %v13817_v20  ;;  %v11450_v20 = vld [vmem:[%s14491_s2 + $0x28] sm:$0xff] }
 0x923   :  { %9418 = vmatmul.mubr.msk.f32.gmra.mrb[112].mxu1 %vm1792_vm1, %v13824_v38  ;;  %v11451_v38 = vld [vmem:[%s14491_s2 + $0x30] sm:$0xff] }
 0x924   :  { %9420 = vmatprep.mubr.msk.f32.mxu1 %vm1792_vm1, %v13831_v31  ;;  %v11452_v31 = vld [vmem:[%s14491_s2 + $0x38] sm:$0xff] }
 0x927   :  { %9421 = vmatmul.mubr.msk.f32.gmra.mrb[114].mxu1 %vm1792_vm1, %v13838_v61  ;;  %v11453_v61 = vld [vmem:[%s14491_s2 + $0x40] sm:$0xff] }
 0x928   :  { %9423 = vmatprep.mubr.msk.f32.mxu1 %vm1792_vm1, %v13845_v37  ;;  %v11454_v37 = vld [vmem:[%s14491_s2 + $0x48] sm:$0xff] }
 0x92b   :  { %9424 = vmatmul.mubr.msk.f32.gmra.mrb[116].mxu1 %vm1792_vm1, %v13852_v58  ;;  %v11455_v58 = vld [vmem:[%s14491_s2 + $0x50] sm:$0xff] }
 0x92c   :  { %9426 = vmatprep.mubr.msk.f32.mxu1 %vm1792_vm1, %v13859_v57  ;;  %v11456_v57 = vld [vmem:[%s14491_s2 + $0x58] sm:$0xff] }
 0x92f   :  { %9427 = vmatmul.mubr.msk.f32.gmra.mrb[118].mxu1 %vm1792_vm1, %v13866_v56  ;;  %v11457_v56 = vld [vmem:[%s14491_s2 + $0x60] sm:$0xff] }
 0x930   :  { %9429 = vmatprep.mubr.msk.f32.mxu1 %vm1792_vm1, %v13873_v33  ;;  %v11458_v33 = vld [vmem:[%s14491_s2 + $0x68] sm:$0xff] }
 0x933   :  { %9430 = vmatmul.mubr.msk.f32.gmra.mrb[120].mxu1 %vm1792_vm1, %v13880_v15  ;;  %v11459_v15 = vld [vmem:[%s14491_s2 + $0x70] sm:$0xff] }
 0x934   :  { %9440 = vmatprep.mubr.msk.f32.mxu1 %vm1792_vm1, %v13887_v48  ;;  %v11460_v48 = vld [vmem:[%s14491_s2 + $0x78] sm:$0xff] }
 0x937   :  { %9441 = vmatmul.mubr.msk.f32.vlgmr.msra.gmra.mrb[58].mxu1 %vm1792_vm1, %v11446_v5 }
 0x938   :  { %9779 = vmatpush3.bf16.msra.mxu1 %v14008_v30  ;;  %9443 = vmatprep.mubr.msk.f32.mxu1 %vm1792_vm1, %v11447_v22  ;;  %v14145_v30 = vld [vmem:[%s14493_s4 + $0x8] sm:$0xff] }
 0x939   :  { %9781 = vmatprep.subr.bf16.mxu1 %v14012_v1 }
 0x93b   :  { %9444 = vmatmul.mubr.msk.f32.gmra.mrb[60].mxu1 %vm1792_vm1, %v11448_v2 }
 0x93c   :  { %9783 = vmatpush3.bf16.msra.mxu1 %v14012_v1  ;;  %9446 = vmatprep.mubr.msk.f32.mxu1 %vm1792_vm1, %v11449_v10  ;;  %v14839_v1 = vld [vmem:[#allocation55_spill] sm:$0xff] }
 0x93d   :  { %9801 = vmatprep.subr.bf16.mxu1 %v14838_v7 }
 0x93f   :  { %9447 = vmatmul.mubr.msk.f32.gmra.mrb[62].mxu1 %vm1792_vm1, %v11450_v20 }
 0x940   :  { %9449 = vmatprep.mubr.msk.f32.mxu1 %vm1792_vm1, %v11451_v38 }
 0x943   :  { %9450 = vmatmul.mubr.msk.f32.gmra.mrb[64].mxu1 %vm1792_vm1, %v11452_v31 }
 0x944   :  { %9452 = vmatprep.mubr.msk.f32.mxu1 %vm1792_vm1, %v11453_v61 }
 0x947   :  { %9453 = vmatmul.mubr.msk.f32.gmra.mrb[66].mxu1 %vm1792_vm1, %v11454_v37 }
 0x948   :  { %9455 = vmatprep.mubr.msk.f32.mxu1 %vm1792_vm1, %v11455_v58 }
 0x94b   :  { %9456 = vmatmul.mubr.msk.f32.gmra.mrb[68].mxu1 %vm1792_vm1, %v11456_v57 }
 0x94c   :  { %9458 = vmatprep.mubr.msk.f32.mxu1 %vm1792_vm1, %v11457_v56 }
 0x94f   :  { %9459 = vmatmul.mubr.msk.f32.gmra.mrb[70].mxu1 %vm1792_vm1, %v11458_v33 }
 0x950   :  { %9461 = vmatprep.mubr.msk.f32.mxu1 %vm1792_vm1, %v11459_v15 }
 0x953   :  { %9462 = vmatmul.mubr.msk.f32.gmra.mrb[72].mxu1 %vm1792_vm1, %v11460_v48 }
 0x954   :  { %9472 = vmatprep.mubr.msk.f32.mxu1 %vm1792_vm1, %v13927_v17  ;;  %v14161_v17 = vld [vmem:[%s14493_s4 + $0x18] sm:$0xff] }
 0x957   :  { %9473 = vmatmul.mubr.msk.f32.vlgmr.msra.gmra.mrb[106].mxu1 %vm1792_vm1, %v14145_v30 }
 0x958   :  { %9803 = vmatpush1.bf16.msra.mxu1 %v14839_v1  ;;  %9475 = vmatprep.mubr.msk.f32.mxu1 %vm1792_vm1, %v14153_v29 }
 0x959   :  { %9805 = vmatprep.subr.bf16.mxu1 %v14840_v40 }
 0x95b   :  { %9476 = vmatmul.mubr.msk.f32.gmra.mrb[108].mxu1 %vm1792_vm1, %v14161_v17 }
 0x95c   :  { %9807 = vmatpush1.bf16.msra.mxu1 %v14841_v49  ;;  %9478 = vmatprep.mubr.msk.f32.mxu1 %vm1792_vm1, %v14169_v45 }
 0x95d   :  { %9809 = vmatprep.subr.bf16.mxu1 %v14842_v14 }
 0x95f   :  { %9479 = vmatmul.mubr.msk.f32.gmra.mrb[110].mxu1 %vm1792_vm1, %v14177_v12 }
 0x960   :  { %9481 = vmatprep.mubr.msk.f32.mxu1 %vm1792_vm1, %v14184_v62 }
 0x963   :  { %9482 = vmatmul.mubr.msk.f32.gmra.mrb[112].mxu1 %vm1792_vm1, %v14191_v6 }
 0x964   :  { %9484 = vmatprep.mubr.msk.f32.mxu1 %vm1792_vm1, %v14198_v21 }
 0x967   :  { %9485 = vmatmul.mubr.msk.f32.gmra.mrb[114].mxu1 %vm1792_vm1, %v14205_v52 }
 0x968   :  { %9487 = vmatprep.mubr.msk.f32.mxu1 %vm1792_vm1, %v14212_v51 }
 0x96b   :  { %9488 = vmatmul.mubr.msk.f32.gmra.mrb[116].mxu1 %vm1792_vm1, %v14219_v19 }
 0x96c   :  { %9490 = vmatprep.mubr.msk.f32.mxu1 %vm1792_vm1, %v14226_v11 }
 0x96f   :  { %9491 = vmatmul.mubr.msk.f32.gmra.mrb[118].mxu1 %vm1792_vm1, %v14233_v18 }
 0x970   :  { %9493 = vmatprep.mubr.msk.f32.mxu1 %vm1792_vm1, %v14240_v34 }
 0x973   :  { %9494 = vmatmul.mubr.msk.f32.gmra.mrb[120].mxu1 %vm1792_vm1, %v14247_v36 }
 0x974   :  { %6929 = vmatprep.mubr.f32.mxu1 %v11518_v43 }
 0x977   :  { %7964 = vmatmul.mubr.msk.f32.vlgmr.msra.gmra.mrb[122].mxu1 %vm1792_vm1, %v6823_v24 }
 0x978   :  { %9811 = vmatpush1.bf16.msra.mxu1 %v14843_v32  ;;  %7000 = vmatprep.mubr.f32.mxu1 %v11518_v43 }
 0x979   :  { %9813 = vmatprep.subr.bf16.mxu1 %v14844_v39 }
 0x97c   :  { %9815 = vmatpush1.bf16.msra.mxu1 %v14845_v55 }
 0x97d   :  { %9817 = vmatprep.subr.bf16.mxu1 %v14031_v25 }
 0x97f   :  { %7965 = vmatmul.mubr.msk.f32.vlgmr.msra.gmra.mrb[124].mxu1 %vm1792_vm1, %v6823_v24 }
 0x980   :  { %9819 = vmatpush1.bf16.msra.mxu1 %v13766_v63  ;;  %7071 = vmatprep.mubr.f32.mxu1 %v11518_v43 }
 0x981   :  { %9821 = vmatprep.subr.bf16.mxu1 %v14035_v16 }
 0x984   :  { %9823 = vmatpush1.bf16.msra.mxu1 %v13770_v60 }
 0x987   :  { %7966 = vmatmul.mubr.msk.f32.vlgmr.msra.gmra.mrb[126].mxu1 %vm1792_vm1, %v6823_v24 }
 0x988   :  { %7142 = vmatprep.mubr.f32.mxu1 %v11518_v43 }
 0xa0a   :  { %v9442_v3 = vpop.f32.mrb[58].mxu1 }
 0xa0b   :  { %v9934_v13 = vadd.f32 %v9442_v3, %v14802_v26  ;;  %v5981_v5 = vpop.f32.mrb[59].mxu1 }
 0xa0c   :  { %v9935_v22 = vadd.f32 %v5981_v5, %v14803_v8 }
 0xa0d   :  { %v7925_v2 = vmul.f32 -1.442695, %v9934_v13 }
 0xa0e   :  { %v7924_v25 = vmul.f32 -1.442695, %v9935_v22  ;;  %v9445_v10 = vpop.f32.mrb[60].mxu1 }
 0xa0f   :  { %11124 = vpow2.f32 %v7925_v2  ;;  %v9936_v63 = vadd.f32 %v9445_v10, %v14804_v9  ;;  %v5991_v7 = vpop.f32.mrb[61].mxu1  ;;  %v14846_v10 = vld [vmem:[#allocation17_spill] sm:$0xff] }
 0xa10   :  { %11126 = vpow2.f32 %v7924_v25  ;;  %v9937_v60 = vadd.f32 %v5991_v7, %v14805_v44 }
 0xa11   :  { %v7927_v16 = vmul.f32 -1.442695, %v9936_v63 }
 0xa12   :  { %v9448_v20 = vpop.f32.mrb[62].mxu1  ;;  %v7926_v8 = vmul.f32 -1.442695, %v9937_v60  ;;  %v14847_v60 = vld [vmem:[#allocation18_spill] sm:$0xff] }
 0xa13   :  { %11128 = vpow2.f32 %v7927_v16  ;;  %v9938_v38 = vadd.f32 %v9448_v20, %v14806_v54  ;;  %v6001_v31 = vpop.f32.mrb[63].mxu1 }
 0xa14   :  { %v9939_v26 = vadd.f32 %v6001_v31, %v14807_v41 }
 0xa15   :  { %v7929_v61 = vmul.f32 -1.442695, %v9938_v38 }
 0xa16   :  { %v7928_v37 = vmul.f32 -1.442695, %v9939_v26  ;;  %v9451_v58 = vpop.f32.mrb[64].mxu1  ;;  %v14848_v26 = vld [vmem:[#allocation21_spill] sm:$0xff] }
 0xa17   :  { %11130 = vpow2.f32 %v7929_v61  ;;  %v9940_v57 = vadd.f32 %v9451_v58, %v14808_v53  ;;  %v6011_v9 = vpop.f32.mrb[65].mxu1 }
 0xa18   :  { %11132 = vpow2.f32 %v7928_v37  ;;  %v9941_v56 = vadd.f32 %v6011_v9, %v14809_v42 }
 0xa19   :  { %v11125_v33 = vpop.eup %11124  ;;  %v7931_v44 = vmul.f32 -1.442695, %v9940_v57  ;;  %11134 = vpow2.f32 %v7926_v8 }
 0xa1a   :  { %v11127_v15 = vpop.eup %11126  ;;  %v6519_v48 = vadd.f32 1.0, %v11125_v33  ;;  %v7930_v54 = vmul.f32 -1.442695, %v9941_v56  ;;  %v9454_v1 = vpop.f32.mrb[66].mxu1  ;;  %v14849_v56 = vld [vmem:[#allocation22_spill] sm:$0xff] }
 0xa1b   :  { %11136 = vpow2.f32 %v7931_v44  ;;  %v9942_v41 = vadd.f32 %v9454_v1, %v14810_v27  ;;  %v6021_v40 = vpop.f32.mrb[67].mxu1  ;;  %v6518_v49 = vadd.f32 1.0, %v11127_v15  ;;  %v14850_v1 = vld [vmem:[#allocation41_spill] sm:$0xff] }
 0xa1c   :  { %v9943_v14 = vadd.f32 %v6021_v40, %v14811_v47  ;;  %11138 = vrcp.f32 %v6519_v48 }
 0xa1d   :  { %v11129_v43 = vpop.eup %11128  ;;  %v7933_v53 = vmul.f32 -1.442695, %v9942_v41  ;;  %11140 = vpow2.f32 %v7930_v54 }
 0xa1e   :  { %v6521_v24 = vadd.f32 1.0, %v11129_v43  ;;  %v7932_v42 = vmul.f32 -1.442695, %v9943_v14  ;;  %v9457_v32 = vpop.f32.mrb[68].mxu1  ;;  %v14851_v14 = vld [vmem:[#allocation40_spill] sm:$0xff] }
 0xa1f   :  { %11142 = vpow2.f32 %v7933_v53  ;;  %v9944_v39 = vadd.f32 %v9457_v32, %v14812_v0  ;;  %v6031_v55 = vpop.f32.mrb[69].mxu1 }
 0xa20   :  { %11144 = vrcp.f32 %v6518_v49  ;;  %v9945_v3 = vadd.f32 %v6031_v55, %v14813_v46 }
 0xa21   :  { %v11131_v13 = vpop.eup %11130  ;;  %11146 = vrcp.f32 %v6521_v24  ;;  %v7935_v27 = vmul.f32 -1.442695, %v9944_v39 }
 0xa22   :  { %v11133_v5 = vpop.eup %11132  ;;  %v6523_v22 = vadd.f32 1.0, %v11131_v13  ;;  %11148 = vpow2.f32 %v7932_v42  ;;  %v7934_v47 = vmul.f32 -1.442695, %v9945_v3  ;;  %v9460_v2 = vpop.f32.mrb[70].mxu1 }
 0xa23   :  { %v6522_v25 = vadd.f32 1.0, %v11133_v5  ;;  %11150 = vpow2.f32 %v7935_v27  ;;  %v9946_v63 = vadd.f32 %v9460_v2, %v14846_v10  ;;  %v6041_v7 = vpop.f32.mrb[71].mxu1  ;;  %v11135_v16 = vpop.eup %11134  ;;  %v14852_v27 = vld [vmem:[#allocation44_spill] sm:$0xff] }
 0xa24   :  { %11152 = vrcp.f32 %v6523_v22  ;;  %v9947_v20 = vadd.f32 %v6041_v7, %v14847_v60  ;;  %v6520_v58 = vadd.f32 1.0, %v11135_v16  ;;  %v14854_v60 = vld [vmem:[#allocation23_spill] sm:$0xff] }
 0xa25   :  { %v11137_v0 = vpop.eup %11136  ;;  %11154 = vrcp.f32 %v6522_v25  ;;  %v14853_v25 = vld [vmem:[#allocation45_spill] sm:$0xff] }
 0xa26   :  { %v6525_v46 = vadd.f32 1.0, %v11137_v0  ;;  %11156 = vpow2.f32 %v7934_v47  ;;  %v9463_v38 = vpop.f32.mrb[72].mxu1  ;;  %v11139_v31 = vpop.eup %11138 }
 0xa27   :  { %11158 = vtanh.f32 %v9946_v63  ;;  %v9948_v61 = vadd.f32 %v9463_v38, %v14848_v26  ;;  %v6051_v8 = vpop.f32.mrb[73].mxu1  ;;  %v11141_v37 = vpop.eup %11140 }
 0xa28   :  { %11160 = vrcp.f32 %v6525_v46  ;;  %v6524_v9 = vadd.f32 1.0, %v11141_v37  ;;  %v9949_v33 = vadd.f32 %v6051_v8, %v14849_v56  ;;  %v14855_v8 = vld [vmem:[#allocation26_spill] sm:$0xff] }
 0xa29   :  { %v11143_v57 = vpop.eup %11142  ;;  %11162 = vtanh.f32 %v9947_v20 }
 0xa2a   :  { %v11145_v44 = vpop.eup %11144  ;;  %v6527_v15 = vadd.f32 1.0, %v11143_v57  ;;  %11164 = vtanh.f32 %v9948_v61  ;;  %v9474_v48 = vpop.f32.mrb[106].mxu1 }
 0xa2b   :  { %v11147_v54 = vpop.eup %11146  ;;  %11166 = vrcp.f32 %v6524_v9  ;;  %v10030_v41 = vadd.f32 %v9474_v48, %v14850_v1  ;;  %v6126_v40 = vpop.f32.mrb[107].mxu1 }
 0xa2c   :  { %v11149_v49 = vpop.eup %11148  ;;  %11168 = vrcp.f32 %v6520_v58  ;;  %v10031_v43 = vadd.f32 %v6126_v40, %v14851_v14  ;;  %v14856_v58 = vld [vmem:[#allocation43_spill] sm:$0xff] }
 0xa2d   :  { %v11151_v53 = vpop.eup %11150  ;;  %v6526_v24 = vadd.f32 1.0, %v11149_v49  ;;  %11170 = vtanh.f32 %v9949_v33  ;;  %v7897_v42 = vmul.f32 -1.442695, %v10030_v41 }
 0xa2e   :  { %v11153_v32 = vpop.eup %11152  ;;  %11172 = vrcp.f32 %v6527_v15  ;;  %v6529_v39 = vadd.f32 1.0, %v11151_v53  ;;  %v7896_v55 = vmul.f32 -1.442695, %v10031_v43  ;;  %v9477_v3 = vpop.f32.mrb[108].mxu1  ;;  %v14857_v15 = vld [vmem:[#allocation42_spill] sm:$0xff]  ;;  %v14858_v43 = vld [vmem:[#allocation27_spill] sm:$0xff] }
 0xa2f   :  { %v11155_v13 = vpop.eup %11154  ;;  %11174 = vrcp.f32 %v6526_v24  ;;  %v10032_v5 = vadd.f32 %v9477_v3, %v14852_v27  ;;  %v6136_v22 = vpop.f32.mrb[109].mxu1  ;;  %v6559_v2 = vmul.f32 %v11153_v32, %v13987_v59  ;;  %v14859_v3 = vld [vmem:[#allocation46_spill] sm:$0xff] }
 0xa30   :  { %v11157_v47 = vpop.eup %11156  ;;  %11176 = vrcp.f32 %v6529_v39  ;;  %v10033_v10 = vadd.f32 %v6136_v22, %v14853_v25  ;;  %v6558_v20 = vmul.f32 %v11155_v13, %v14854_v60 }
 0xa31   :  { %v11159_v63 = vpop.eup %11158  ;;  %v6528_v7 = vadd.f32 1.0, %v11157_v47  ;;  %11178 = vpow2.f32 %v7897_v42  ;;  %v7899_v16 = vmul.f32 -1.442695, %v10032_v5  ;;  %v14860_v47 = vld [vmem:[#allocation47_spill] sm:$0xff] }
 0xa32   :  { %v11161_v0 = vpop.eup %11160  ;;  %v6563_v46 = vmul.f32 %v11159_v63, %v11139_v31  ;;  %11180 = vpow2.f32 %v7896_v55  ;;  %v7898_v38 = vmul.f32 -1.442695, %v10033_v10  ;;  %v9480_v26 = vpop.f32.mrb[110].mxu1 }
 0xa33   :  { %v11163_v61 = vpop.eup %11162  ;;  %v6561_v37 = vmul.f32 %v11161_v0, %v14855_v8  ;;  %11182 = vrcp.f32 %v6528_v7  ;;  %v10034_v59 = vadd.f32 %v9480_v26, %v14856_v58  ;;  %v6146_v57 = vpop.f32.mrb[111].mxu1  ;;  %v14862_v8 = vld [vmem:[#allocation49_spill] sm:$0xff] }
 0xa34   :  { %v11165_v9 = vpop.eup %11164  ;;  %v6567_v56 = vadd.f32 %v6563_v46, %v6559_v2  ;;  %v6562_v33 = vmul.f32 %v11163_v61, %v11145_v44  ;;  %11184 = vpow2.f32 %v7899_v16  ;;  %v10035_v48 = vadd.f32 %v6146_v57, %v14857_v15 }
 0xa35   :  { %v11167_v41 = vpop.eup %11166  ;;  %v6565_v40 = vmul.f32 %v11165_v9, %v11147_v54  ;;  %11186 = vpow2.f32 %v7898_v38  ;;  %v7901_v31 = vmul.f32 -1.442695, %v10034_v59 }
 0xa36   :  { %v11169_v49 = vpop.eup %11168  ;;  %v6560_v53 = vmul.f32 %v11167_v41, %v14858_v43  ;;  %11188 = vtanh.f32 %v6567_v56  ;;  %v6566_v24 = vadd.f32 %v6562_v33, %v6558_v20  ;;  %v7900_v42 = vmul.f32 -1.442695, %v10035_v48  ;;  %v9483_v32 = vpop.f32.mrb[112].mxu1  ;;  %v14861_v20 = vld [vmem:[#allocation48_spill] sm:$0xff] }
 0xa37   :  { %v11171_v39 = vpop.eup %11170  ;;  %v6569_v55 = vadd.f32 %v6565_v40, %v6561_v37  ;;  %11190 = vpow2.f32 %v7901_v31  ;;  %v10036_v13 = vadd.f32 %v9483_v32, %v14859_v3  ;;  %v6156_v44 = vpop.f32.mrb[113].mxu1  ;;  %v14863_v31 = vld [vmem:[#allocation52_spill] sm:$0xff] }
 0xa38   :  { %v11173_v5 = vpop.eup %11172  ;;  %11192 = vtanh.f32 %v6566_v24  ;;  %v6564_v22 = vmul.f32 %v11171_v39, %v11169_v49  ;;  %v10037_v54 = vadd.f32 %v6156_v44, %v14860_v47 }
 0xa39   :  { %v11175_v2 = vpop.eup %11174  ;;  %11194 = vtanh.f32 %v6569_v55  ;;  %v7903_v10 = vmul.f32 -1.442695, %v10036_v13 }
 0xa3a   :  { %v11177_v63 = vpop.eup %11176  ;;  %v6568_v7 = vadd.f32 %v6564_v22, %v6560_v53  ;;  %11196 = vpow2.f32 %v7900_v42  ;;  %v7902_v16 = vmul.f32 -1.442695, %v10037_v54  ;;  %v9486_v0 = vpop.f32.mrb[114].mxu1 }
 0xa3b   :  { %v11179_v60 = vpop.eup %11178  ;;  %11198 = vpow2.f32 %v7903_v10  ;;  %v10038_v46 = vadd.f32 %v9486_v0, %v14861_v20  ;;  %v6166_v38 = vpop.f32.mrb[115].mxu1 }
 0xa3c   :  { %v11181_v26 = vpop.eup %11180  ;;  %11200 = vtanh.f32 %v6568_v7  ;;  %v6242_v61 = vadd.f32 1.0, %v11179_v60  ;;  %v10039_v37 = vadd.f32 %v6166_v38, %v14862_v8  ;;  %v14864_v38 = vld [vmem:[#allocation50_spill] sm:$0xff] }
 0xa3d   :  { %v11183_v59 = vpop.eup %11182  ;;  %v6241_v57 = vadd.f32 1.0, %v11181_v26  ;;  %11202 = vpow2.f32 %v7902_v16  ;;  %v7905_v9 = vmul.f32 -1.442695, %v10038_v46 }
 0xa3e   :  { %v11185_v56 = vpop.eup %11184  ;;  %v9489_v33 = vpop.f32.mrb[116].mxu1  ;;  %11204 = vrcp.f32 %v6242_v61  ;;  %v7904_v40 = vmul.f32 -1.442695, %v10039_v37 }
 0xa3f   :  { %v11187_v48 = vpop.eup %11186  ;;  %v6244_v41 = vadd.f32 1.0, %v11185_v56  ;;  %v10040_v49 = vadd.f32 %v9489_v33, %v14863_v31  ;;  %v6176_v43 = vpop.f32.mrb[117].mxu1  ;;  %11206 = vrcp.f32 %v6241_v57  ;;  %v14865_v56 = vld [vmem:[#allocation51_spill] sm:$0xff] }
 0xa40   :  { %v11189_v53 = vpop.eup %11188  ;;  %v10041_v24 = vadd.f32 %v6176_v43, %v12514_v23  ;;  %11208 = vpow2.f32 %v7905_v9 }
 0xa41   :  { %v11191_v42 = vpop.eup %11190  ;;  %v7907_v32 = vmul.f32 -1.442695, %v10040_v49  ;;  %v6575_v39 = vmul.f32 %v11189_v53, %v11173_v5  ;;  %11210 = vrcp.f32 %v6244_v41  ;;  %v6243_v53 = vadd.f32 1.0, %v11187_v48 }
 0xa42   :  { %v11193_v55 = vpop.eup %11192  ;;  %v6246_v13 = vadd.f32 1.0, %v11191_v42  ;;  %v7906_v44 = vmul.f32 -1.442695, %v10041_v24  ;;  %v9492_v22 = vpop.f32.mrb[118].mxu1  ;;  %11212 = vpow2.f32 %v7904_v40 }
 0xa43   :  { %v11195_v54 = vpop.eup %11194  ;;  %v6186_v10 = vpop.f32.mrb[119].mxu1  ;;  %v6574_v7 = vmul.f32 %v11193_v55, %v11175_v2  ;;  %v10042_v26 = vadd.f32 %v9492_v22, %v14864_v38 }
 0xa44   :  { %v11197_v16 = vpop.eup %11196  ;;  %11214 = vrcp.f32 %v6246_v13  ;;  %v6577_v0 = vmul.f32 %v11195_v54, %v11177_v63  ;;  %v10043_v33 = vadd.f32 %v6186_v10, %v14865_v56  ;;  %v14866_v63 = vld [vmem:[#allocation53_spill] sm:$0xff] }
 0xa45   :  { %v11199_v60 = vpop.eup %11198  ;;  %v6245_v46 = vadd.f32 1.0, %v11197_v16  ;;  %11216 = vpow2.f32 %v7907_v32  ;;  %v14297_v61 = vpack.c.bf16 %v6575_v39, %v6574_v7  ;;  %v14303_v32 = vpop.permute.xlu0 %6859  ;;  %v14867_v39 = vld [vmem:[#allocation54_spill] sm:$0xff] }
 0xa46   :  { %v11201_v5 = vpop.eup %11200  ;;  %v6248_v37 = vadd.f32 1.0, %v11199_v60  ;;  %11218 = vpow2.f32 %v7906_v44  ;;  %v9495_v57 = vpop.f32.mrb[120].mxu1 }
 0xa47   :  { %v11203_v9 = vpop.eup %11202  ;;  %11220 = vrcp.f32 %v6245_v46  ;;  %v6196_v41 = vpop.f32.mrb[121].mxu1  ;;  %v6576_v2 = vmul.f32 %v11201_v5, %v11183_v59  ;;  %v10044_v49 = vadd.f32 %v9495_v57, %v14866_v63 }
 0xa48   :  { %11222 = vrcp.f32 %v6248_v37  ;;  %v6247_v40 = vadd.f32 1.0, %v11203_v9  ;;  %v11205_v43 = vpop.eup %11204  ;;  %v10045_v55 = vadd.f32 %v6196_v41, %v14867_v39 }
 0xa49   :  { %11224 = vtanh.f32 %v10042_v26  ;;  %v14301_v24 = vpack.c.bf16 %v6577_v0, %v6576_v2  ;;  %v11207_v42 = vpop.eup %11206 }
 0xa4a   :  { %11226 = vrcp.f32 %v6247_v40  ;;  %v6931_v13 = vpop.f32.mrb[122].mxu1  ;;  %v11209_v44 = vpop.eup %11208 }
 0xa4b   :  { %11228 = vtanh.f32 %v10043_v33  ;;  %v6932_v59 = vadd.f32 %v6931_v13, %v14303_v32  ;;  %v6933_v22 = vpop.f32.mrb[123].mxu1  ;;  %v11211_v54 = vpop.eup %11210  ;;  %v6250_v46 = vadd.f32 1.0, %v11209_v44 }
 0xa4c   :  { %11230 = vtanh.f32 %v10044_v49  ;;  %v6934_v10 = vadd.f32 %v6933_v22, %v14303_v32  ;;  %v11213_v48 = vpop.eup %11212 }
 0xa4d   :  { %11232 = vrcp.f32 %v6243_v53  ;;  %v7968_v7 = vmul.f32 -1.442695, %v6932_v59  ;;  %v6249_v5 = vadd.f32 1.0, %v11213_v48 }
 0xa4e   :  { %v11215_v16 = vpop.eup %11214  ;;  %11234 = vtanh.f32 %v10045_v55  ;;  %v7969_v0 = vmul.f32 -1.442695, %v6934_v10 }
 0xa4f   :  { %v11217_v60 = vpop.eup %11216  ;;  %11236 = vpow2.f32 %v7968_v7  ;;  %v6282_v33 = vmul.f32 %v11215_v16, %v14018_v28 }
 0xa50   :  { %v11219_v26 = vpop.eup %11218  ;;  %v6252_v57 = vadd.f32 1.0, %v11217_v60  ;;  %11238 = vpow2.f32 %v7969_v0 }
 0xa51   :  { %v11221_v37 = vpop.eup %11220  ;;  %v6251_v41 = vadd.f32 1.0, %v11219_v26  ;;  %11240 = vrcp.f32 %v6250_v46 }
 0xa52   :  { %v11223_v9 = vpop.eup %11222  ;;  %v7002_v2 = vpop.f32.mrb[124].mxu1  ;;  %v6281_v13 = vmul.f32 %v11221_v37, %v14022_v50  ;;  %11242 = vrcp.f32 %v6249_v5 }
 0xa53   :  { %v11225_v40 = vpop.eup %11224  ;;  %v7003_v49 = vadd.f32 %v7002_v2, %v14303_v32  ;;  %v7004_v53 = vpop.f32.mrb[125].mxu1  ;;  %v6284_v10 = vmul.f32 %v11223_v9, %v14024_v35  ;;  %11244 = vrcp.f32 %v6252_v57 }
 0xa54   :  { %v11227_v55 = vpop.eup %11226  ;;  %v6286_v44 = vmul.f32 %v11225_v40, %v11205_v43  ;;  %v7005_v59 = vadd.f32 %v7004_v53, %v14303_v32  ;;  %11246 = vrcp.f32 %v6251_v41 }
 0xa55   :  { %v11229_v22 = vpop.eup %11228  ;;  %v7970_v48 = vmul.f32 -1.442695, %v7003_v49  ;;  %v6283_v46 = vmul.f32 %v11227_v55, %v14028_v4 }
 0xa56   :  { %v11231_v28 = vpop.eup %11230  ;;  %v14313_v7 = vadd.f32 %v6286_v44, %v6282_v33  ;;  %v6285_v16 = vmul.f32 %v11229_v22, %v11207_v42  ;;  %v7971_v0 = vmul.f32 -1.442695, %v7005_v59 }
 0xa57   :  { %v11233_v60 = vpop.eup %11232  ;;  %v6288_v26 = vmul.f32 %v11231_v28, %v11211_v54  ;;  %11248 = vpow2.f32 %v7970_v48 }
 0xa58   :  { %v11235_v50 = vpop.eup %11234  ;;  %11250 = vtanh.f32 %v14313_v7  ;;  %v14317_v43 = vadd.f32 %v6285_v16, %v6281_v13 }
 0xa59   :  { %v11237_v5 = vpop.eup %11236  ;;  %v14319_v35 = vadd.f32 %v6288_v26, %v6284_v10  ;;  %v6287_v37 = vmul.f32 %v11235_v50, %v11233_v60  ;;  %11252 = vpow2.f32 %v7971_v0 }
 0xa5a   :  { %11254 = vtanh.f32 %v14317_v43  ;;  %v7173_v57 = vadd.f32 1.0, %v11237_v5  ;;  %v7073_v42 = vpop.f32.mrb[126].mxu1  ;;  %v11239_v9 = vpop.eup %11238 }
 0xa5b   :  { %11256 = vtanh.f32 %v14319_v35  ;;  %v14323_v4 = vadd.f32 %v6287_v37, %v6283_v46  ;;  %v7074_v54 = vadd.f32 %v7073_v42, %v14303_v32  ;;  %v7075_v33 = vpop.f32.mrb[127].mxu1  ;;  %v7174_v41 = vadd.f32 1.0, %v11239_v9  ;;  %v11241_v40 = vpop.eup %11240 }
 0xa5c   :  { %11258 = vrcp.f32 %v7173_v57  ;;  %v7076_v2 = vadd.f32 %v7075_v33, %v14303_v32  ;;  %v11243_v53 = vpop.eup %11242  ;;  %v11519_v57 = vmov 1983009808   ;;  %v7210_v9 = vlaneseq }
 0xa5d   :  { %11260 = vtanh.f32 %v14323_v4  ;;  %v7972_v49 = vmul.f32 -1.442695, %v7074_v54  ;;  %v11245_v13 = vpop.eup %11244  ;;  %v7208_v42 = vunpack.c.l.s4 %v11519_v57 }
 0xa5e   :  { %11262 = vrcp.f32 %v7174_v41  ;;  %v7973_v55 = vmul.f32 -1.442695, %v7076_v2  ;;  %v11247_v44 = vpop.eup %11246 }
 0xa5f   :  { %11264 = vpow2.f32 %v7972_v49 }
 0xa60   :  { %11266 = vpow2.f32 %v7973_v55 }
 0xa61   :  { %v11249_v59 = vpop.eup %11248 }
 0xa62   :  { %v11251_v22 = vpop.eup %11250  ;;  %v7175_v10 = vadd.f32 1.0, %v11249_v59  ;;  %v7211_v59 = vshrl.u32 %v7210_v9, 7  ;;  %v11482_v9 = vld [vmem:[%s14494_s5 + $0x38] sm:$0xff] }
 0xa63   :  { %v11253_v48 = vpop.eup %11252  ;;  %v6298_v28 = vmul.f32 %v11251_v22, %v11241_v40 }
 0xa64   :  { %v11255_v16 = vpop.eup %11254  ;;  %11268 = vrcp.f32 %v7175_v10  ;;  %v7176_v0 = vadd.f32 1.0, %v11253_v48  ;;  %v11476_v48 = vld [vmem:[%s14494_s5 + $0x8] sm:$0xff] }
 0xa65   :  { %v11257_v60 = vpop.eup %11256  ;;  %v6297_v46 = vmul.f32 %v11255_v16, %v11243_v53  ;;  %v11477_v16 = vld [vmem:[%s14494_s5 + $0x10] sm:$0xff] }
 0xa66   :  { %v11259_v26 = vpop.eup %11258  ;;  %11270 = vrcp.f32 %v7176_v0  ;;  %v6300_v50 = vmul.f32 %v11257_v60, %v11245_v13  ;;  %v7209_v13 = vunpack.c.0.s8 %v7208_v42  ;;  %v11480_v42 = vld [vmem:[%s14494_s5 + $0x28] sm:$0xff] }
 0xa67   :  { %v11261_v5 = vpop.eup %11260  ;;  %v14328_v37 = vpack.c.bf16 %v6298_v28, %v6297_v46  ;;  %v11478_v46 = vld [vmem:[%s14494_s5 + $0x18] sm:$0xff] }
 0xa68   :  { %v11263_v54 = vpop.eup %11262  ;;  %v6299_v33 = vmul.f32 %v11261_v5, %v11247_v44  ;;  %v14337_v44 = vsub.s32 %v7209_v13, %v7211_v59  ;;  %v11490_v13 = vld [vmem:[%s14494_s5 + $0x78] sm:$0xff]  ;;  %v11491_v59 = vld [vmem:[%s14493_s4] sm:$0xff] }
 0xa69   :  { %v11265_v41 = vpop.eup %11264  ;;  %9785 = vmatprep.subr.bf16.mxu0 %v14328_v37  ;;  %v7205_v2 = vcombine.low %v11259_v26, %v11263_v54  ;;  %v11483_v54 = vld [vmem:[%s14494_s5 + $0x40] sm:$0xff] }
 0xa6a   :  { %v11267_v40 = vpop.eup %11266  ;;  %v7177_v49 = vadd.f32 1.0, %v11265_v41  ;;  %9787 = vmatpush3.bf16.msra.mxu0 %v14328_v37  ;;  %v14332_v53 = vpack.c.bf16 %v6300_v50, %v6299_v33  ;;  %v11479_v50 = vld [vmem:[%s14494_s5 + $0x20] sm:$0xff]  ;;  %v11484_v33 = vld [vmem:[%s14494_s5 + $0x48] sm:$0xff]  ;;  %v11485_v41 = vld [vmem:[%s14494_s5 + $0x50] sm:$0xff] }
 0xa6b   :  { %v7178_v55 = vadd.f32 1.0, %v11267_v40  ;;  %v7213_v0 = vrot.slane %v7205_v2, %v14337_v44  ;;  %v11486_v2 = vld [vmem:[%s14494_s5 + $0x58] sm:$0xff]  ;;  %v11487_v40 = vld [vmem:[%s14494_s5 + $0x60] sm:$0xff] }
 0xa6c   :  { %11272 = vrcp.f32 %v7177_v49  ;;  %9789 = vmatprep.subr.bf16.mxu0 %v14332_v53  ;;  %v11488_v49 = vld [vmem:[%s14494_s5 + $0x68] sm:$0xff] }
 0xa6d   :  { %11274 = vrcp.f32 %v7178_v55  ;;  %v11489_v55 = vld [vmem:[%s14494_s5 + $0x70] sm:$0xff] }
 0xa6e   :  { %v11269_v22 = vpop.eup %11268  ;;  %9791 = vmatpush3.bf16.msra.mxu0 %v14332_v53 }
 0xa6f   :  { %9793 = vmatprep.subr.bf16.mxu0 %v14297_v61 }
 0xa70   :  { %v11271_v10 = vpop.eup %11270 }
 0xa71   :  { %9505 = vmatmul.mubr.msk.f32.vlgmr.msra.gmra.mrb[118].mxu0 %vm1792_vm1, %v11476_v48  ;;  %v7206_v28 = vcombine.low %v11269_v22, %v11271_v10 }
 0xa72   :  { %9795 = vmatpush3.bf16.msra.mxu0 %v14297_v61  ;;  %9507 = vmatprep.mubr.msk.f32.mxu0 %vm1792_vm1, %v11477_v16 }
 0xa73   :  { %9797 = vmatprep.subr.bf16.mxu0 %v14301_v24  ;;  %v7220_v60 = vrot.slane %v7206_v28, %v14337_v44 }
 0xa75   :  { %9508 = vmatmul.mubr.msk.f32.gmra.mrb[120].mxu0 %vm1792_vm1, %v11478_v46  ;;  %v7221_v26 = vcombine.low %v7213_v0, %v7220_v60 }
 0xa76   :  { %v14355_v61 = vpop.eup %11272  ;;  %9799 = vmatpush3.bf16.msra.mxu0 %v14301_v24  ;;  %9510 = vmatprep.mubr.msk.f32.mxu0 %vm1792_vm1, %v11479_v50  ;;  %v11481_v24 = vld [vmem:[%s14494_s5 + $0x30] sm:$0xff] }
 0xa77   :  { %v14362_v5 = vpop.eup %11274  ;;  %7241 = vst [vmem:[#allocation4] sm:$0xff] %v7221_v26 }
 0xa78   :  { %v7222_v57 = vcombine.low %v14355_v61, %v14362_v5 }
 0xa79   :  { %9511 = vmatmul.mubr.msk.f32.gmra.mrb[122].mxu0 %vm1792_vm1, %v11480_v42 }
 0xa7a   :  { %9513 = vmatprep.mubr.msk.f32.mxu0 %vm1792_vm1, %v11481_v24 }
 0xa7d   :  { %9514 = vmatmul.mubr.msk.f32.gmra.mrb[124].mxu0 %vm1792_vm1, %v11482_v9 }
 0xa7e   :  { %9516 = vmatprep.mubr.msk.f32.mxu0 %vm1792_vm1, %v11483_v54 }
 0xa81   :  { %9517 = vmatmul.mubr.msk.f32.gmra.mrb[126].mxu0 %vm1792_vm1, %v11484_v33 }
 0xa82   :  { %9519 = vmatprep.mubr.msk.f32.mxu0 %vm1792_vm1, %v11485_v41 }
 0xa85   :  { %9520 = vmatmul.mubr.msk.f32.gmra.mrb[128].mxu0 %vm1792_vm1, %v11486_v2 }
 0xa86   :  { %9522 = vmatprep.mubr.msk.f32.mxu0 %vm1792_vm1, %v11487_v40 }
 0xa89   :  { %9523 = vmatmul.mubr.msk.f32.gmra.mrb[130].mxu0 %vm1792_vm1, %v11488_v49 }
 0xa8a   :  { %9525 = vmatprep.mubr.msk.f32.mxu0 %vm1792_vm1, %v11489_v55 }
 0xa8d   :  { %9526 = vmatmul.mubr.msk.f32.gmra.mrb[132].mxu0 %vm1792_vm1, %v11490_v13 }
 0xa8e   :  { %9536 = vmatprep.mubr.msk.f32.mxu0 %vm1792_vm1, %v11491_v59 }
 0xa91   :  { %9537 = vmatmul.mubr.msk.f32.vlgmr.msra.gmra.mrb[118].mxu0 %vm1792_vm1, %v14145_v30 }
 0xa92   :  { %9539 = vmatprep.mubr.msk.f32.mxu0 %vm1792_vm1, %v14153_v29 }
 0xa95   :  { %9540 = vmatmul.mubr.msk.f32.gmra.mrb[120].mxu0 %vm1792_vm1, %v14161_v17 }
 0xa96   :  { %9542 = vmatprep.mubr.msk.f32.mxu0 %vm1792_vm1, %v14169_v45 }
 0xa99   :  { %9543 = vmatmul.mubr.msk.f32.gmra.mrb[122].mxu0 %vm1792_vm1, %v14177_v12 }
 0xa9a   :  { %9545 = vmatprep.mubr.msk.f32.mxu0 %vm1792_vm1, %v14184_v62 }
 0xa9d   :  { %9546 = vmatmul.mubr.msk.f32.gmra.mrb[124].mxu0 %vm1792_vm1, %v14191_v6 }
 0xa9e   :  { %9548 = vmatprep.mubr.msk.f32.mxu0 %vm1792_vm1, %v14198_v21 }
 0xaa1   :  { %9549 = vmatmul.mubr.msk.f32.gmra.mrb[126].mxu0 %vm1792_vm1, %v14205_v52 }
 0xaa2   :  { %9551 = vmatprep.mubr.msk.f32.mxu0 %vm1792_vm1, %v14212_v51 }
 0xaa5   :  { %9552 = vmatmul.mubr.msk.f32.gmra.mrb[128].mxu0 %vm1792_vm1, %v14219_v19 }
 0xaa6   :  { %9554 = vmatprep.mubr.msk.f32.mxu0 %vm1792_vm1, %v14226_v11 }
 0xaa9   :  { %9555 = vmatmul.mubr.msk.f32.gmra.mrb[130].mxu0 %vm1792_vm1, %v14233_v18 }
 0xaaa   :  { %9557 = vmatprep.mubr.msk.f32.mxu0 %vm1792_vm1, %v14240_v34 }
 0xaad   :  { %9558 = vmatmul.mubr.msk.f32.gmra.mrb[132].mxu0 %vm1792_vm1, %v14247_v36 }
 0xb64   :  { %v9538_v30 = vpop.f32.mrb[118].mxu0 }
 0xb65   :  { %v10046_v29 = vadd.f32 %v9538_v30, %v14850_v1  ;;  %v6644_v17 = vpop.f32.mrb[119].mxu0 }
 0xb66   :  { %v10047_v45 = vadd.f32 %v6644_v17, %v14851_v14 }
 0xb67   :  { %v7953_v12 = vmul.f32 -1.442695, %v10046_v29 }
 0xb68   :  { %v7952_v62 = vmul.f32 -1.442695, %v10047_v45  ;;  %v9541_v6 = vpop.f32.mrb[120].mxu0 }
 0xb69   :  { %11276 = vpow2.f32 %v7953_v12  ;;  %v10048_v21 = vadd.f32 %v9541_v6, %v14852_v27  ;;  %v6654_v52 = vpop.f32.mrb[121].mxu0 }
 0xb6a   :  { %11278 = vpow2.f32 %v7952_v62  ;;  %v10049_v19 = vadd.f32 %v6654_v52, %v14853_v25 }
 0xb6b   :  { %v7955_v51 = vmul.f32 -1.442695, %v10048_v21 }
 0xb6c   :  { %v9544_v11 = vpop.f32.mrb[122].mxu0  ;;  %v7954_v14 = vmul.f32 -1.442695, %v10049_v19 }
 0xb6d   :  { %11280 = vpow2.f32 %v7955_v51  ;;  %v10050_v18 = vadd.f32 %v9544_v11, %v14856_v58  ;;  %v6664_v34 = vpop.f32.mrb[123].mxu0 }
 0xb6e   :  { %v10051_v36 = vadd.f32 %v6664_v34, %v14857_v15 }
 0xb6f   :  { %v7957_v1 = vmul.f32 -1.442695, %v10050_v18 }
 0xb70   :  { %v7956_v22 = vmul.f32 -1.442695, %v10051_v36  ;;  %v9547_v10 = vpop.f32.mrb[124].mxu0 }
 0xb71   :  { %11282 = vpow2.f32 %v7957_v1  ;;  %v10052_v48 = vadd.f32 %v9547_v10, %v14859_v3  ;;  %v6674_v27 = vpop.f32.mrb[125].mxu0 }
 0xb72   :  { %11284 = vpow2.f32 %v7956_v22  ;;  %v10053_v28 = vadd.f32 %v6674_v27, %v14860_v47 }
 0xb73   :  { %v11277_v16 = vpop.eup %11276  ;;  %v7959_v25 = vmul.f32 -1.442695, %v10052_v48  ;;  %11286 = vpow2.f32 %v7954_v14 }
 0xb74   :  { %v11279_v0 = vpop.eup %11278  ;;  %v6760_v60 = vadd.f32 1.0, %v11277_v16  ;;  %v7958_v58 = vmul.f32 -1.442695, %v10053_v28  ;;  %v9550_v46 = vpop.f32.mrb[126].mxu0 }
 0xb75   :  { %v6759_v26 = vadd.f32 1.0, %v11279_v0  ;;  %11288 = vpow2.f32 %v7959_v25  ;;  %v10054_v15 = vadd.f32 %v9550_v46, %v14861_v20  ;;  %v6684_v50 = vpop.f32.mrb[127].mxu0 }
 0xb76   :  { %v10055_v42 = vadd.f32 %v6684_v50, %v14862_v8  ;;  %11290 = vrcp.f32 %v6760_v60 }
 0xb77   :  { %v11281_v24 = vpop.eup %11280  ;;  %v7961_v3 = vmul.f32 -1.442695, %v10054_v15  ;;  %11292 = vpow2.f32 %v7958_v58 }
 0xb78   :  { %v6762_v9 = vadd.f32 1.0, %v11281_v24  ;;  %v7960_v47 = vmul.f32 -1.442695, %v10055_v42  ;;  %v9553_v54 = vpop.f32.mrb[128].mxu0  ;;  %11294 = vrcp.f32 %v6759_v26 }
 0xb79   :  { %v10056_v33 = vadd.f32 %v9553_v54, %v14863_v31  ;;  %v6694_v41 = vpop.f32.mrb[129].mxu0  ;;  %11296 = vpow2.f32 %v7961_v3 }
 0xb7a   :  { %v10057_v2 = vadd.f32 %v6694_v41, %v12514_v23  ;;  %11298 = vrcp.f32 %v6762_v9 }
 0xb7b   :  { %v11283_v40 = vpop.eup %11282  ;;  %v7963_v20 = vmul.f32 -1.442695, %v10056_v33  ;;  %11300 = vpow2.f32 %v7960_v47 }
 0xb7c   :  { %v11285_v49 = vpop.eup %11284  ;;  %v6764_v55 = vadd.f32 1.0, %v11283_v40  ;;  %v7962_v8 = vmul.f32 -1.442695, %v10057_v2  ;;  %v9556_v13 = vpop.f32.mrb[130].mxu0 }
 0xb7d   :  { %v6763_v59 = vadd.f32 1.0, %v11285_v49  ;;  %11302 = vpow2.f32 %v7963_v20  ;;  %v10058_v30 = vadd.f32 %v9556_v13, %v14864_v38  ;;  %v6704_v29 = vpop.f32.mrb[131].mxu0  ;;  %v11287_v17 = vpop.eup %11286 }
 0xb7e   :  { %11304 = vrcp.f32 %v6764_v55  ;;  %v10059_v45 = vadd.f32 %v6704_v29, %v14865_v56  ;;  %v6761_v51 = vadd.f32 1.0, %v11287_v17  ;;  %v11492_v17 = vld [vmem:[%s14496_s7] sm:$0x3]  ;;  %s11520_s7 = smov [#allocation4]  }
 0xb7f   :  { %v11289_v31 = vpop.eup %11288  ;;  %11306 = vrcp.f32 %v6763_v59  ;;  %s7249_s23 = sshll.u32 %s11520_s7, 4  ;;  %s7250_s23 = int_to_ptr.vmem [resolvable:$true] %s7249_s23 }
 0xb80   :  { %v6766_v23 = vadd.f32 1.0, %v11289_v31  ;;  %11308 = vpow2.f32 %v7962_v8  ;;  %v9559_v12 = vpop.f32.mrb[132].mxu0  ;;  %v11291_v62 = vpop.eup %11290  ;;  %s11493_s24 = scalar_lea.vmem %s7250_s23, 256  ;;  %p11498_p1 = scmp.lt.s32.totalorder %s7250_s23, %s7250_s23 }
 0xb81   :  { %11310 = vtanh.f32 %v10058_v30  ;;  %v10060_v6 = vadd.f32 %v9559_v12, %v14866_v63  ;;  %v6714_v21 = vpop.f32.mrb[133].mxu0  ;;  %v11293_v52 = vpop.eup %11292  ;;  %p11494_p0 = scmp.ne.s32.totalorder %s7250_s23, %s11493_s24  ;;  %p11499_p2 = scmp.lt.s32.totalorder %s11493_s24, %s11493_s24 }
 0xb82   :  { %11312 = vrcp.f32 %v6766_v23  ;;  %v11295_v19 = vpop.eup %11294  ;;  %v6765_v38 = vadd.f32 1.0, %v11293_v52  ;;  %v10061_v11 = vadd.f32 %v6714_v21, %v14867_v39 }
 0xb83   :  { %11314 = vtanh.f32 %v10059_v45  ;;  %v11297_v18 = vpop.eup %11296  ;;  %p11500_p3 = por %p11499_p2, %p11498_p1 }
 0xb84   :  { %11316 = vtanh.f32 %v10060_v6  ;;  %v11299_v34 = vpop.eup %11298  ;;  %v6768_v10 = vadd.f32 1.0, %v11297_v18 }
 0xb85   :  { %11318 = vrcp.f32 %v6765_v38  ;;  %v11301_v56 = vpop.eup %11300  ;;  %p11501_p4 = pnand %p11500_p3, %p11494_p0 }
 0xb86   :  { %11320 = vrcp.f32 %v6761_v51  ;;  %v6767_v27 = vadd.f32 1.0, %v11301_v56 }
 0xb87   :  { %v11303_v36 = vpop.eup %11302  ;;  %11322 = vtanh.f32 %v10061_v11 }
 0xb88   :  { %v11305_v1 = vpop.eup %11304  ;;  %v6770_v60 = vadd.f32 1.0, %v11303_v36  ;;  %11324 = vrcp.f32 %v6768_v10 }
 0xb89   :  { %v11307_v14 = vpop.eup %11306  ;;  %v6800_v22 = vmul.f32 %v11305_v1, %v14313_v7  ;;  %11326 = vrcp.f32 %v6767_v27 }
 0xb8a   :  { %v11309_v63 = vpop.eup %11308  ;;  %v6799_v16 = vmul.f32 %v11307_v14, %v14317_v43 }
 0xb8b   :  { %v11311_v48 = vpop.eup %11310  ;;  %v6769_v43 = vadd.f32 1.0, %v11309_v63 }
 0xb8c   :  { %v11313_v28 = vpop.eup %11312  ;;  %v6804_v39 = vmul.f32 %v11311_v48, %v11291_v62 }
 0xb8d   :  { %v11315_v25 = vpop.eup %11314  ;;  %v6802_v0 = vmul.f32 %v11313_v28, %v14319_v35 }
 0xb8e   :  { %v11317_v58 = vpop.eup %11316  ;;  %v6808_v46 = vadd.f32 %v6804_v39, %v6800_v22  ;;  %v6803_v26 = vmul.f32 %v11315_v25, %v11295_v19 }
 0xb8f   :  { %v11319_v15 = vpop.eup %11318  ;;  %v6806_v50 = vmul.f32 %v11317_v58, %v11299_v34 }
 0xb90   :  { %v11321_v42 = vpop.eup %11320  ;;  %v6801_v7 = vmul.f32 %v11319_v15, %v14323_v4  ;;  %11328 = vtanh.f32 %v6808_v46  ;;  %v6807_v24 = vadd.f32 %v6803_v26, %v6799_v16 }
 0xb91   :  { %v11323_v3 = vpop.eup %11322  ;;  %11330 = vrcp.f32 %v6770_v60  ;;  %v6810_v9 = vadd.f32 %v6806_v50, %v6802_v0 }
 0xb92   :  { %11332 = vtanh.f32 %v6807_v24  ;;  %v6805_v47 = vmul.f32 %v11323_v3, %v11321_v42  ;;  %v11325_v54 = vpop.eup %11324 }
 0xb93   :  { %11334 = vtanh.f32 %v6810_v9  ;;  %v11327_v33 = vpop.eup %11326 }
 0xb94   :  { %v6809_v35 = vadd.f32 %v6805_v47, %v6801_v7  ;;  %11336 = vrcp.f32 %v6769_v43 }
 0xb96   :  { %11338 = vtanh.f32 %v6809_v35 }
 0xb9a   :  { %v11329_v41 = vpop.eup %11328 }
 0xb9b   :  { %v11331_v2 = vpop.eup %11330  ;;  %v6816_v40 = vmul.f32 %v11329_v41, %v11325_v54 }
 0xb9c   :  { %v11333_v20 = vpop.eup %11332 }
 0xb9d   :  { %v11335_v49 = vpop.eup %11334  ;;  %v6815_v4 = vmul.f32 %v11333_v20, %v11327_v33 }
 0xb9e   :  { %v6818_v55 = vmul.f32 %v11335_v49, %v11331_v2  ;;  %v11337_v8 = vpop.eup %11336 }
 0xb9f   :  { %v9824_v13 = vpack.c.bf16 %v6816_v40, %v6815_v4 }
 0xba0   :  { %v11339_v59 = vpop.eup %11338 }
 0xba1   :  { %9825 = vmatprep.subr.bf16.mxu1 %v9824_v13  ;;  %v6817_v30 = vmul.f32 %v11339_v59, %v11337_v8 }
 0xba2   :  { %9827 = vmatpush1.bf16.msra.mxu1 %v14328_v37 }
 0xba3   :  { %v9828_v29 = vpack.c.bf16 %v6818_v55, %v6817_v30 }
 0xba5   :  { %9829 = vmatprep.subr.bf16.mxu1 %v9828_v29 }
 0xba6   :  { %9831 = vmatpush1.bf16.msra.mxu1 %v14332_v53 }
 0xba9   :  { %7967 = vmatmul.mubr.msk.f32.vlgmr.msra.gmra.mrb[128].mxu1 %vm1792_vm1, %v11492_v17 }
 0xc7c   :  { %v7144_v31 = vpop.f32.mrb[128].mxu1 }
 0xc7d   :  { %v7145_v45 = vadd.f32 %v7144_v31, %v14303_v32  ;;  %v7146_v23 = vpop.f32.mrb[129].mxu1 }
 0xc7e   :  { %v7147_v12 = vadd.f32 %v7146_v23, %v14303_v32  ;;  %v7230_v32 = vrot.slane %v7222_v57, %v14337_v44 }
 0xc7f   :  { %v7974_v62 = vmul.f32 -1.442695, %v7145_v45 }
 0xc80   :  { %v7975_v6 = vmul.f32 -1.442695, %v7147_v12 }
 0xc81   :  { %11340 = vpow2.f32 %v7974_v62 }
 0xc82   :  { %11342 = vpow2.f32 %v7975_v6 }
 0xc8b   :  { %v11341_v37 = vpop.eup %11340 }
 0xc8c   :  { %v11343_v21 = vpop.eup %11342  ;;  %v7179_v52 = vadd.f32 1.0, %v11341_v37 }
 0xc8d   :  { %v7180_v53 = vadd.f32 1.0, %v11343_v21 }
 0xc8e   :  { %11344 = vrcp.f32 %v7179_v52 }
 0xc8f   :  { %11346 = vrcp.f32 %v7180_v53 }
 0xc98   :  { %v11345_v51 = vpop.eup %11344 }
 0xc99   :  { %v11347_v19 = vpop.eup %11346 }
 0xc9a   :  { %v7223_v38 = vcombine.low %v11345_v51, %v11347_v19 }
 0xc9c   :  { %v7237_v11 = vrot.slane %v7223_v38, %v14337_v44 }
 0xc9e   :  { %v7238_v18 = vcombine.low %v7230_v32, %v7237_v11 }
 0xca0   :  { %7242 = vst [vmem:[#allocation4 + $0x8] sm:$0xff] %v7238_v18 }
 0xca1   :  { %11504 = shalt.err (!%p11501_p4)
}
 0xca2   :  { %s11505_s3 = scalar_lea.hbm %s14498_s9, 256 }
 0xca3   :  { %p11506_p5 = scmp.ne.s32.totalorder %s14498_s9, %s11505_s3  ;;  %p11509_p6 = scmp.lt.u32.totalorder %s11505_s3, %s14498_s9 }
 0xca5   :  { %p11511_p7 = pnand %p11509_p6, %p11506_p5 }
 0xca7   :  { %11514 = shalt.err (!%p11511_p7)
}
 0xca8   :  { %7252 = dma.vmem_to_hbm [thread:$0]  %s7250_s23, 256, %s14498_s9, [#allocation5]  }
 0xca9   :  { %11515 = dma.done.wait [#allocation5], 256  }
 0xcaa   :  { %11516 = vsyncadd [#allocation5], 4294967040 }
 0xcab   :  { %7256 = vsyncpa [#allocation5], 1 }

</bundles_post_ra>
